<compile_context>
chip_gen: v6e
topology: v6e:2x2x1
jax: 0.10.0
libtpu: 0.0.40
codegen_flags: <defaults>
</compile_context>

<pallas_src>
import math

import jax
import jax.numpy as jnp
from jax import lax
from jax.experimental import pallas as pl
from jax.experimental.pallas import tpu as pltpu

# ---------------- model hyper-parameters (small, consistent with the module) ---
N_WRITERS = 5
N_TOKENS = 10
D_MODEL = 32
NHEAD = 4
NUM_DECODER_LAYERS = 2
DIM_FEEDFORWARD = 64
MAX_SEQ_LENGTH = 16          # must equal past-stroke length (decoding_mask size)
NUM_MIXTURE = 4

HEAD_DIM = D_MODEL // NHEAD
LN_EPS = 1e-5
MM_DTYPE = jnp.bfloat16      # MXU-operand dtype; accumulation stays float32
NEG_INF = -1e9               # finite mask constant (safe with low-precision operands)
HEAD_OUT = NUM_MIXTURE * 5 + 3   # merged gauss(20) + presence(3) = 23
HEAD_OUT_PAD = 128               # pad merged head to a lane-dense output slab


# ----------------------------- in-kernel helpers --------------------------------
def _linear(x, w, b=None):
    """y = x @ w.T (+ b); w in PyTorch nn.Linear (out, in) convention."""
    y = lax.dot_general(x.astype(MM_DTYPE), w.astype(MM_DTYPE),
                        (((1,), (1,)), ((), ())),
                        preferred_element_type=jnp.float32)
    return y if b is None else y + b


def _layer_norm(v, g, b):
    mu = jnp.mean(v, axis=-1, keepdims=True)
    var = jnp.mean((v - mu) ** 2, axis=-1, keepdims=True)
    return (v - mu) * lax.rsqrt(var + LN_EPS) * g + b


def _attend(q, k, v, bias):
    """softmax(q k^T / sqrt(hd) + bias) @ v for one (batch element, head)."""
    s = lax.dot_general(q.astype(MM_DTYPE), k.astype(MM_DTYPE),
                        (((1,), (1,)), ((), ())),
                        preferred_element_type=jnp.float32)
    s = s * (1.0 / math.sqrt(HEAD_DIM))
    if bias is not None:
        s = s + bias
    s = s - jnp.max(s, axis=-1, keepdims=True)
    p = jnp.exp(s)
    p = p * pl.reciprocal(jnp.sum(p, axis=-1, keepdims=True), approx=True)
    return jnp.dot(p.astype(MM_DTYPE), v.astype(MM_DTYPE),
                   preferred_element_type=jnp.float32)


# ----------------------------------- kernel -------------------------------------
def stroke_transformer_kernel(
    mem_ref, strokes_ref, pos_out_ref, causal_ref, membias_ref,
    pse_w1_ref, pse_b1_ref, pse_w2_ref, pse_b2_ref,
    sa_in_w_ref, sa_in_b_ref, sa_out_w_ref, sa_out_b_ref,
    ca_q_w_ref, ca_q_b_ref, ca_kv_w_ref, ca_kv_b_ref, ca_out_w_ref, ca_out_b_ref,
    ff_w1_ref, ff_b1_ref, ff_w2_ref, ff_b2_ref,
    ln1_g_ref, ln1_b_ref, ln2_g_ref, ln2_b_ref, ln3_g_ref, ln3_b_ref,
    head_w_ref, head_b_ref,
    out_ref,
    attn_buf,                        # VMEM scratch (B_tile*T, D)
):
    Bt, T, _ = strokes_ref.shape
    S = mem_ref.shape[1]
    D = D_MODEL

    strokes = strokes_ref[...].reshape(Bt * T, 3)
    mem = mem_ref[...].reshape(Bt * S, D)
    causal = causal_ref[...]          # (T, T) additive causal bias
    mem_bias = membias_ref[...]       # (1, S) 0 for valid keys / NEG_INF for padding

    # past_stroke_embedder: Linear(3,D) -> ReLU -> Linear(D,D), + pos enc
    h = jnp.maximum(_linear(strokes, pse_w1_ref[...], pse_b1_ref[...]), 0.0)
    x = _linear(h, pse_w2_ref[...], pse_b2_ref[...])
    x = (x.reshape(Bt, T, D) + pos_out_ref[...][None]).reshape(Bt * T, D)

    # TODO(synk): dropout layers in TransformerDecoderLayer are identity (eval-mode forward).
    for l in range(NUM_DECODER_LAYERS):      # post-LN decoder layer (norm_first=False)
        # ---- self-attention: one fused QKV matmul, one out-proj matmul ----
        qkv = _linear(x, sa_in_w_ref[l], sa_in_b_ref[l])          # (Bt*T, 3D)
        for b in range(Bt):
            r = b * T
            for hh in range(NHEAD):
                c = hh * HEAD_DIM
                q = qkv[r:r + T, c:c + HEAD_DIM]
                k = qkv[r:r + T, D + c:D + c + HEAD_DIM]
                v = qkv[r:r + T, 2 * D + c:2 * D + c + HEAD_DIM]
                attn_buf[r:r + T, c:c + HEAD_DIM] = _attend(q, k, v, causal)
        sa = _linear(attn_buf[...], sa_out_w_ref[l], sa_out_b_ref[l])
        x = _layer_norm(x + sa, ln1_g_ref[l], ln1_b_ref[l])

        # ---- cross-attention: Q / KV projections batch-folded ----
        cq = _linear(x, ca_q_w_ref[l], ca_q_b_ref[l])             # (Bt*T, D)
        ckv = _linear(mem, ca_kv_w_ref[l], ca_kv_b_ref[l])        # (Bt*S, 2D)
        for b in range(Bt):
            rq = b * T
            rk = b * S
            for hh in range(NHEAD):
                c = hh * HEAD_DIM
                q = cq[rq:rq + T, c:c + HEAD_DIM]
                k = ckv[rk:rk + S, c:c + HEAD_DIM]
                v = ckv[rk:rk + S, D + c:D + c + HEAD_DIM]
                attn_buf[rq:rq + T, c:c + HEAD_DIM] = _attend(q, k, v, mem_bias)
        ca = _linear(attn_buf[...], ca_out_w_ref[l], ca_out_b_ref[l])
        x = _layer_norm(x + ca, ln2_g_ref[l], ln2_b_ref[l])

        # ---- feed-forward ----
        ff = jnp.maximum(_linear(x, ff_w1_ref[l], ff_b1_ref[l]), 0.0)
        ff = _linear(ff, ff_w2_ref[l], ff_b2_ref[l])
        x = _layer_norm(x + ff, ln3_g_ref[l], ln3_b_ref[l])

    # merged gaussian+presence heads -> single lane-dense (.., 128) store
    y = _linear(x, head_w_ref[...], head_b_ref[...])              # (Bt*T, 128)
    out_ref[...] = y.reshape(Bt, T, HEAD_OUT_PAD).astype(out_ref.dtype)


# ---------------------------------- wrapper --------------------------------------
def stroke_transformer_forward(params, writer_tags, text_tokens, past_strokes,
                               *, batch_tile=None):
    B, T, _ = past_strokes.shape
    assert T == MAX_SEQ_LENGTH, "decoding_mask size requires T == max_seq_length"
    s_text = text_tokens.shape[1]
    S = s_text + 1
    S_pad = ((S + 7) // 8) * 8          # pad memory length to a sublane multiple

    if batch_tile is None:
        # Keep >=2 grid steps when possible so both v7x TensorCores get work;
        # on v5e/v6e the extra ~0.35us grid step is negligible.
        batch_tile = B // 2 if (B % 2 == 0 and B >= 2) else B
    assert B % batch_tile == 0
    grid = (B // batch_tile,)

    D, M = D_MODEL, NUM_MIXTURE

    # ------- plain-JAX glue: embedding gathers, positional add, concat, padding ----
    writer_emb = params["writer_embedding"][writer_tags]                    # (B, D)
    token_emb = (params["token_embedding"][text_tokens]
                 + params["pos_in"][None, :s_text, :])                      # (B, St, D)
    seq_emb = jnp.concatenate([writer_emb[:, None, :], token_emb], axis=1)  # (B, S, D)
    seq_emb = jnp.pad(seq_emb, ((0, 0), (0, S_pad - S), (0, 0))).astype(MM_DTYPE)
    pos_out = params["pos_out"][:T, :]

    # mask / key-padding bias tables hoisted out of the kernel
    row = lax.broadcasted_iota(jnp.int32, (T, T), 0)
    col = lax.broadcasted_iota(jnp.int32, (T, T), 1)
    causal_bias = jnp.where(col > row, NEG_INF, 0.0).astype(jnp.float32)
    key_idx = lax.broadcasted_iota(jnp.int32, (1, S_pad), 1)
    mem_key_bias = jnp.where(key_idx < S, 0.0, NEG_INF).astype(jnp.float32)

    bf = lambda a: a.astype(MM_DTYPE)
    # split cross-attn in_proj into Q / KV parts (avoids in-kernel weight slicing)
    ca_q_w = bf(params["ca_in_w"][:, :D, :])
    ca_kv_w = bf(params["ca_in_w"][:, D:, :])
    ca_q_b = params["ca_in_b"][:, :, :D]
    ca_kv_b = params["ca_in_b"][:, :, D:]
    # merge + lane-pad the two output heads
    head_w = jnp.concatenate([params["gauss_w"], params["pres_w"]], axis=0)   # (23, D)
    head_w = bf(jnp.pad(head_w, ((0, HEAD_OUT_PAD - HEAD_OUT), (0, 0))))
    head_b = jnp.concatenate([params["gauss_b"], params["pres_b"]], axis=1)   # (1, 23)
    head_b = jnp.pad(head_b, ((0, 0), (0, HEAD_OUT_PAD - HEAD_OUT)))

    weight_args = [
        bf(params["pse_w1"]), params["pse_b1"], bf(params["pse_w2"]), params["pse_b2"],
        bf(params["sa_in_w"]), params["sa_in_b"], bf(params["sa_out_w"]), params["sa_out_b"],
        ca_q_w, ca_q_b, ca_kv_w, ca_kv_b, bf(params["ca_out_w"]), params["ca_out_b"],
        bf(params["ff_w1"]), params["ff_b1"], bf(params["ff_w2"]), params["ff_b2"],
        params["ln1_g"], params["ln1_b"], params["ln2_g"], params["ln2_b"],
        params["ln3_g"], params["ln3_b"],
        head_w, head_b,
    ]

    def batch_spec(shape):
        nd = len(shape)
        return pl.BlockSpec((batch_tile,) + tuple(shape[1:]),
                            lambda i, nd=nd: (i,) + (0,) * (nd - 1))

    def bcast_spec(shape):
        nd = len(shape)
        return pl.BlockSpec(tuple(shape), lambda i, nd=nd: (0,) * nd)

    in_specs = ([batch_spec(seq_emb.shape),
                 batch_spec(past_strokes.shape),
                 bcast_spec(pos_out.shape),
                 bcast_spec(causal_bias.shape),
                 bcast_spec(mem_key_bias.shape)]
                + [bcast_spec(w.shape) for w in weight_args])

    out_shape = jax.ShapeDtypeStruct((B, T, HEAD_OUT_PAD), jnp.float32)
    out_specs = batch_spec((B, T, HEAD_OUT_PAD))

    head_out = pl.pallas_call(
        stroke_transformer_kernel,
        out_shape=out_shape,
        grid_spec=pltpu.PrefetchScalarGridSpec(
            num_scalar_prefetch=0,
            grid=grid,
            in_specs=in_specs,
            out_specs=out_specs,
            scratch_shapes=[pltpu.VMEM((batch_tile * T, D_MODEL), jnp.float32)],
        ),
        compiler_params=pltpu.CompilerParams(
            dimension_semantics=("parallel",)),
    )(seq_emb, past_strokes, pos_out, causal_bias, mem_key_bias, *weight_args)

    gaussian_params = head_out[..., :M * 5].reshape(B, T, M, 5)
    presence_logits = head_out[..., M * 5:HEAD_OUT]
    return gaussian_params, presence_logits


# ------------------------------ parameter init -----------------------------------
def init_params(key):
    keys = list(jax.random.split(key, 32))
    it = iter(keys)

    def nrm(shape, scale=0.1):
        return scale * jax.random.normal(next(it), shape, dtype=jnp.float32)

    D, F, L, M = D_MODEL, DIM_FEEDFORWARD, NUM_DECODER_LAYERS, NUM_MIXTURE
    return dict(
        writer_embedding=nrm((N_WRITERS, D)),
        token_embedding=nrm((N_TOKENS, D)),
        pos_in=nrm((MAX_SEQ_LENGTH, D), 0.02),   # nn.Parameter (zeros in __init__)
        pos_out=nrm((MAX_SEQ_LENGTH, D), 0.02),  # randomized here (synthetic weights)
        pse_w1=nrm((D, 3)), pse_b1=nrm((1, D)),
        pse_w2=nrm((D, D)), pse_b2=nrm((1, D)),
        sa_in_w=nrm((L, 3 * D, D)), sa_in_b=nrm((L, 1, 3 * D)),
        sa_out_w=nrm((L, D, D)), sa_out_b=nrm((L, 1, D)),
        ca_in_w=nrm((L, 3 * D, D)), ca_in_b=nrm((L, 1, 3 * D)),
        ca_out_w=nrm((L, D, D)), ca_out_b=nrm((L, 1, D)),
        ff_w1=nrm((L, F, D)), ff_b1=nrm((L, 1, F)),
        ff_w2=nrm((L, D, F)), ff_b2=nrm((L, 1, D)),
        ln1_g=jnp.ones((L, 1, D), jnp.float32), ln1_b=jnp.zeros((L, 1, D), jnp.float32),
        ln2_g=jnp.ones((L, 1, D), jnp.float32), ln2_b=jnp.zeros((L, 1, D), jnp.float32),
        ln3_g=jnp.ones((L, 1, D), jnp.float32), ln3_b=jnp.zeros((L, 1, D), jnp.float32),
        gauss_w=nrm((M * 5, D)), gauss_b=nrm((1, M * 5)),
        pres_w=nrm((3, D)), pres_b=nrm((1, 3)),
    )


# ------------------------------------ main ----------------------------------------
if __name__ == "__main__":
    key = jax.random.PRNGKey(0)
    pkey, k1, k2, k3 = jax.random.split(key, 4)
    params = init_params(pkey)

    B = 2
    S_TEXT = 8
    writer_tags = jax.random.randint(k1, (B,), 0, N_WRITERS)
    text_tokens = jax.random.randint(k2, (B, S_TEXT), 0, N_TOKENS)
    past_strokes = jax.random.normal(k3, (B, MAX_SEQ_LENGTH, 3), dtype=jnp.float32)

    fwd = jax.jit(stroke_transformer_forward)
    gaussian_params, presence_logits = fwd(params, writer_tags, text_tokens, past_strokes)
    jax.block_until_ready((gaussian_params, presence_logits))

    assert gaussian_params.shape == (B, MAX_SEQ_LENGTH, NUM_MIXTURE, 5)
    assert presence_logits.shape == (B, MAX_SEQ_LENGTH, 3)
    assert bool(jnp.all(jnp.isfinite(gaussian_params)))
    assert bool(jnp.all(jnp.isfinite(presence_logits)))
    print("KERNEL_OK")
</pallas_src>

<mosaic_0001>
module attributes {stable_mosaic.version = 11 : i64} {
  func.func @stroke_transformer_kernel(%arg0: i32, %arg1: memref<1x16x32xbf16, #tpu.memory_space<vmem>>, %arg2: memref<1x16x3xf32, #tpu.memory_space<vmem>>, %arg3: memref<16x32xf32, #tpu.memory_space<vmem>>, %arg4: memref<16x16xf32, #tpu.memory_space<vmem>>, %arg5: memref<1x16xf32, #tpu.memory_space<vmem>>, %arg6: memref<32x3xbf16, #tpu.memory_space<vmem>>, %arg7: memref<1x32xf32, #tpu.memory_space<vmem>>, %arg8: memref<32x32xbf16, #tpu.memory_space<vmem>>, %arg9: memref<1x32xf32, #tpu.memory_space<vmem>>, %arg10: memref<2x96x32xbf16, #tpu.memory_space<vmem>>, %arg11: memref<2x1x96xf32, #tpu.memory_space<vmem>>, %arg12: memref<2x32x32xbf16, #tpu.memory_space<vmem>>, %arg13: memref<2x1x32xf32, #tpu.memory_space<vmem>>, %arg14: memref<2x32x32xbf16, #tpu.memory_space<vmem>>, %arg15: memref<2x1x32xf32, #tpu.memory_space<vmem>>, %arg16: memref<2x64x32xbf16, #tpu.memory_space<vmem>>, %arg17: memref<2x1x64xf32, #tpu.memory_space<vmem>>, %arg18: memref<2x32x32xbf16, #tpu.memory_space<vmem>>, %arg19: memref<2x1x32xf32, #tpu.memory_space<vmem>>, %arg20: memref<2x64x32xbf16, #tpu.memory_space<vmem>>, %arg21: memref<2x1x64xf32, #tpu.memory_space<vmem>>, %arg22: memref<2x32x64xbf16, #tpu.memory_space<vmem>>, %arg23: memref<2x1x32xf32, #tpu.memory_space<vmem>>, %arg24: memref<2x1x32xf32, #tpu.memory_space<vmem>>, %arg25: memref<2x1x32xf32, #tpu.memory_space<vmem>>, %arg26: memref<2x1x32xf32, #tpu.memory_space<vmem>>, %arg27: memref<2x1x32xf32, #tpu.memory_space<vmem>>, %arg28: memref<2x1x32xf32, #tpu.memory_space<vmem>>, %arg29: memref<2x1x32xf32, #tpu.memory_space<vmem>>, %arg30: memref<128x32xbf16, #tpu.memory_space<vmem>>, %arg31: memref<1x128xf32, #tpu.memory_space<vmem>>, %arg32: memref<1x16x128xf32, #tpu.memory_space<vmem>>, %arg33: memref<16x32xf32, #tpu.memory_space<vmem>>) attributes {dimension_semantics = [#tpu.dimension_semantics<parallel>], iteration_bounds = array<i64: 2>, scalar_prefetch = 0 : i64, scratch_operands = 1 : i64, tpu.core_type = #tpu.core_type<tc>, window_params = [{transform_indices = @transform_0, window_bounds = array<i64: 1, 16, 32>}, {transform_indices = @transform_1, window_bounds = array<i64: 1, 16, 3>}, {pipeline_mode = #tpu.pipeline_mode<synchronous>, transform_indices = @transform_2, window_bounds = array<i64: 16, 32>}, {pipeline_mode = #tpu.pipeline_mode<synchronous>, transform_indices = @transform_3, window_bounds = array<i64: 16, 16>}, {pipeline_mode = #tpu.pipeline_mode<synchronous>, transform_indices = @transform_4, window_bounds = array<i64: 1, 16>}, {pipeline_mode = #tpu.pipeline_mode<synchronous>, transform_indices = @transform_5, window_bounds = array<i64: 32, 3>}, {pipeline_mode = #tpu.pipeline_mode<synchronous>, transform_indices = @transform_6, window_bounds = array<i64: 1, 32>}, {pipeline_mode = #tpu.pipeline_mode<synchronous>, transform_indices = @transform_7, window_bounds = array<i64: 32, 32>}, {pipeline_mode = #tpu.pipeline_mode<synchronous>, transform_indices = @transform_8, window_bounds = array<i64: 1, 32>}, {pipeline_mode = #tpu.pipeline_mode<synchronous>, transform_indices = @transform_9, window_bounds = array<i64: 2, 96, 32>}, {pipeline_mode = #tpu.pipeline_mode<synchronous>, transform_indices = @transform_10, window_bounds = array<i64: 2, 1, 96>}, {pipeline_mode = #tpu.pipeline_mode<synchronous>, transform_indices = @transform_11, window_bounds = array<i64: 2, 32, 32>}, {pipeline_mode = #tpu.pipeline_mode<synchronous>, transform_indices = @transform_12, window_bounds = array<i64: 2, 1, 32>}, {pipeline_mode = #tpu.pipeline_mode<synchronous>, transform_indices = @transform_13, window_bounds = array<i64: 2, 32, 32>}, {pipeline_mode = #tpu.pipeline_mode<synchronous>, transform_indices = @transform_14, window_bounds = array<i64: 2, 1, 32>}, {pipeline_mode = #tpu.pipeline_mode<synchronous>, transform_indices = @transform_15, window_bounds = array<i64: 2, 64, 32>}, {pipeline_mode = #tpu.pipeline_mode<synchronous>, transform_indices = @transform_16, window_bounds = array<i64: 2, 1, 64>}, {pipeline_mode = #tpu.pipeline_mode<synchronous>, transform_indices = @transform_17, window_bounds = array<i64: 2, 32, 32>}, {pipeline_mode = #tpu.pipeline_mode<synchronous>, transform_indices = @transform_18, window_bounds = array<i64: 2, 1, 32>}, {pipeline_mode = #tpu.pipeline_mode<synchronous>, transform_indices = @transform_19, window_bounds = array<i64: 2, 64, 32>}, {pipeline_mode = #tpu.pipeline_mode<synchronous>, transform_indices = @transform_20, window_bounds = array<i64: 2, 1, 64>}, {pipeline_mode = #tpu.pipeline_mode<synchronous>, transform_indices = @transform_21, window_bounds = array<i64: 2, 32, 64>}, {pipeline_mode = #tpu.pipeline_mode<synchronous>, transform_indices = @transform_22, window_bounds = array<i64: 2, 1, 32>}, {pipeline_mode = #tpu.pipeline_mode<synchronous>, transform_indices = @transform_23, window_bounds = array<i64: 2, 1, 32>}, {pipeline_mode = #tpu.pipeline_mode<synchronous>, transform_indices = @transform_24, window_bounds = array<i64: 2, 1, 32>}, {pipeline_mode = #tpu.pipeline_mode<synchronous>, transform_indices = @transform_25, window_bounds = array<i64: 2, 1, 32>}, {pipeline_mode = #tpu.pipeline_mode<synchronous>, transform_indices = @transform_26, window_bounds = array<i64: 2, 1, 32>}, {pipeline_mode = #tpu.pipeline_mode<synchronous>, transform_indices = @transform_27, window_bounds = array<i64: 2, 1, 32>}, {pipeline_mode = #tpu.pipeline_mode<synchronous>, transform_indices = @transform_28, window_bounds = array<i64: 2, 1, 32>}, {pipeline_mode = #tpu.pipeline_mode<synchronous>, transform_indices = @transform_29, window_bounds = array<i64: 128, 32>}, {pipeline_mode = #tpu.pipeline_mode<synchronous>, transform_indices = @transform_30, window_bounds = array<i64: 1, 128>}, {transform_indices = @transform_31, window_bounds = array<i64: 1, 16, 128>}]} {
    %c0 = arith.constant 0 : index
    %c0_0 = arith.constant 0 : index
    %c0_1 = arith.constant 0 : index
    %0 = vector.load %arg2[%c0, %c0_0, %c0_1] : memref<1x16x3xf32, #tpu.memory_space<vmem>>, vector<1x16x3xf32>
    %1 = vector.shape_cast %0 : vector<1x16x3xf32> to vector<16x3xf32>
    %c0_2 = arith.constant 0 : index
    %c0_3 = arith.constant 0 : index
    %c0_4 = arith.constant 0 : index
    %2 = vector.load %arg1[%c0_2, %c0_3, %c0_4] : memref<1x16x32xbf16, #tpu.memory_space<vmem>>, vector<1x16x32xbf16>
    %3 = vector.shape_cast %2 : vector<1x16x32xbf16> to vector<16x32xbf16>
    %c0_5 = arith.constant 0 : index
    %c0_6 = arith.constant 0 : index
    %4 = vector.load %arg4[%c0_5, %c0_6] : memref<16x16xf32, #tpu.memory_space<vmem>>, vector<16x16xf32>
    %c0_7 = arith.constant 0 : index
    %c0_8 = arith.constant 0 : index
    %5 = vector.load %arg5[%c0_7, %c0_8] : memref<1x16xf32, #tpu.memory_space<vmem>>, vector<1x16xf32>
    %c0_9 = arith.constant 0 : index
    %c0_10 = arith.constant 0 : index
    %6 = vector.load %arg6[%c0_9, %c0_10] : memref<32x3xbf16, #tpu.memory_space<vmem>>, vector<32x3xbf16>
    %c0_11 = arith.constant 0 : index
    %c0_12 = arith.constant 0 : index
    %7 = vector.load %arg7[%c0_11, %c0_12] : memref<1x32xf32, #tpu.memory_space<vmem>>, vector<1x32xf32>
    %8 = arith.truncf %1 : vector<16x3xf32> to vector<16x3xbf16>
    %cst = arith.constant dense<0.000000e+00> : vector<16x32xf32>
    %9 = tpu.matmul %8, %6, %cst {dimension_numbers = #tpu.dot_dimension_numbers<[1], [1], [0], [0], [0, 0, 1, 0], [], []>} : vector<16x3xbf16>, vector<32x3xbf16>, vector<16x32xf32> -> vector<16x32xf32>
    %10 = vector.broadcast %7 : vector<1x32xf32> to vector<16x32xf32>
    %11 = arith.addf %9, %10 : vector<16x32xf32>
    %cst_13 = arith.constant 0.000000e+00 : f32
    %12 = vector.broadcast %cst_13 : f32 to vector<16x32xf32>
    %13 = arith.maximumf %11, %12 : vector<16x32xf32>
    %c0_14 = arith.constant 0 : index
    %c0_15 = arith.constant 0 : index
    %14 = vector.load %arg8[%c0_14, %c0_15] : memref<32x32xbf16, #tpu.memory_space<vmem>>, vector<32x32xbf16>
    %c0_16 = arith.constant 0 : index
    %c0_17 = arith.constant 0 : index
    %15 = vector.load %arg9[%c0_16, %c0_17] : memref<1x32xf32, #tpu.memory_space<vmem>>, vector<1x32xf32>
    %16 = arith.truncf %13 : vector<16x32xf32> to vector<16x32xbf16>
    %cst_18 = arith.constant dense<0.000000e+00> : vector<16x32xf32>
    %17 = tpu.matmul %16, %14, %cst_18 {dimension_numbers = #tpu.dot_dimension_numbers<[1], [1], [0], [0], [0, 0, 1, 0], [], []>} : vector<16x32xbf16>, vector<32x32xbf16>, vector<16x32xf32> -> vector<16x32xf32>
    %18 = vector.broadcast %15 : vector<1x32xf32> to vector<16x32xf32>
    %19 = arith.addf %17, %18 : vector<16x32xf32>
    %20 = vector.shape_cast %19 : vector<16x32xf32> to vector<1x16x32xf32>
    %c0_19 = arith.constant 0 : index
    %c0_20 = arith.constant 0 : index
    %21 = vector.load %arg3[%c0_19, %c0_20] : memref<16x32xf32, #tpu.memory_space<vmem>>, vector<16x32xf32>
    %22 = vector.shape_cast %21 : vector<16x32xf32> to vector<1x16x32xf32>
    %23 = arith.addf %20, %22 : vector<1x16x32xf32>
    %24 = vector.shape_cast %23 : vector<1x16x32xf32> to vector<16x32xf32>
    %c0_21 = arith.constant 0 : index
    %c0_22 = arith.constant 0 : index
    %c0_23 = arith.constant 0 : index
    %25 = vector.load %arg10[%c0_21, %c0_22, %c0_23] : memref<2x96x32xbf16, #tpu.memory_space<vmem>>, vector<1x96x32xbf16>
    %26 = vector.shape_cast %25 : vector<1x96x32xbf16> to vector<96x32xbf16>
    %c0_24 = arith.constant 0 : index
    %c0_25 = arith.constant 0 : index
    %c0_26 = arith.constant 0 : index
    %27 = vector.load %arg11[%c0_24, %c0_25, %c0_26] : memref<2x1x96xf32, #tpu.memory_space<vmem>>, vector<1x1x96xf32>
    %28 = vector.shape_cast %27 : vector<1x1x96xf32> to vector<1x96xf32>
    %29 = arith.truncf %24 : vector<16x32xf32> to vector<16x32xbf16>
    %cst_27 = arith.constant dense<0.000000e+00> : vector<16x96xf32>
    %30 = tpu.matmul %29, %26, %cst_27 {dimension_numbers = #tpu.dot_dimension_numbers<[1], [1], [0], [0], [0, 0, 1, 0], [], []>} : vector<16x32xbf16>, vector<96x32xbf16>, vector<16x96xf32> -> vector<16x96xf32>
    %31 = vector.broadcast %28 : vector<1x96xf32> to vector<16x96xf32>
    %32 = arith.addf %30, %31 : vector<16x96xf32>
    %33 = vector.extract_strided_slice %32 {offsets = [0, 0], sizes = [16, 8], strides = [1, 1]} : vector<16x96xf32> to vector<16x8xf32>
    %34 = vector.extract_strided_slice %32 {offsets = [0, 32], sizes = [16, 8], strides = [1, 1]} : vector<16x96xf32> to vector<16x8xf32>
    %35 = vector.extract_strided_slice %32 {offsets = [0, 64], sizes = [16, 8], strides = [1, 1]} : vector<16x96xf32> to vector<16x8xf32>
    %36 = arith.truncf %33 : vector<16x8xf32> to vector<16x8xbf16>
    %37 = arith.truncf %34 : vector<16x8xf32> to vector<16x8xbf16>
    %cst_28 = arith.constant dense<0.000000e+00> : vector<16x16xf32>
    %38 = tpu.matmul %36, %37, %cst_28 {dimension_numbers = #tpu.dot_dimension_numbers<[1], [1], [0], [0], [0, 0, 1, 0], [], []>} : vector<16x8xbf16>, vector<16x8xbf16>, vector<16x16xf32> -> vector<16x16xf32>
    %cst_29 = arith.constant 0.353553385 : f32
    %39 = vector.broadcast %cst_29 : f32 to vector<16x16xf32>
    %40 = arith.mulf %38, %39 : vector<16x16xf32>
    %41 = arith.addf %40, %4 : vector<16x16xf32>
    %cst_30 = arith.constant dense<0xFF800000> : vector<16xf32>
    %42 = vector.multi_reduction <maximumf>, %41, %cst_30 [1] : vector<16x16xf32> to vector<16xf32>
    %43 = vector.shape_cast %42 : vector<16xf32> to vector<16x1xf32>
    %44 = vector.broadcast %43 : vector<16x1xf32> to vector<16x16xf32>
    %45 = arith.subf %41, %44 : vector<16x16xf32>
    %46 = math.exp %45 : vector<16x16xf32>
    %cst_31 = arith.constant dense<0.000000e+00> : vector<16xf32>
    %47 = vector.multi_reduction <add>, %46, %cst_31 [1] : vector<16x16xf32> to vector<16xf32>
    %48 = vector.shape_cast %47 : vector<16xf32> to vector<16x1xf32>
    %49 = tpu.reciprocal %48 {approx = true} : vector<16x1xf32> -> vector<16x1xf32>
    %50 = vector.broadcast %49 : vector<16x1xf32> to vector<16x16xf32>
    %51 = arith.mulf %46, %50 : vector<16x16xf32>
    %52 = arith.truncf %51 : vector<16x16xf32> to vector<16x16xbf16>
    %53 = arith.truncf %35 : vector<16x8xf32> to vector<16x8xbf16>
    %cst_32 = arith.constant dense<0.000000e+00> : vector<16x8xf32>
    %54 = tpu.matmul %52, %53, %cst_32 {dimension_numbers = #tpu.dot_dimension_numbers<[1], [0], [0], [1], [0, 0, 1, 1], [], []>} : vector<16x16xbf16>, vector<16x8xbf16>, vector<16x8xf32> -> vector<16x8xf32>
    %c0_33 = arith.constant 0 : index
    %c0_34 = arith.constant 0 : index
    %55 = vector.load %arg33[%c0_33, %c0_34] : memref<16x32xf32, #tpu.memory_space<vmem>>, vector<16x8xf32>
    tpu.vector_store %arg33[%c0_33, %c0_34], %54 {strides = array<i32>} : memref<16x32xf32, #tpu.memory_space<vmem>>, vector<16x8xf32>,
    %56 = vector.extract_strided_slice %32 {offsets = [0, 8], sizes = [16, 8], strides = [1, 1]} : vector<16x96xf32> to vector<16x8xf32>
    %57 = vector.extract_strided_slice %32 {offsets = [0, 40], sizes = [16, 8], strides = [1, 1]} : vector<16x96xf32> to vector<16x8xf32>
    %58 = vector.extract_strided_slice %32 {offsets = [0, 72], sizes = [16, 8], strides = [1, 1]} : vector<16x96xf32> to vector<16x8xf32>
    %59 = arith.truncf %56 : vector<16x8xf32> to vector<16x8xbf16>
    %60 = arith.truncf %57 : vector<16x8xf32> to vector<16x8xbf16>
    %cst_35 = arith.constant dense<0.000000e+00> : vector<16x16xf32>
    %61 = tpu.matmul %59, %60, %cst_35 {dimension_numbers = #tpu.dot_dimension_numbers<[1], [1], [0], [0], [0, 0, 1, 0], [], []>} : vector<16x8xbf16>, vector<16x8xbf16>, vector<16x16xf32> -> vector<16x16xf32>
    %cst_36 = arith.constant 0.353553385 : f32
    %62 = vector.broadcast %cst_36 : f32 to vector<16x16xf32>
    %63 = arith.mulf %61, %62 : vector<16x16xf32>
    %64 = arith.addf %63, %4 : vector<16x16xf32>
    %cst_37 = arith.constant dense<0xFF800000> : vector<16xf32>
    %65 = vector.multi_reduction <maximumf>, %64, %cst_37 [1] : vector<16x16xf32> to vector<16xf32>
    %66 = vector.shape_cast %65 : vector<16xf32> to vector<16x1xf32>
    %67 = vector.broadcast %66 : vector<16x1xf32> to vector<16x16xf32>
    %68 = arith.subf %64, %67 : vector<16x16xf32>
    %69 = math.exp %68 : vector<16x16xf32>
    %cst_38 = arith.constant dense<0.000000e+00> : vector<16xf32>
    %70 = vector.multi_reduction <add>, %69, %cst_38 [1] : vector<16x16xf32> to vector<16xf32>
    %71 = vector.shape_cast %70 : vector<16xf32> to vector<16x1xf32>
    %72 = tpu.reciprocal %71 {approx = true} : vector<16x1xf32> -> vector<16x1xf32>
    %73 = vector.broadcast %72 : vector<16x1xf32> to vector<16x16xf32>
    %74 = arith.mulf %69, %73 : vector<16x16xf32>
    %75 = arith.truncf %74 : vector<16x16xf32> to vector<16x16xbf16>
    %76 = arith.truncf %58 : vector<16x8xf32> to vector<16x8xbf16>
    %cst_39 = arith.constant dense<0.000000e+00> : vector<16x8xf32>
    %77 = tpu.matmul %75, %76, %cst_39 {dimension_numbers = #tpu.dot_dimension_numbers<[1], [0], [0], [1], [0, 0, 1, 1], [], []>} : vector<16x16xbf16>, vector<16x8xbf16>, vector<16x8xf32> -> vector<16x8xf32>
    %c0_40 = arith.constant 0 : index
    %c8 = arith.constant 8 : index
    %78 = vector.load %arg33[%c0_40, %c8] : memref<16x32xf32, #tpu.memory_space<vmem>>, vector<16x8xf32>
    tpu.vector_store %arg33[%c0_40, %c8], %77 {strides = array<i32>} : memref<16x32xf32, #tpu.memory_space<vmem>>, vector<16x8xf32>,
    %79 = vector.extract_strided_slice %32 {offsets = [0, 16], sizes = [16, 8], strides = [1, 1]} : vector<16x96xf32> to vector<16x8xf32>
    %80 = vector.extract_strided_slice %32 {offsets = [0, 48], sizes = [16, 8], strides = [1, 1]} : vector<16x96xf32> to vector<16x8xf32>
    %81 = vector.extract_strided_slice %32 {offsets = [0, 80], sizes = [16, 8], strides = [1, 1]} : vector<16x96xf32> to vector<16x8xf32>
    %82 = arith.truncf %79 : vector<16x8xf32> to vector<16x8xbf16>
    %83 = arith.truncf %80 : vector<16x8xf32> to vector<16x8xbf16>
    %cst_41 = arith.constant dense<0.000000e+00> : vector<16x16xf32>
    %84 = tpu.matmul %82, %83, %cst_41 {dimension_numbers = #tpu.dot_dimension_numbers<[1], [1], [0], [0], [0, 0, 1, 0], [], []>} : vector<16x8xbf16>, vector<16x8xbf16>, vector<16x16xf32> -> vector<16x16xf32>
    %cst_42 = arith.constant 0.353553385 : f32
    %85 = vector.broadcast %cst_42 : f32 to vector<16x16xf32>
    %86 = arith.mulf %84, %85 : vector<16x16xf32>
    %87 = arith.addf %86, %4 : vector<16x16xf32>
    %cst_43 = arith.constant dense<0xFF800000> : vector<16xf32>
    %88 = vector.multi_reduction <maximumf>, %87, %cst_43 [1] : vector<16x16xf32> to vector<16xf32>
    %89 = vector.shape_cast %88 : vector<16xf32> to vector<16x1xf32>
    %90 = vector.broadcast %89 : vector<16x1xf32> to vector<16x16xf32>
    %91 = arith.subf %87, %90 : vector<16x16xf32>
    %92 = math.exp %91 : vector<16x16xf32>
    %cst_44 = arith.constant dense<0.000000e+00> : vector<16xf32>
    %93 = vector.multi_reduction <add>, %92, %cst_44 [1] : vector<16x16xf32> to vector<16xf32>
    %94 = vector.shape_cast %93 : vector<16xf32> to vector<16x1xf32>
    %95 = tpu.reciprocal %94 {approx = true} : vector<16x1xf32> -> vector<16x1xf32>
    %96 = vector.broadcast %95 : vector<16x1xf32> to vector<16x16xf32>
    %97 = arith.mulf %92, %96 : vector<16x16xf32>
    %98 = arith.truncf %97 : vector<16x16xf32> to vector<16x16xbf16>
    %99 = arith.truncf %81 : vector<16x8xf32> to vector<16x8xbf16>
    %cst_45 = arith.constant dense<0.000000e+00> : vector<16x8xf32>
    %100 = tpu.matmul %98, %99, %cst_45 {dimension_numbers = #tpu.dot_dimension_numbers<[1], [0], [0], [1], [0, 0, 1, 1], [], []>} : vector<16x16xbf16>, vector<16x8xbf16>, vector<16x8xf32> -> vector<16x8xf32>
    %c0_46 = arith.constant 0 : index
    %c16 = arith.constant 16 : index
    %101 = vector.load %arg33[%c0_46, %c16] : memref<16x32xf32, #tpu.memory_space<vmem>>, vector<16x8xf32>
    tpu.vector_store %arg33[%c0_46, %c16], %100 {strides = array<i32>} : memref<16x32xf32, #tpu.memory_space<vmem>>, vector<16x8xf32>,
    %102 = vector.extract_strided_slice %32 {offsets = [0, 24], sizes = [16, 8], strides = [1, 1]} : vector<16x96xf32> to vector<16x8xf32>
    %103 = vector.extract_strided_slice %32 {offsets = [0, 56], sizes = [16, 8], strides = [1, 1]} : vector<16x96xf32> to vector<16x8xf32>
    %104 = vector.extract_strided_slice %32 {offsets = [0, 88], sizes = [16, 8], strides = [1, 1]} : vector<16x96xf32> to vector<16x8xf32>
    %105 = arith.truncf %102 : vector<16x8xf32> to vector<16x8xbf16>
    %106 = arith.truncf %103 : vector<16x8xf32> to vector<16x8xbf16>
    %cst_47 = arith.constant dense<0.000000e+00> : vector<16x16xf32>
    %107 = tpu.matmul %105, %106, %cst_47 {dimension_numbers = #tpu.dot_dimension_numbers<[1], [1], [0], [0], [0, 0, 1, 0], [], []>} : vector<16x8xbf16>, vector<16x8xbf16>, vector<16x16xf32> -> vector<16x16xf32>
    %cst_48 = arith.constant 0.353553385 : f32
    %108 = vector.broadcast %cst_48 : f32 to vector<16x16xf32>
    %109 = arith.mulf %107, %108 : vector<16x16xf32>
    %110 = arith.addf %109, %4 : vector<16x16xf32>
    %cst_49 = arith.constant dense<0xFF800000> : vector<16xf32>
    %111 = vector.multi_reduction <maximumf>, %110, %cst_49 [1] : vector<16x16xf32> to vector<16xf32>
    %112 = vector.shape_cast %111 : vector<16xf32> to vector<16x1xf32>
    %113 = vector.broadcast %112 : vector<16x1xf32> to vector<16x16xf32>
    %114 = arith.subf %110, %113 : vector<16x16xf32>
    %115 = math.exp %114 : vector<16x16xf32>
    %cst_50 = arith.constant dense<0.000000e+00> : vector<16xf32>
    %116 = vector.multi_reduction <add>, %115, %cst_50 [1] : vector<16x16xf32> to vector<16xf32>
    %117 = vector.shape_cast %116 : vector<16xf32> to vector<16x1xf32>
    %118 = tpu.reciprocal %117 {approx = true} : vector<16x1xf32> -> vector<16x1xf32>
    %119 = vector.broadcast %118 : vector<16x1xf32> to vector<16x16xf32>
    %120 = arith.mulf %115, %119 : vector<16x16xf32>
    %121 = arith.truncf %120 : vector<16x16xf32> to vector<16x16xbf16>
    %122 = arith.truncf %104 : vector<16x8xf32> to vector<16x8xbf16>
    %cst_51 = arith.constant dense<0.000000e+00> : vector<16x8xf32>
    %123 = tpu.matmul %121, %122, %cst_51 {dimension_numbers = #tpu.dot_dimension_numbers<[1], [0], [0], [1], [0, 0, 1, 1], [], []>} : vector<16x16xbf16>, vector<16x8xbf16>, vector<16x8xf32> -> vector<16x8xf32>
    %c0_52 = arith.constant 0 : index
    %c24 = arith.constant 24 : index
    %124 = vector.load %arg33[%c0_52, %c24] : memref<16x32xf32, #tpu.memory_space<vmem>>, vector<16x8xf32>
    tpu.vector_store %arg33[%c0_52, %c24], %123 {strides = array<i32>} : memref<16x32xf32, #tpu.memory_space<vmem>>, vector<16x8xf32>,
    %c0_53 = arith.constant 0 : index
    %c0_54 = arith.constant 0 : index
    %125 = vector.load %arg33[%c0_53, %c0_54] : memref<16x32xf32, #tpu.memory_space<vmem>>, vector<16x32xf32>
    %c0_55 = arith.constant 0 : index
    %c0_56 = arith.constant 0 : index
    %c0_57 = arith.constant 0 : index
    %126 = vector.load %arg12[%c0_55, %c0_56, %c0_57] : memref<2x32x32xbf16, #tpu.memory_space<vmem>>, vector<1x32x32xbf16>
    %127 = vector.shape_cast %126 : vector<1x32x32xbf16> to vector<32x32xbf16>
    %c0_58 = arith.constant 0 : index
    %c0_59 = arith.constant 0 : index
    %c0_60 = arith.constant 0 : index
    %128 = vector.load %arg13[%c0_58, %c0_59, %c0_60] : memref<2x1x32xf32, #tpu.memory_space<vmem>>, vector<1x1x32xf32>
    %129 = vector.shape_cast %128 : vector<1x1x32xf32> to vector<1x32xf32>
    %130 = arith.truncf %125 : vector<16x32xf32> to vector<16x32xbf16>
    %cst_61 = arith.constant dense<0.000000e+00> : vector<16x32xf32>
    %131 = tpu.matmul %130, %127, %cst_61 {dimension_numbers = #tpu.dot_dimension_numbers<[1], [1], [0], [0], [0, 0, 1, 0], [], []>} : vector<16x32xbf16>, vector<32x32xbf16>, vector<16x32xf32> -> vector<16x32xf32>
    %132 = vector.broadcast %129 : vector<1x32xf32> to vector<16x32xf32>
    %133 = arith.addf %131, %132 : vector<16x32xf32>
    %134 = arith.addf %24, %133 : vector<16x32xf32>
    %c0_62 = arith.constant 0 : index
    %c0_63 = arith.constant 0 : index
    %c0_64 = arith.constant 0 : index
    %135 = vector.load %arg24[%c0_62, %c0_63, %c0_64] : memref<2x1x32xf32, #tpu.memory_space<vmem>>, vector<1x1x32xf32>
    %136 = vector.shape_cast %135 : vector<1x1x32xf32> to vector<1x32xf32>
    %c0_65 = arith.constant 0 : index
    %c0_66 = arith.constant 0 : index
    %c0_67 = arith.constant 0 : index
    %137 = vector.load %arg25[%c0_65, %c0_66, %c0_67] : memref<2x1x32xf32, #tpu.memory_space<vmem>>, vector<1x1x32xf32>
    %138 = vector.shape_cast %137 : vector<1x1x32xf32> to vector<1x32xf32>
    %cst_68 = arith.constant dense<0.000000e+00> : vector<16xf32>
    %139 = vector.multi_reduction <add>, %134, %cst_68 [1] : vector<16x32xf32> to vector<16xf32>
    %140 = vector.shape_cast %139 : vector<16xf32> to vector<16x1xf32>
    %cst_69 = arith.constant 3.200000e+01 : f32
    %141 = vector.broadcast %cst_69 : f32 to vector<16x1xf32>
    %142 = arith.divf %140, %141 : vector<16x1xf32>
    %143 = vector.broadcast %142 : vector<16x1xf32> to vector<16x32xf32>
    %144 = arith.subf %134, %143 : vector<16x32xf32>
    %145 = arith.mulf %144, %144 : vector<16x32xf32>
    %cst_70 = arith.constant dense<0.000000e+00> : vector<16xf32>
    %146 = vector.multi_reduction <add>, %145, %cst_70 [1] : vector<16x32xf32> to vector<16xf32>
    %147 = vector.shape_cast %146 : vector<16xf32> to vector<16x1xf32>
    %cst_71 = arith.constant 3.200000e+01 : f32
    %148 = vector.broadcast %cst_71 : f32 to vector<16x1xf32>
    %149 = arith.divf %147, %148 : vector<16x1xf32>
    %150 = vector.broadcast %142 : vector<16x1xf32> to vector<16x32xf32>
    %151 = arith.subf %134, %150 : vector<16x32xf32>
    %cst_72 = arith.constant 9.99999974E-6 : f32
    %152 = vector.broadcast %cst_72 : f32 to vector<16x1xf32>
    %153 = arith.addf %149, %152 : vector<16x1xf32>
    %154 = math.rsqrt %153 : vector<16x1xf32>
    %155 = vector.broadcast %154 : vector<16x1xf32> to vector<16x32xf32>
    %156 = arith.mulf %151, %155 : vector<16x32xf32>
    %157 = vector.broadcast %136 : vector<1x32xf32> to vector<16x32xf32>
    %158 = arith.mulf %156, %157 : vector<16x32xf32>
    %159 = vector.broadcast %138 : vector<1x32xf32> to vector<16x32xf32>
    %160 = arith.addf %158, %159 : vector<16x32xf32>
    %c0_73 = arith.constant 0 : index
    %c0_74 = arith.constant 0 : index
    %c0_75 = arith.constant 0 : index
    %161 = vector.load %arg14[%c0_73, %c0_74, %c0_75] : memref<2x32x32xbf16, #tpu.memory_space<vmem>>, vector<1x32x32xbf16>
    %162 = vector.shape_cast %161 : vector<1x32x32xbf16> to vector<32x32xbf16>
    %c0_76 = arith.constant 0 : index
    %c0_77 = arith.constant 0 : index
    %c0_78 = arith.constant 0 : index
    %163 = vector.load %arg15[%c0_76, %c0_77, %c0_78] : memref<2x1x32xf32, #tpu.memory_space<vmem>>, vector<1x1x32xf32>
    %164 = vector.shape_cast %163 : vector<1x1x32xf32> to vector<1x32xf32>
    %165 = arith.truncf %160 : vector<16x32xf32> to vector<16x32xbf16>
    %cst_79 = arith.constant dense<0.000000e+00> : vector<16x32xf32>
    %166 = tpu.matmul %165, %162, %cst_79 {dimension_numbers = #tpu.dot_dimension_numbers<[1], [1], [0], [0], [0, 0, 1, 0], [], []>} : vector<16x32xbf16>, vector<32x32xbf16>, vector<16x32xf32> -> vector<16x32xf32>
    %167 = vector.broadcast %164 : vector<1x32xf32> to vector<16x32xf32>
    %168 = arith.addf %166, %167 : vector<16x32xf32>
    %c0_80 = arith.constant 0 : index
    %c0_81 = arith.constant 0 : index
    %c0_82 = arith.constant 0 : index
    %169 = vector.load %arg16[%c0_80, %c0_81, %c0_82] : memref<2x64x32xbf16, #tpu.memory_space<vmem>>, vector<1x64x32xbf16>
    %170 = vector.shape_cast %169 : vector<1x64x32xbf16> to vector<64x32xbf16>
    %c0_83 = arith.constant 0 : index
    %c0_84 = arith.constant 0 : index
    %c0_85 = arith.constant 0 : index
    %171 = vector.load %arg17[%c0_83, %c0_84, %c0_85] : memref<2x1x64xf32, #tpu.memory_space<vmem>>, vector<1x1x64xf32>
    %172 = vector.shape_cast %171 : vector<1x1x64xf32> to vector<1x64xf32>
    %cst_86 = arith.constant dense<0.000000e+00> : vector<16x64xf32>
    %173 = tpu.matmul %3, %170, %cst_86 {dimension_numbers = #tpu.dot_dimension_numbers<[1], [1], [0], [0], [0, 0, 1, 0], [], []>} : vector<16x32xbf16>, vector<64x32xbf16>, vector<16x64xf32> -> vector<16x64xf32>
    %174 = vector.broadcast %172 : vector<1x64xf32> to vector<16x64xf32>
    %175 = arith.addf %173, %174 : vector<16x64xf32>
    %176 = vector.extract_strided_slice %168 {offsets = [0, 0], sizes = [16, 8], strides = [1, 1]} : vector<16x32xf32> to vector<16x8xf32>
    %177 = vector.extract_strided_slice %175 {offsets = [0, 0], sizes = [16, 8], strides = [1, 1]} : vector<16x64xf32> to vector<16x8xf32>
    %178 = vector.extract_strided_slice %175 {offsets = [0, 32], sizes = [16, 8], strides = [1, 1]} : vector<16x64xf32> to vector<16x8xf32>
    %179 = arith.truncf %176 : vector<16x8xf32> to vector<16x8xbf16>
    %180 = arith.truncf %177 : vector<16x8xf32> to vector<16x8xbf16>
    %cst_87 = arith.constant dense<0.000000e+00> : vector<16x16xf32>
    %181 = tpu.matmul %179, %180, %cst_87 {dimension_numbers = #tpu.dot_dimension_numbers<[1], [1], [0], [0], [0, 0, 1, 0], [], []>} : vector<16x8xbf16>, vector<16x8xbf16>, vector<16x16xf32> -> vector<16x16xf32>
    %cst_88 = arith.constant 0.353553385 : f32
    %182 = vector.broadcast %cst_88 : f32 to vector<16x16xf32>
    %183 = arith.mulf %181, %182 : vector<16x16xf32>
    %184 = vector.broadcast %5 : vector<1x16xf32> to vector<16x16xf32>
    %185 = arith.addf %183, %184 : vector<16x16xf32>
    %cst_89 = arith.constant dense<0xFF800000> : vector<16xf32>
    %186 = vector.multi_reduction <maximumf>, %185, %cst_89 [1] : vector<16x16xf32> to vector<16xf32>
    %187 = vector.shape_cast %186 : vector<16xf32> to vector<16x1xf32>
    %188 = vector.broadcast %187 : vector<16x1xf32> to vector<16x16xf32>
    %189 = arith.subf %185, %188 : vector<16x16xf32>
    %190 = math.exp %189 : vector<16x16xf32>
    %cst_90 = arith.constant dense<0.000000e+00> : vector<16xf32>
    %191 = vector.multi_reduction <add>, %190, %cst_90 [1] : vector<16x16xf32> to vector<16xf32>
    %192 = vector.shape_cast %191 : vector<16xf32> to vector<16x1xf32>
    %193 = tpu.reciprocal %192 {approx = true} : vector<16x1xf32> -> vector<16x1xf32>
    %194 = vector.broadcast %193 : vector<16x1xf32> to vector<16x16xf32>
    %195 = arith.mulf %190, %194 : vector<16x16xf32>
    %196 = arith.truncf %195 : vector<16x16xf32> to vector<16x16xbf16>
    %197 = arith.truncf %178 : vector<16x8xf32> to vector<16x8xbf16>
    %cst_91 = arith.constant dense<0.000000e+00> : vector<16x8xf32>
    %198 = tpu.matmul %196, %197, %cst_91 {dimension_numbers = #tpu.dot_dimension_numbers<[1], [0], [0], [1], [0, 0, 1, 1], [], []>} : vector<16x16xbf16>, vector<16x8xbf16>, vector<16x8xf32> -> vector<16x8xf32>
    %c0_92 = arith.constant 0 : index
    %c0_93 = arith.constant 0 : index
    %199 = vector.load %arg33[%c0_92, %c0_93] : memref<16x32xf32, #tpu.memory_space<vmem>>, vector<16x8xf32>
    tpu.vector_store %arg33[%c0_92, %c0_93], %198 {strides = array<i32>} : memref<16x32xf32, #tpu.memory_space<vmem>>, vector<16x8xf32>,
    %200 = vector.extract_strided_slice %168 {offsets = [0, 8], sizes = [16, 8], strides = [1, 1]} : vector<16x32xf32> to vector<16x8xf32>
    %201 = vector.extract_strided_slice %175 {offsets = [0, 8], sizes = [16, 8], strides = [1, 1]} : vector<16x64xf32> to vector<16x8xf32>
    %202 = vector.extract_strided_slice %175 {offsets = [0, 40], sizes = [16, 8], strides = [1, 1]} : vector<16x64xf32> to vector<16x8xf32>
    %203 = arith.truncf %200 : vector<16x8xf32> to vector<16x8xbf16>
    %204 = arith.truncf %201 : vector<16x8xf32> to vector<16x8xbf16>
    %cst_94 = arith.constant dense<0.000000e+00> : vector<16x16xf32>
    %205 = tpu.matmul %203, %204, %cst_94 {dimension_numbers = #tpu.dot_dimension_numbers<[1], [1], [0], [0], [0, 0, 1, 0], [], []>} : vector<16x8xbf16>, vector<16x8xbf16>, vector<16x16xf32> -> vector<16x16xf32>
    %cst_95 = arith.constant 0.353553385 : f32
    %206 = vector.broadcast %cst_95 : f32 to vector<16x16xf32>
    %207 = arith.mulf %205, %206 : vector<16x16xf32>
    %208 = vector.broadcast %5 : vector<1x16xf32> to vector<16x16xf32>
    %209 = arith.addf %207, %208 : vector<16x16xf32>
    %cst_96 = arith.constant dense<0xFF800000> : vector<16xf32>
    %210 = vector.multi_reduction <maximumf>, %209, %cst_96 [1] : vector<16x16xf32> to vector<16xf32>
    %211 = vector.shape_cast %210 : vector<16xf32> to vector<16x1xf32>
    %212 = vector.broadcast %211 : vector<16x1xf32> to vector<16x16xf32>
    %213 = arith.subf %209, %212 : vector<16x16xf32>
    %214 = math.exp %213 : vector<16x16xf32>
    %cst_97 = arith.constant dense<0.000000e+00> : vector<16xf32>
    %215 = vector.multi_reduction <add>, %214, %cst_97 [1] : vector<16x16xf32> to vector<16xf32>
    %216 = vector.shape_cast %215 : vector<16xf32> to vector<16x1xf32>
    %217 = tpu.reciprocal %216 {approx = true} : vector<16x1xf32> -> vector<16x1xf32>
    %218 = vector.broadcast %217 : vector<16x1xf32> to vector<16x16xf32>
    %219 = arith.mulf %214, %218 : vector<16x16xf32>
    %220 = arith.truncf %219 : vector<16x16xf32> to vector<16x16xbf16>
    %221 = arith.truncf %202 : vector<16x8xf32> to vector<16x8xbf16>
    %cst_98 = arith.constant dense<0.000000e+00> : vector<16x8xf32>
    %222 = tpu.matmul %220, %221, %cst_98 {dimension_numbers = #tpu.dot_dimension_numbers<[1], [0], [0], [1], [0, 0, 1, 1], [], []>} : vector<16x16xbf16>, vector<16x8xbf16>, vector<16x8xf32> -> vector<16x8xf32>
    %c0_99 = arith.constant 0 : index
    %c8_100 = arith.constant 8 : index
    %223 = vector.load %arg33[%c0_99, %c8_100] : memref<16x32xf32, #tpu.memory_space<vmem>>, vector<16x8xf32>
    tpu.vector_store %arg33[%c0_99, %c8_100], %222 {strides = array<i32>} : memref<16x32xf32, #tpu.memory_space<vmem>>, vector<16x8xf32>,
    %224 = vector.extract_strided_slice %168 {offsets = [0, 16], sizes = [16, 8], strides = [1, 1]} : vector<16x32xf32> to vector<16x8xf32>
    %225 = vector.extract_strided_slice %175 {offsets = [0, 16], sizes = [16, 8], strides = [1, 1]} : vector<16x64xf32> to vector<16x8xf32>
    %226 = vector.extract_strided_slice %175 {offsets = [0, 48], sizes = [16, 8], strides = [1, 1]} : vector<16x64xf32> to vector<16x8xf32>
    %227 = arith.truncf %224 : vector<16x8xf32> to vector<16x8xbf16>
    %228 = arith.truncf %225 : vector<16x8xf32> to vector<16x8xbf16>
    %cst_101 = arith.constant dense<0.000000e+00> : vector<16x16xf32>
    %229 = tpu.matmul %227, %228, %cst_101 {dimension_numbers = #tpu.dot_dimension_numbers<[1], [1], [0], [0], [0, 0, 1, 0], [], []>} : vector<16x8xbf16>, vector<16x8xbf16>, vector<16x16xf32> -> vector<16x16xf32>
    %cst_102 = arith.constant 0.353553385 : f32
    %230 = vector.broadcast %cst_102 : f32 to vector<16x16xf32>
    %231 = arith.mulf %229, %230 : vector<16x16xf32>
    %232 = vector.broadcast %5 : vector<1x16xf32> to vector<16x16xf32>
    %233 = arith.addf %231, %232 : vector<16x16xf32>
    %cst_103 = arith.constant dense<0xFF800000> : vector<16xf32>
    %234 = vector.multi_reduction <maximumf>, %233, %cst_103 [1] : vector<16x16xf32> to vector<16xf32>
    %235 = vector.shape_cast %234 : vector<16xf32> to vector<16x1xf32>
    %236 = vector.broadcast %235 : vector<16x1xf32> to vector<16x16xf32>
    %237 = arith.subf %233, %236 : vector<16x16xf32>
    %238 = math.exp %237 : vector<16x16xf32>
    %cst_104 = arith.constant dense<0.000000e+00> : vector<16xf32>
    %239 = vector.multi_reduction <add>, %238, %cst_104 [1] : vector<16x16xf32> to vector<16xf32>
    %240 = vector.shape_cast %239 : vector<16xf32> to vector<16x1xf32>
    %241 = tpu.reciprocal %240 {approx = true} : vector<16x1xf32> -> vector<16x1xf32>
    %242 = vector.broadcast %241 : vector<16x1xf32> to vector<16x16xf32>
    %243 = arith.mulf %238, %242 : vector<16x16xf32>
    %244 = arith.truncf %243 : vector<16x16xf32> to vector<16x16xbf16>
    %245 = arith.truncf %226 : vector<16x8xf32> to vector<16x8xbf16>
    %cst_105 = arith.constant dense<0.000000e+00> : vector<16x8xf32>
    %246 = tpu.matmul %244, %245, %cst_105 {dimension_numbers = #tpu.dot_dimension_numbers<[1], [0], [0], [1], [0, 0, 1, 1], [], []>} : vector<16x16xbf16>, vector<16x8xbf16>, vector<16x8xf32> -> vector<16x8xf32>
    %c0_106 = arith.constant 0 : index
    %c16_107 = arith.constant 16 : index
    %247 = vector.load %arg33[%c0_106, %c16_107] : memref<16x32xf32, #tpu.memory_space<vmem>>, vector<16x8xf32>
    tpu.vector_store %arg33[%c0_106, %c16_107], %246 {strides = array<i32>} : memref<16x32xf32, #tpu.memory_space<vmem>>, vector<16x8xf32>,
    %248 = vector.extract_strided_slice %168 {offsets = [0, 24], sizes = [16, 8], strides = [1, 1]} : vector<16x32xf32> to vector<16x8xf32>
    %249 = vector.extract_strided_slice %175 {offsets = [0, 24], sizes = [16, 8], strides = [1, 1]} : vector<16x64xf32> to vector<16x8xf32>
    %250 = vector.extract_strided_slice %175 {offsets = [0, 56], sizes = [16, 8], strides = [1, 1]} : vector<16x64xf32> to vector<16x8xf32>
    %251 = arith.truncf %248 : vector<16x8xf32> to vector<16x8xbf16>
    %252 = arith.truncf %249 : vector<16x8xf32> to vector<16x8xbf16>
    %cst_108 = arith.constant dense<0.000000e+00> : vector<16x16xf32>
    %253 = tpu.matmul %251, %252, %cst_108 {dimension_numbers = #tpu.dot_dimension_numbers<[1], [1], [0], [0], [0, 0, 1, 0], [], []>} : vector<16x8xbf16>, vector<16x8xbf16>, vector<16x16xf32> -> vector<16x16xf32>
    %cst_109 = arith.constant 0.353553385 : f32
    %254 = vector.broadcast %cst_109 : f32 to vector<16x16xf32>
    %255 = arith.mulf %253, %254 : vector<16x16xf32>
    %256 = vector.broadcast %5 : vector<1x16xf32> to vector<16x16xf32>
    %257 = arith.addf %255, %256 : vector<16x16xf32>
    %cst_110 = arith.constant dense<0xFF800000> : vector<16xf32>
    %258 = vector.multi_reduction <maximumf>, %257, %cst_110 [1] : vector<16x16xf32> to vector<16xf32>
    %259 = vector.shape_cast %258 : vector<16xf32> to vector<16x1xf32>
    %260 = vector.broadcast %259 : vector<16x1xf32> to vector<16x16xf32>
    %261 = arith.subf %257, %260 : vector<16x16xf32>
    %262 = math.exp %261 : vector<16x16xf32>
    %cst_111 = arith.constant dense<0.000000e+00> : vector<16xf32>
    %263 = vector.multi_reduction <add>, %262, %cst_111 [1] : vector<16x16xf32> to vector<16xf32>
    %264 = vector.shape_cast %263 : vector<16xf32> to vector<16x1xf32>
    %265 = tpu.reciprocal %264 {approx = true} : vector<16x1xf32> -> vector<16x1xf32>
    %266 = vector.broadcast %265 : vector<16x1xf32> to vector<16x16xf32>
    %267 = arith.mulf %262, %266 : vector<16x16xf32>
    %268 = arith.truncf %267 : vector<16x16xf32> to vector<16x16xbf16>
    %269 = arith.truncf %250 : vector<16x8xf32> to vector<16x8xbf16>
    %cst_112 = arith.constant dense<0.000000e+00> : vector<16x8xf32>
    %270 = tpu.matmul %268, %269, %cst_112 {dimension_numbers = #tpu.dot_dimension_numbers<[1], [0], [0], [1], [0, 0, 1, 1], [], []>} : vector<16x16xbf16>, vector<16x8xbf16>, vector<16x8xf32> -> vector<16x8xf32>
    %c0_113 = arith.constant 0 : index
    %c24_114 = arith.constant 24 : index
    %271 = vector.load %arg33[%c0_113, %c24_114] : memref<16x32xf32, #tpu.memory_space<vmem>>, vector<16x8xf32>
    tpu.vector_store %arg33[%c0_113, %c24_114], %270 {strides = array<i32>} : memref<16x32xf32, #tpu.memory_space<vmem>>, vector<16x8xf32>,
    %c0_115 = arith.constant 0 : index
    %c0_116 = arith.constant 0 : index
    %272 = vector.load %arg33[%c0_115, %c0_116] : memref<16x32xf32, #tpu.memory_space<vmem>>, vector<16x32xf32>
    %c0_117 = arith.constant 0 : index
    %c0_118 = arith.constant 0 : index
    %c0_119 = arith.constant 0 : index
    %273 = vector.load %arg18[%c0_117, %c0_118, %c0_119] : memref<2x32x32xbf16, #tpu.memory_space<vmem>>, vector<1x32x32xbf16>
    %274 = vector.shape_cast %273 : vector<1x32x32xbf16> to vector<32x32xbf16>
    %c0_120 = arith.constant 0 : index
    %c0_121 = arith.constant 0 : index
    %c0_122 = arith.constant 0 : index
    %275 = vector.load %arg19[%c0_120, %c0_121, %c0_122] : memref<2x1x32xf32, #tpu.memory_space<vmem>>, vector<1x1x32xf32>
    %276 = vector.shape_cast %275 : vector<1x1x32xf32> to vector<1x32xf32>
    %277 = arith.truncf %272 : vector<16x32xf32> to vector<16x32xbf16>
    %cst_123 = arith.constant dense<0.000000e+00> : vector<16x32xf32>
    %278 = tpu.matmul %277, %274, %cst_123 {dimension_numbers = #tpu.dot_dimension_numbers<[1], [1], [0], [0], [0, 0, 1, 0], [], []>} : vector<16x32xbf16>, vector<32x32xbf16>, vector<16x32xf32> -> vector<16x32xf32>
    %279 = vector.broadcast %276 : vector<1x32xf32> to vector<16x32xf32>
    %280 = arith.addf %278, %279 : vector<16x32xf32>
    %281 = arith.addf %160, %280 : vector<16x32xf32>
    %c0_124 = arith.constant 0 : index
    %c0_125 = arith.constant 0 : index
    %c0_126 = arith.constant 0 : index
    %282 = vector.load %arg26[%c0_124, %c0_125, %c0_126] : memref<2x1x32xf32, #tpu.memory_space<vmem>>, vector<1x1x32xf32>
    %283 = vector.shape_cast %282 : vector<1x1x32xf32> to vector<1x32xf32>
    %c0_127 = arith.constant 0 : index
    %c0_128 = arith.constant 0 : index
    %c0_129 = arith.constant 0 : index
    %284 = vector.load %arg27[%c0_127, %c0_128, %c0_129] : memref<2x1x32xf32, #tpu.memory_space<vmem>>, vector<1x1x32xf32>
    %285 = vector.shape_cast %284 : vector<1x1x32xf32> to vector<1x32xf32>
    %cst_130 = arith.constant dense<0.000000e+00> : vector<16xf32>
    %286 = vector.multi_reduction <add>, %281, %cst_130 [1] : vector<16x32xf32> to vector<16xf32>
    %287 = vector.shape_cast %286 : vector<16xf32> to vector<16x1xf32>
    %cst_131 = arith.constant 3.200000e+01 : f32
    %288 = vector.broadcast %cst_131 : f32 to vector<16x1xf32>
    %289 = arith.divf %287, %288 : vector<16x1xf32>
    %290 = vector.broadcast %289 : vector<16x1xf32> to vector<16x32xf32>
    %291 = arith.subf %281, %290 : vector<16x32xf32>
    %292 = arith.mulf %291, %291 : vector<16x32xf32>
    %cst_132 = arith.constant dense<0.000000e+00> : vector<16xf32>
    %293 = vector.multi_reduction <add>, %292, %cst_132 [1] : vector<16x32xf32> to vector<16xf32>
    %294 = vector.shape_cast %293 : vector<16xf32> to vector<16x1xf32>
    %cst_133 = arith.constant 3.200000e+01 : f32
    %295 = vector.broadcast %cst_133 : f32 to vector<16x1xf32>
    %296 = arith.divf %294, %295 : vector<16x1xf32>
    %297 = vector.broadcast %289 : vector<16x1xf32> to vector<16x32xf32>
    %298 = arith.subf %281, %297 : vector<16x32xf32>
    %cst_134 = arith.constant 9.99999974E-6 : f32
    %299 = vector.broadcast %cst_134 : f32 to vector<16x1xf32>
    %300 = arith.addf %296, %299 : vector<16x1xf32>
    %301 = math.rsqrt %300 : vector<16x1xf32>
    %302 = vector.broadcast %301 : vector<16x1xf32> to vector<16x32xf32>
    %303 = arith.mulf %298, %302 : vector<16x32xf32>
    %304 = vector.broadcast %283 : vector<1x32xf32> to vector<16x32xf32>
    %305 = arith.mulf %303, %304 : vector<16x32xf32>
    %306 = vector.broadcast %285 : vector<1x32xf32> to vector<16x32xf32>
    %307 = arith.addf %305, %306 : vector<16x32xf32>
    %c0_135 = arith.constant 0 : index
    %c0_136 = arith.constant 0 : index
    %c0_137 = arith.constant 0 : index
    %308 = vector.load %arg20[%c0_135, %c0_136, %c0_137] : memref<2x64x32xbf16, #tpu.memory_space<vmem>>, vector<1x64x32xbf16>
    %309 = vector.shape_cast %308 : vector<1x64x32xbf16> to vector<64x32xbf16>
    %c0_138 = arith.constant 0 : index
    %c0_139 = arith.constant 0 : index
    %c0_140 = arith.constant 0 : index
    %310 = vector.load %arg21[%c0_138, %c0_139, %c0_140] : memref<2x1x64xf32, #tpu.memory_space<vmem>>, vector<1x1x64xf32>
    %311 = vector.shape_cast %310 : vector<1x1x64xf32> to vector<1x64xf32>
    %312 = arith.truncf %307 : vector<16x32xf32> to vector<16x32xbf16>
    %cst_141 = arith.constant dense<0.000000e+00> : vector<16x64xf32>
    %313 = tpu.matmul %312, %309, %cst_141 {dimension_numbers = #tpu.dot_dimension_numbers<[1], [1], [0], [0], [0, 0, 1, 0], [], []>} : vector<16x32xbf16>, vector<64x32xbf16>, vector<16x64xf32> -> vector<16x64xf32>
    %314 = vector.broadcast %311 : vector<1x64xf32> to vector<16x64xf32>
    %315 = arith.addf %313, %314 : vector<16x64xf32>
    %cst_142 = arith.constant 0.000000e+00 : f32
    %316 = vector.broadcast %cst_142 : f32 to vector<16x64xf32>
    %317 = arith.maximumf %315, %316 : vector<16x64xf32>
    %c0_143 = arith.constant 0 : index
    %c0_144 = arith.constant 0 : index
    %c0_145 = arith.constant 0 : index
    %318 = vector.load %arg22[%c0_143, %c0_144, %c0_145] : memref<2x32x64xbf16, #tpu.memory_space<vmem>>, vector<1x32x64xbf16>
    %319 = vector.shape_cast %318 : vector<1x32x64xbf16> to vector<32x64xbf16>
    %c0_146 = arith.constant 0 : index
    %c0_147 = arith.constant 0 : index
    %c0_148 = arith.constant 0 : index
    %320 = vector.load %arg23[%c0_146, %c0_147, %c0_148] : memref<2x1x32xf32, #tpu.memory_space<vmem>>, vector<1x1x32xf32>
    %321 = vector.shape_cast %320 : vector<1x1x32xf32> to vector<1x32xf32>
    %322 = arith.truncf %317 : vector<16x64xf32> to vector<16x64xbf16>
    %cst_149 = arith.constant dense<0.000000e+00> : vector<16x32xf32>
    %323 = tpu.matmul %322, %319, %cst_149 {dimension_numbers = #tpu.dot_dimension_numbers<[1], [1], [0], [0], [0, 0, 1, 0], [], []>} : vector<16x64xbf16>, vector<32x64xbf16>, vector<16x32xf32> -> vector<16x32xf32>
    %324 = vector.broadcast %321 : vector<1x32xf32> to vector<16x32xf32>
    %325 = arith.addf %323, %324 : vector<16x32xf32>
    %326 = arith.addf %307, %325 : vector<16x32xf32>
    %c0_150 = arith.constant 0 : index
    %c0_151 = arith.constant 0 : index
    %c0_152 = arith.constant 0 : index
    %327 = vector.load %arg28[%c0_150, %c0_151, %c0_152] : memref<2x1x32xf32, #tpu.memory_space<vmem>>, vector<1x1x32xf32>
    %328 = vector.shape_cast %327 : vector<1x1x32xf32> to vector<1x32xf32>
    %c0_153 = arith.constant 0 : index
    %c0_154 = arith.constant 0 : index
    %c0_155 = arith.constant 0 : index
    %329 = vector.load %arg29[%c0_153, %c0_154, %c0_155] : memref<2x1x32xf32, #tpu.memory_space<vmem>>, vector<1x1x32xf32>
    %330 = vector.shape_cast %329 : vector<1x1x32xf32> to vector<1x32xf32>
    %cst_156 = arith.constant dense<0.000000e+00> : vector<16xf32>
    %331 = vector.multi_reduction <add>, %326, %cst_156 [1] : vector<16x32xf32> to vector<16xf32>
    %332 = vector.shape_cast %331 : vector<16xf32> to vector<16x1xf32>
    %cst_157 = arith.constant 3.200000e+01 : f32
    %333 = vector.broadcast %cst_157 : f32 to vector<16x1xf32>
    %334 = arith.divf %332, %333 : vector<16x1xf32>
    %335 = vector.broadcast %334 : vector<16x1xf32> to vector<16x32xf32>
    %336 = arith.subf %326, %335 : vector<16x32xf32>
    %337 = arith.mulf %336, %336 : vector<16x32xf32>
    %cst_158 = arith.constant dense<0.000000e+00> : vector<16xf32>
    %338 = vector.multi_reduction <add>, %337, %cst_158 [1] : vector<16x32xf32> to vector<16xf32>
    %339 = vector.shape_cast %338 : vector<16xf32> to vector<16x1xf32>
    %cst_159 = arith.constant 3.200000e+01 : f32
    %340 = vector.broadcast %cst_159 : f32 to vector<16x1xf32>
    %341 = arith.divf %339, %340 : vector<16x1xf32>
    %342 = vector.broadcast %334 : vector<16x1xf32> to vector<16x32xf32>
    %343 = arith.subf %326, %342 : vector<16x32xf32>
    %cst_160 = arith.constant 9.99999974E-6 : f32
    %344 = vector.broadcast %cst_160 : f32 to vector<16x1xf32>
    %345 = arith.addf %341, %344 : vector<16x1xf32>
    %346 = math.rsqrt %345 : vector<16x1xf32>
    %347 = vector.broadcast %346 : vector<16x1xf32> to vector<16x32xf32>
    %348 = arith.mulf %343, %347 : vector<16x32xf32>
    %349 = vector.broadcast %328 : vector<1x32xf32> to vector<16x32xf32>
    %350 = arith.mulf %348, %349 : vector<16x32xf32>
    %351 = vector.broadcast %330 : vector<1x32xf32> to vector<16x32xf32>
    %352 = arith.addf %350, %351 : vector<16x32xf32>
    %c1 = arith.constant 1 : index
    %c0_161 = arith.constant 0 : index
    %c0_162 = arith.constant 0 : index
    %353 = vector.load %arg10[%c1, %c0_161, %c0_162] : memref<2x96x32xbf16, #tpu.memory_space<vmem>>, vector<1x96x32xbf16>
    %354 = vector.shape_cast %353 : vector<1x96x32xbf16> to vector<96x32xbf16>
    %c1_163 = arith.constant 1 : index
    %c0_164 = arith.constant 0 : index
    %c0_165 = arith.constant 0 : index
    %355 = vector.load %arg11[%c1_163, %c0_164, %c0_165] : memref<2x1x96xf32, #tpu.memory_space<vmem>>, vector<1x1x96xf32>
    %356 = vector.shape_cast %355 : vector<1x1x96xf32> to vector<1x96xf32>
    %357 = arith.truncf %352 : vector<16x32xf32> to vector<16x32xbf16>
    %cst_166 = arith.constant dense<0.000000e+00> : vector<16x96xf32>
    %358 = tpu.matmul %357, %354, %cst_166 {dimension_numbers = #tpu.dot_dimension_numbers<[1], [1], [0], [0], [0, 0, 1, 0], [], []>} : vector<16x32xbf16>, vector<96x32xbf16>, vector<16x96xf32> -> vector<16x96xf32>
    %359 = vector.broadcast %356 : vector<1x96xf32> to vector<16x96xf32>
    %360 = arith.addf %358, %359 : vector<16x96xf32>
    %361 = vector.extract_strided_slice %360 {offsets = [0, 0], sizes = [16, 8], strides = [1, 1]} : vector<16x96xf32> to vector<16x8xf32>
    %362 = vector.extract_strided_slice %360 {offsets = [0, 32], sizes = [16, 8], strides = [1, 1]} : vector<16x96xf32> to vector<16x8xf32>
    %363 = vector.extract_strided_slice %360 {offsets = [0, 64], sizes = [16, 8], strides = [1, 1]} : vector<16x96xf32> to vector<16x8xf32>
    %364 = arith.truncf %361 : vector<16x8xf32> to vector<16x8xbf16>
    %365 = arith.truncf %362 : vector<16x8xf32> to vector<16x8xbf16>
    %cst_167 = arith.constant dense<0.000000e+00> : vector<16x16xf32>
    %366 = tpu.matmul %364, %365, %cst_167 {dimension_numbers = #tpu.dot_dimension_numbers<[1], [1], [0], [0], [0, 0, 1, 0], [], []>} : vector<16x8xbf16>, vector<16x8xbf16>, vector<16x16xf32> -> vector<16x16xf32>
    %cst_168 = arith.constant 0.353553385 : f32
    %367 = vector.broadcast %cst_168 : f32 to vector<16x16xf32>
    %368 = arith.mulf %366, %367 : vector<16x16xf32>
    %369 = arith.addf %368, %4 : vector<16x16xf32>
    %cst_169 = arith.constant dense<0xFF800000> : vector<16xf32>
    %370 = vector.multi_reduction <maximumf>, %369, %cst_169 [1] : vector<16x16xf32> to vector<16xf32>
    %371 = vector.shape_cast %370 : vector<16xf32> to vector<16x1xf32>
    %372 = vector.broadcast %371 : vector<16x1xf32> to vector<16x16xf32>
    %373 = arith.subf %369, %372 : vector<16x16xf32>
    %374 = math.exp %373 : vector<16x16xf32>
    %cst_170 = arith.constant dense<0.000000e+00> : vector<16xf32>
    %375 = vector.multi_reduction <add>, %374, %cst_170 [1] : vector<16x16xf32> to vector<16xf32>
    %376 = vector.shape_cast %375 : vector<16xf32> to vector<16x1xf32>
    %377 = tpu.reciprocal %376 {approx = true} : vector<16x1xf32> -> vector<16x1xf32>
    %378 = vector.broadcast %377 : vector<16x1xf32> to vector<16x16xf32>
    %379 = arith.mulf %374, %378 : vector<16x16xf32>
    %380 = arith.truncf %379 : vector<16x16xf32> to vector<16x16xbf16>
    %381 = arith.truncf %363 : vector<16x8xf32> to vector<16x8xbf16>
    %cst_171 = arith.constant dense<0.000000e+00> : vector<16x8xf32>
    %382 = tpu.matmul %380, %381, %cst_171 {dimension_numbers = #tpu.dot_dimension_numbers<[1], [0], [0], [1], [0, 0, 1, 1], [], []>} : vector<16x16xbf16>, vector<16x8xbf16>, vector<16x8xf32> -> vector<16x8xf32>
    %c0_172 = arith.constant 0 : index
    %c0_173 = arith.constant 0 : index
    %383 = vector.load %arg33[%c0_172, %c0_173] : memref<16x32xf32, #tpu.memory_space<vmem>>, vector<16x8xf32>
    tpu.vector_store %arg33[%c0_172, %c0_173], %382 {strides = array<i32>} : memref<16x32xf32, #tpu.memory_space<vmem>>, vector<16x8xf32>,
    %384 = vector.extract_strided_slice %360 {offsets = [0, 8], sizes = [16, 8], strides = [1, 1]} : vector<16x96xf32> to vector<16x8xf32>
    %385 = vector.extract_strided_slice %360 {offsets = [0, 40], sizes = [16, 8], strides = [1, 1]} : vector<16x96xf32> to vector<16x8xf32>
    %386 = vector.extract_strided_slice %360 {offsets = [0, 72], sizes = [16, 8], strides = [1, 1]} : vector<16x96xf32> to vector<16x8xf32>
    %387 = arith.truncf %384 : vector<16x8xf32> to vector<16x8xbf16>
    %388 = arith.truncf %385 : vector<16x8xf32> to vector<16x8xbf16>
    %cst_174 = arith.constant dense<0.000000e+00> : vector<16x16xf32>
    %389 = tpu.matmul %387, %388, %cst_174 {dimension_numbers = #tpu.dot_dimension_numbers<[1], [1], [0], [0], [0, 0, 1, 0], [], []>} : vector<16x8xbf16>, vector<16x8xbf16>, vector<16x16xf32> -> vector<16x16xf32>
    %cst_175 = arith.constant 0.353553385 : f32
    %390 = vector.broadcast %cst_175 : f32 to vector<16x16xf32>
    %391 = arith.mulf %389, %390 : vector<16x16xf32>
    %392 = arith.addf %391, %4 : vector<16x16xf32>
    %cst_176 = arith.constant dense<0xFF800000> : vector<16xf32>
    %393 = vector.multi_reduction <maximumf>, %392, %cst_176 [1] : vector<16x16xf32> to vector<16xf32>
    %394 = vector.shape_cast %393 : vector<16xf32> to vector<16x1xf32>
    %395 = vector.broadcast %394 : vector<16x1xf32> to vector<16x16xf32>
    %396 = arith.subf %392, %395 : vector<16x16xf32>
    %397 = math.exp %396 : vector<16x16xf32>
    %cst_177 = arith.constant dense<0.000000e+00> : vector<16xf32>
    %398 = vector.multi_reduction <add>, %397, %cst_177 [1] : vector<16x16xf32> to vector<16xf32>
    %399 = vector.shape_cast %398 : vector<16xf32> to vector<16x1xf32>
    %400 = tpu.reciprocal %399 {approx = true} : vector<16x1xf32> -> vector<16x1xf32>
    %401 = vector.broadcast %400 : vector<16x1xf32> to vector<16x16xf32>
    %402 = arith.mulf %397, %401 : vector<16x16xf32>
    %403 = arith.truncf %402 : vector<16x16xf32> to vector<16x16xbf16>
    %404 = arith.truncf %386 : vector<16x8xf32> to vector<16x8xbf16>
    %cst_178 = arith.constant dense<0.000000e+00> : vector<16x8xf32>
    %405 = tpu.matmul %403, %404, %cst_178 {dimension_numbers = #tpu.dot_dimension_numbers<[1], [0], [0], [1], [0, 0, 1, 1], [], []>} : vector<16x16xbf16>, vector<16x8xbf16>, vector<16x8xf32> -> vector<16x8xf32>
    %c0_179 = arith.constant 0 : index
    %c8_180 = arith.constant 8 : index
    %406 = vector.load %arg33[%c0_179, %c8_180] : memref<16x32xf32, #tpu.memory_space<vmem>>, vector<16x8xf32>
    tpu.vector_store %arg33[%c0_179, %c8_180], %405 {strides = array<i32>} : memref<16x32xf32, #tpu.memory_space<vmem>>, vector<16x8xf32>,
    %407 = vector.extract_strided_slice %360 {offsets = [0, 16], sizes = [16, 8], strides = [1, 1]} : vector<16x96xf32> to vector<16x8xf32>
    %408 = vector.extract_strided_slice %360 {offsets = [0, 48], sizes = [16, 8], strides = [1, 1]} : vector<16x96xf32> to vector<16x8xf32>
    %409 = vector.extract_strided_slice %360 {offsets = [0, 80], sizes = [16, 8], strides = [1, 1]} : vector<16x96xf32> to vector<16x8xf32>
    %410 = arith.truncf %407 : vector<16x8xf32> to vector<16x8xbf16>
    %411 = arith.truncf %408 : vector<16x8xf32> to vector<16x8xbf16>
    %cst_181 = arith.constant dense<0.000000e+00> : vector<16x16xf32>
    %412 = tpu.matmul %410, %411, %cst_181 {dimension_numbers = #tpu.dot_dimension_numbers<[1], [1], [0], [0], [0, 0, 1, 0], [], []>} : vector<16x8xbf16>, vector<16x8xbf16>, vector<16x16xf32> -> vector<16x16xf32>
    %cst_182 = arith.constant 0.353553385 : f32
    %413 = vector.broadcast %cst_182 : f32 to vector<16x16xf32>
    %414 = arith.mulf %412, %413 : vector<16x16xf32>
    %415 = arith.addf %414, %4 : vector<16x16xf32>
    %cst_183 = arith.constant dense<0xFF800000> : vector<16xf32>
    %416 = vector.multi_reduction <maximumf>, %415, %cst_183 [1] : vector<16x16xf32> to vector<16xf32>
    %417 = vector.shape_cast %416 : vector<16xf32> to vector<16x1xf32>
    %418 = vector.broadcast %417 : vector<16x1xf32> to vector<16x16xf32>
    %419 = arith.subf %415, %418 : vector<16x16xf32>
    %420 = math.exp %419 : vector<16x16xf32>
    %cst_184 = arith.constant dense<0.000000e+00> : vector<16xf32>
    %421 = vector.multi_reduction <add>, %420, %cst_184 [1] : vector<16x16xf32> to vector<16xf32>
    %422 = vector.shape_cast %421 : vector<16xf32> to vector<16x1xf32>
    %423 = tpu.reciprocal %422 {approx = true} : vector<16x1xf32> -> vector<16x1xf32>
    %424 = vector.broadcast %423 : vector<16x1xf32> to vector<16x16xf32>
    %425 = arith.mulf %420, %424 : vector<16x16xf32>
    %426 = arith.truncf %425 : vector<16x16xf32> to vector<16x16xbf16>
    %427 = arith.truncf %409 : vector<16x8xf32> to vector<16x8xbf16>
    %cst_185 = arith.constant dense<0.000000e+00> : vector<16x8xf32>
    %428 = tpu.matmul %426, %427, %cst_185 {dimension_numbers = #tpu.dot_dimension_numbers<[1], [0], [0], [1], [0, 0, 1, 1], [], []>} : vector<16x16xbf16>, vector<16x8xbf16>, vector<16x8xf32> -> vector<16x8xf32>
    %c0_186 = arith.constant 0 : index
    %c16_187 = arith.constant 16 : index
    %429 = vector.load %arg33[%c0_186, %c16_187] : memref<16x32xf32, #tpu.memory_space<vmem>>, vector<16x8xf32>
    tpu.vector_store %arg33[%c0_186, %c16_187], %428 {strides = array<i32>} : memref<16x32xf32, #tpu.memory_space<vmem>>, vector<16x8xf32>,
    %430 = vector.extract_strided_slice %360 {offsets = [0, 24], sizes = [16, 8], strides = [1, 1]} : vector<16x96xf32> to vector<16x8xf32>
    %431 = vector.extract_strided_slice %360 {offsets = [0, 56], sizes = [16, 8], strides = [1, 1]} : vector<16x96xf32> to vector<16x8xf32>
    %432 = vector.extract_strided_slice %360 {offsets = [0, 88], sizes = [16, 8], strides = [1, 1]} : vector<16x96xf32> to vector<16x8xf32>
    %433 = arith.truncf %430 : vector<16x8xf32> to vector<16x8xbf16>
    %434 = arith.truncf %431 : vector<16x8xf32> to vector<16x8xbf16>
    %cst_188 = arith.constant dense<0.000000e+00> : vector<16x16xf32>
    %435 = tpu.matmul %433, %434, %cst_188 {dimension_numbers = #tpu.dot_dimension_numbers<[1], [1], [0], [0], [0, 0, 1, 0], [], []>} : vector<16x8xbf16>, vector<16x8xbf16>, vector<16x16xf32> -> vector<16x16xf32>
    %cst_189 = arith.constant 0.353553385 : f32
    %436 = vector.broadcast %cst_189 : f32 to vector<16x16xf32>
    %437 = arith.mulf %435, %436 : vector<16x16xf32>
    %438 = arith.addf %437, %4 : vector<16x16xf32>
    %cst_190 = arith.constant dense<0xFF800000> : vector<16xf32>
    %439 = vector.multi_reduction <maximumf>, %438, %cst_190 [1] : vector<16x16xf32> to vector<16xf32>
    %440 = vector.shape_cast %439 : vector<16xf32> to vector<16x1xf32>
    %441 = vector.broadcast %440 : vector<16x1xf32> to vector<16x16xf32>
    %442 = arith.subf %438, %441 : vector<16x16xf32>
    %443 = math.exp %442 : vector<16x16xf32>
    %cst_191 = arith.constant dense<0.000000e+00> : vector<16xf32>
    %444 = vector.multi_reduction <add>, %443, %cst_191 [1] : vector<16x16xf32> to vector<16xf32>
    %445 = vector.shape_cast %444 : vector<16xf32> to vector<16x1xf32>
    %446 = tpu.reciprocal %445 {approx = true} : vector<16x1xf32> -> vector<16x1xf32>
    %447 = vector.broadcast %446 : vector<16x1xf32> to vector<16x16xf32>
    %448 = arith.mulf %443, %447 : vector<16x16xf32>
    %449 = arith.truncf %448 : vector<16x16xf32> to vector<16x16xbf16>
    %450 = arith.truncf %432 : vector<16x8xf32> to vector<16x8xbf16>
    %cst_192 = arith.constant dense<0.000000e+00> : vector<16x8xf32>
    %451 = tpu.matmul %449, %450, %cst_192 {dimension_numbers = #tpu.dot_dimension_numbers<[1], [0], [0], [1], [0, 0, 1, 1], [], []>} : vector<16x16xbf16>, vector<16x8xbf16>, vector<16x8xf32> -> vector<16x8xf32>
    %c0_193 = arith.constant 0 : index
    %c24_194 = arith.constant 24 : index
    %452 = vector.load %arg33[%c0_193, %c24_194] : memref<16x32xf32, #tpu.memory_space<vmem>>, vector<16x8xf32>
    tpu.vector_store %arg33[%c0_193, %c24_194], %451 {strides = array<i32>} : memref<16x32xf32, #tpu.memory_space<vmem>>, vector<16x8xf32>,
    %c0_195 = arith.constant 0 : index
    %c0_196 = arith.constant 0 : index
    %453 = vector.load %arg33[%c0_195, %c0_196] : memref<16x32xf32, #tpu.memory_space<vmem>>, vector<16x32xf32>
    %c1_197 = arith.constant 1 : index
    %c0_198 = arith.constant 0 : index
    %c0_199 = arith.constant 0 : index
    %454 = vector.load %arg12[%c1_197, %c0_198, %c0_199] : memref<2x32x32xbf16, #tpu.memory_space<vmem>>, vector<1x32x32xbf16>
    %455 = vector.shape_cast %454 : vector<1x32x32xbf16> to vector<32x32xbf16>
    %c1_200 = arith.constant 1 : index
    %c0_201 = arith.constant 0 : index
    %c0_202 = arith.constant 0 : index
    %456 = vector.load %arg13[%c1_200, %c0_201, %c0_202] : memref<2x1x32xf32, #tpu.memory_space<vmem>>, vector<1x1x32xf32>
    %457 = vector.shape_cast %456 : vector<1x1x32xf32> to vector<1x32xf32>
    %458 = arith.truncf %453 : vector<16x32xf32> to vector<16x32xbf16>
    %cst_203 = arith.constant dense<0.000000e+00> : vector<16x32xf32>
    %459 = tpu.matmul %458, %455, %cst_203 {dimension_numbers = #tpu.dot_dimension_numbers<[1], [1], [0], [0], [0, 0, 1, 0], [], []>} : vector<16x32xbf16>, vector<32x32xbf16>, vector<16x32xf32> -> vector<16x32xf32>
    %460 = vector.broadcast %457 : vector<1x32xf32> to vector<16x32xf32>
    %461 = arith.addf %459, %460 : vector<16x32xf32>
    %462 = arith.addf %352, %461 : vector<16x32xf32>
    %c1_204 = arith.constant 1 : index
    %c0_205 = arith.constant 0 : index
    %c0_206 = arith.constant 0 : index
    %463 = vector.load %arg24[%c1_204, %c0_205, %c0_206] : memref<2x1x32xf32, #tpu.memory_space<vmem>>, vector<1x1x32xf32>
    %464 = vector.shape_cast %463 : vector<1x1x32xf32> to vector<1x32xf32>
    %c1_207 = arith.constant 1 : index
    %c0_208 = arith.constant 0 : index
    %c0_209 = arith.constant 0 : index
    %465 = vector.load %arg25[%c1_207, %c0_208, %c0_209] : memref<2x1x32xf32, #tpu.memory_space<vmem>>, vector<1x1x32xf32>
    %466 = vector.shape_cast %465 : vector<1x1x32xf32> to vector<1x32xf32>
    %cst_210 = arith.constant dense<0.000000e+00> : vector<16xf32>
    %467 = vector.multi_reduction <add>, %462, %cst_210 [1] : vector<16x32xf32> to vector<16xf32>
    %468 = vector.shape_cast %467 : vector<16xf32> to vector<16x1xf32>
    %cst_211 = arith.constant 3.200000e+01 : f32
    %469 = vector.broadcast %cst_211 : f32 to vector<16x1xf32>
    %470 = arith.divf %468, %469 : vector<16x1xf32>
    %471 = vector.broadcast %470 : vector<16x1xf32> to vector<16x32xf32>
    %472 = arith.subf %462, %471 : vector<16x32xf32>
    %473 = arith.mulf %472, %472 : vector<16x32xf32>
    %cst_212 = arith.constant dense<0.000000e+00> : vector<16xf32>
    %474 = vector.multi_reduction <add>, %473, %cst_212 [1] : vector<16x32xf32> to vector<16xf32>
    %475 = vector.shape_cast %474 : vector<16xf32> to vector<16x1xf32>
    %cst_213 = arith.constant 3.200000e+01 : f32
    %476 = vector.broadcast %cst_213 : f32 to vector<16x1xf32>
    %477 = arith.divf %475, %476 : vector<16x1xf32>
    %478 = vector.broadcast %470 : vector<16x1xf32> to vector<16x32xf32>
    %479 = arith.subf %462, %478 : vector<16x32xf32>
    %cst_214 = arith.constant 9.99999974E-6 : f32
    %480 = vector.broadcast %cst_214 : f32 to vector<16x1xf32>
    %481 = arith.addf %477, %480 : vector<16x1xf32>
    %482 = math.rsqrt %481 : vector<16x1xf32>
    %483 = vector.broadcast %482 : vector<16x1xf32> to vector<16x32xf32>
    %484 = arith.mulf %479, %483 : vector<16x32xf32>
    %485 = vector.broadcast %464 : vector<1x32xf32> to vector<16x32xf32>
    %486 = arith.mulf %484, %485 : vector<16x32xf32>
    %487 = vector.broadcast %466 : vector<1x32xf32> to vector<16x32xf32>
    %488 = arith.addf %486, %487 : vector<16x32xf32>
    %c1_215 = arith.constant 1 : index
    %c0_216 = arith.constant 0 : index
    %c0_217 = arith.constant 0 : index
    %489 = vector.load %arg14[%c1_215, %c0_216, %c0_217] : memref<2x32x32xbf16, #tpu.memory_space<vmem>>, vector<1x32x32xbf16>
    %490 = vector.shape_cast %489 : vector<1x32x32xbf16> to vector<32x32xbf16>
    %c1_218 = arith.constant 1 : index
    %c0_219 = arith.constant 0 : index
    %c0_220 = arith.constant 0 : index
    %491 = vector.load %arg15[%c1_218, %c0_219, %c0_220] : memref<2x1x32xf32, #tpu.memory_space<vmem>>, vector<1x1x32xf32>
    %492 = vector.shape_cast %491 : vector<1x1x32xf32> to vector<1x32xf32>
    %493 = arith.truncf %488 : vector<16x32xf32> to vector<16x32xbf16>
    %cst_221 = arith.constant dense<0.000000e+00> : vector<16x32xf32>
    %494 = tpu.matmul %493, %490, %cst_221 {dimension_numbers = #tpu.dot_dimension_numbers<[1], [1], [0], [0], [0, 0, 1, 0], [], []>} : vector<16x32xbf16>, vector<32x32xbf16>, vector<16x32xf32> -> vector<16x32xf32>
    %495 = vector.broadcast %492 : vector<1x32xf32> to vector<16x32xf32>
    %496 = arith.addf %494, %495 : vector<16x32xf32>
    %c1_222 = arith.constant 1 : index
    %c0_223 = arith.constant 0 : index
    %c0_224 = arith.constant 0 : index
    %497 = vector.load %arg16[%c1_222, %c0_223, %c0_224] : memref<2x64x32xbf16, #tpu.memory_space<vmem>>, vector<1x64x32xbf16>
    %498 = vector.shape_cast %497 : vector<1x64x32xbf16> to vector<64x32xbf16>
    %c1_225 = arith.constant 1 : index
    %c0_226 = arith.constant 0 : index
    %c0_227 = arith.constant 0 : index
    %499 = vector.load %arg17[%c1_225, %c0_226, %c0_227] : memref<2x1x64xf32, #tpu.memory_space<vmem>>, vector<1x1x64xf32>
    %500 = vector.shape_cast %499 : vector<1x1x64xf32> to vector<1x64xf32>
    %cst_228 = arith.constant dense<0.000000e+00> : vector<16x64xf32>
    %501 = tpu.matmul %3, %498, %cst_228 {dimension_numbers = #tpu.dot_dimension_numbers<[1], [1], [0], [0], [0, 0, 1, 0], [], []>} : vector<16x32xbf16>, vector<64x32xbf16>, vector<16x64xf32> -> vector<16x64xf32>
    %502 = vector.broadcast %500 : vector<1x64xf32> to vector<16x64xf32>
    %503 = arith.addf %501, %502 : vector<16x64xf32>
    %504 = vector.extract_strided_slice %496 {offsets = [0, 0], sizes = [16, 8], strides = [1, 1]} : vector<16x32xf32> to vector<16x8xf32>
    %505 = vector.extract_strided_slice %503 {offsets = [0, 0], sizes = [16, 8], strides = [1, 1]} : vector<16x64xf32> to vector<16x8xf32>
    %506 = vector.extract_strided_slice %503 {offsets = [0, 32], sizes = [16, 8], strides = [1, 1]} : vector<16x64xf32> to vector<16x8xf32>
    %507 = arith.truncf %504 : vector<16x8xf32> to vector<16x8xbf16>
    %508 = arith.truncf %505 : vector<16x8xf32> to vector<16x8xbf16>
    %cst_229 = arith.constant dense<0.000000e+00> : vector<16x16xf32>
    %509 = tpu.matmul %507, %508, %cst_229 {dimension_numbers = #tpu.dot_dimension_numbers<[1], [1], [0], [0], [0, 0, 1, 0], [], []>} : vector<16x8xbf16>, vector<16x8xbf16>, vector<16x16xf32> -> vector<16x16xf32>
    %cst_230 = arith.constant 0.353553385 : f32
    %510 = vector.broadcast %cst_230 : f32 to vector<16x16xf32>
    %511 = arith.mulf %509, %510 : vector<16x16xf32>
    %512 = vector.broadcast %5 : vector<1x16xf32> to vector<16x16xf32>
    %513 = arith.addf %511, %512 : vector<16x16xf32>
    %cst_231 = arith.constant dense<0xFF800000> : vector<16xf32>
    %514 = vector.multi_reduction <maximumf>, %513, %cst_231 [1] : vector<16x16xf32> to vector<16xf32>
    %515 = vector.shape_cast %514 : vector<16xf32> to vector<16x1xf32>
    %516 = vector.broadcast %515 : vector<16x1xf32> to vector<16x16xf32>
    %517 = arith.subf %513, %516 : vector<16x16xf32>
    %518 = math.exp %517 : vector<16x16xf32>
    %cst_232 = arith.constant dense<0.000000e+00> : vector<16xf32>
    %519 = vector.multi_reduction <add>, %518, %cst_232 [1] : vector<16x16xf32> to vector<16xf32>
    %520 = vector.shape_cast %519 : vector<16xf32> to vector<16x1xf32>
    %521 = tpu.reciprocal %520 {approx = true} : vector<16x1xf32> -> vector<16x1xf32>
    %522 = vector.broadcast %521 : vector<16x1xf32> to vector<16x16xf32>
    %523 = arith.mulf %518, %522 : vector<16x16xf32>
    %524 = arith.truncf %523 : vector<16x16xf32> to vector<16x16xbf16>
    %525 = arith.truncf %506 : vector<16x8xf32> to vector<16x8xbf16>
    %cst_233 = arith.constant dense<0.000000e+00> : vector<16x8xf32>
    %526 = tpu.matmul %524, %525, %cst_233 {dimension_numbers = #tpu.dot_dimension_numbers<[1], [0], [0], [1], [0, 0, 1, 1], [], []>} : vector<16x16xbf16>, vector<16x8xbf16>, vector<16x8xf32> -> vector<16x8xf32>
    %c0_234 = arith.constant 0 : index
    %c0_235 = arith.constant 0 : index
    %527 = vector.load %arg33[%c0_234, %c0_235] : memref<16x32xf32, #tpu.memory_space<vmem>>, vector<16x8xf32>
    tpu.vector_store %arg33[%c0_234, %c0_235], %526 {strides = array<i32>} : memref<16x32xf32, #tpu.memory_space<vmem>>, vector<16x8xf32>,
    %528 = vector.extract_strided_slice %496 {offsets = [0, 8], sizes = [16, 8], strides = [1, 1]} : vector<16x32xf32> to vector<16x8xf32>
    %529 = vector.extract_strided_slice %503 {offsets = [0, 8], sizes = [16, 8], strides = [1, 1]} : vector<16x64xf32> to vector<16x8xf32>
    %530 = vector.extract_strided_slice %503 {offsets = [0, 40], sizes = [16, 8], strides = [1, 1]} : vector<16x64xf32> to vector<16x8xf32>
    %531 = arith.truncf %528 : vector<16x8xf32> to vector<16x8xbf16>
    %532 = arith.truncf %529 : vector<16x8xf32> to vector<16x8xbf16>
    %cst_236 = arith.constant dense<0.000000e+00> : vector<16x16xf32>
    %533 = tpu.matmul %531, %532, %cst_236 {dimension_numbers = #tpu.dot_dimension_numbers<[1], [1], [0], [0], [0, 0, 1, 0], [], []>} : vector<16x8xbf16>, vector<16x8xbf16>, vector<16x16xf32> -> vector<16x16xf32>
    %cst_237 = arith.constant 0.353553385 : f32
    %534 = vector.broadcast %cst_237 : f32 to vector<16x16xf32>
    %535 = arith.mulf %533, %534 : vector<16x16xf32>
    %536 = vector.broadcast %5 : vector<1x16xf32> to vector<16x16xf32>
    %537 = arith.addf %535, %536 : vector<16x16xf32>
    %cst_238 = arith.constant dense<0xFF800000> : vector<16xf32>
    %538 = vector.multi_reduction <maximumf>, %537, %cst_238 [1] : vector<16x16xf32> to vector<16xf32>
    %539 = vector.shape_cast %538 : vector<16xf32> to vector<16x1xf32>
    %540 = vector.broadcast %539 : vector<16x1xf32> to vector<16x16xf32>
    %541 = arith.subf %537, %540 : vector<16x16xf32>
    %542 = math.exp %541 : vector<16x16xf32>
    %cst_239 = arith.constant dense<0.000000e+00> : vector<16xf32>
    %543 = vector.multi_reduction <add>, %542, %cst_239 [1] : vector<16x16xf32> to vector<16xf32>
    %544 = vector.shape_cast %543 : vector<16xf32> to vector<16x1xf32>
    %545 = tpu.reciprocal %544 {approx = true} : vector<16x1xf32> -> vector<16x1xf32>
    %546 = vector.broadcast %545 : vector<16x1xf32> to vector<16x16xf32>
    %547 = arith.mulf %542, %546 : vector<16x16xf32>
    %548 = arith.truncf %547 : vector<16x16xf32> to vector<16x16xbf16>
    %549 = arith.truncf %530 : vector<16x8xf32> to vector<16x8xbf16>
    %cst_240 = arith.constant dense<0.000000e+00> : vector<16x8xf32>
    %550 = tpu.matmul %548, %549, %cst_240 {dimension_numbers = #tpu.dot_dimension_numbers<[1], [0], [0], [1], [0, 0, 1, 1], [], []>} : vector<16x16xbf16>, vector<16x8xbf16>, vector<16x8xf32> -> vector<16x8xf32>
    %c0_241 = arith.constant 0 : index
    %c8_242 = arith.constant 8 : index
    %551 = vector.load %arg33[%c0_241, %c8_242] : memref<16x32xf32, #tpu.memory_space<vmem>>, vector<16x8xf32>
    tpu.vector_store %arg33[%c0_241, %c8_242], %550 {strides = array<i32>} : memref<16x32xf32, #tpu.memory_space<vmem>>, vector<16x8xf32>,
    %552 = vector.extract_strided_slice %496 {offsets = [0, 16], sizes = [16, 8], strides = [1, 1]} : vector<16x32xf32> to vector<16x8xf32>
    %553 = vector.extract_strided_slice %503 {offsets = [0, 16], sizes = [16, 8], strides = [1, 1]} : vector<16x64xf32> to vector<16x8xf32>
    %554 = vector.extract_strided_slice %503 {offsets = [0, 48], sizes = [16, 8], strides = [1, 1]} : vector<16x64xf32> to vector<16x8xf32>
    %555 = arith.truncf %552 : vector<16x8xf32> to vector<16x8xbf16>
    %556 = arith.truncf %553 : vector<16x8xf32> to vector<16x8xbf16>
    %cst_243 = arith.constant dense<0.000000e+00> : vector<16x16xf32>
    %557 = tpu.matmul %555, %556, %cst_243 {dimension_numbers = #tpu.dot_dimension_numbers<[1], [1], [0], [0], [0, 0, 1, 0], [], []>} : vector<16x8xbf16>, vector<16x8xbf16>, vector<16x16xf32> -> vector<16x16xf32>
    %cst_244 = arith.constant 0.353553385 : f32
    %558 = vector.broadcast %cst_244 : f32 to vector<16x16xf32>
    %559 = arith.mulf %557, %558 : vector<16x16xf32>
    %560 = vector.broadcast %5 : vector<1x16xf32> to vector<16x16xf32>
    %561 = arith.addf %559, %560 : vector<16x16xf32>
    %cst_245 = arith.constant dense<0xFF800000> : vector<16xf32>
    %562 = vector.multi_reduction <maximumf>, %561, %cst_245 [1] : vector<16x16xf32> to vector<16xf32>
    %563 = vector.shape_cast %562 : vector<16xf32> to vector<16x1xf32>
    %564 = vector.broadcast %563 : vector<16x1xf32> to vector<16x16xf32>
    %565 = arith.subf %561, %564 : vector<16x16xf32>
    %566 = math.exp %565 : vector<16x16xf32>
    %cst_246 = arith.constant dense<0.000000e+00> : vector<16xf32>
    %567 = vector.multi_reduction <add>, %566, %cst_246 [1] : vector<16x16xf32> to vector<16xf32>
    %568 = vector.shape_cast %567 : vector<16xf32> to vector<16x1xf32>
    %569 = tpu.reciprocal %568 {approx = true} : vector<16x1xf32> -> vector<16x1xf32>
    %570 = vector.broadcast %569 : vector<16x1xf32> to vector<16x16xf32>
    %571 = arith.mulf %566, %570 : vector<16x16xf32>
    %572 = arith.truncf %571 : vector<16x16xf32> to vector<16x16xbf16>
    %573 = arith.truncf %554 : vector<16x8xf32> to vector<16x8xbf16>
    %cst_247 = arith.constant dense<0.000000e+00> : vector<16x8xf32>
    %574 = tpu.matmul %572, %573, %cst_247 {dimension_numbers = #tpu.dot_dimension_numbers<[1], [0], [0], [1], [0, 0, 1, 1], [], []>} : vector<16x16xbf16>, vector<16x8xbf16>, vector<16x8xf32> -> vector<16x8xf32>
    %c0_248 = arith.constant 0 : index
    %c16_249 = arith.constant 16 : index
    %575 = vector.load %arg33[%c0_248, %c16_249] : memref<16x32xf32, #tpu.memory_space<vmem>>, vector<16x8xf32>
    tpu.vector_store %arg33[%c0_248, %c16_249], %574 {strides = array<i32>} : memref<16x32xf32, #tpu.memory_space<vmem>>, vector<16x8xf32>,
    %576 = vector.extract_strided_slice %496 {offsets = [0, 24], sizes = [16, 8], strides = [1, 1]} : vector<16x32xf32> to vector<16x8xf32>
    %577 = vector.extract_strided_slice %503 {offsets = [0, 24], sizes = [16, 8], strides = [1, 1]} : vector<16x64xf32> to vector<16x8xf32>
    %578 = vector.extract_strided_slice %503 {offsets = [0, 56], sizes = [16, 8], strides = [1, 1]} : vector<16x64xf32> to vector<16x8xf32>
    %579 = arith.truncf %576 : vector<16x8xf32> to vector<16x8xbf16>
    %580 = arith.truncf %577 : vector<16x8xf32> to vector<16x8xbf16>
    %cst_250 = arith.constant dense<0.000000e+00> : vector<16x16xf32>
    %581 = tpu.matmul %579, %580, %cst_250 {dimension_numbers = #tpu.dot_dimension_numbers<[1], [1], [0], [0], [0, 0, 1, 0], [], []>} : vector<16x8xbf16>, vector<16x8xbf16>, vector<16x16xf32> -> vector<16x16xf32>
    %cst_251 = arith.constant 0.353553385 : f32
    %582 = vector.broadcast %cst_251 : f32 to vector<16x16xf32>
    %583 = arith.mulf %581, %582 : vector<16x16xf32>
    %584 = vector.broadcast %5 : vector<1x16xf32> to vector<16x16xf32>
    %585 = arith.addf %583, %584 : vector<16x16xf32>
    %cst_252 = arith.constant dense<0xFF800000> : vector<16xf32>
    %586 = vector.multi_reduction <maximumf>, %585, %cst_252 [1] : vector<16x16xf32> to vector<16xf32>
    %587 = vector.shape_cast %586 : vector<16xf32> to vector<16x1xf32>
    %588 = vector.broadcast %587 : vector<16x1xf32> to vector<16x16xf32>
    %589 = arith.subf %585, %588 : vector<16x16xf32>
    %590 = math.exp %589 : vector<16x16xf32>
    %cst_253 = arith.constant dense<0.000000e+00> : vector<16xf32>
    %591 = vector.multi_reduction <add>, %590, %cst_253 [1] : vector<16x16xf32> to vector<16xf32>
    %592 = vector.shape_cast %591 : vector<16xf32> to vector<16x1xf32>
    %593 = tpu.reciprocal %592 {approx = true} : vector<16x1xf32> -> vector<16x1xf32>
    %594 = vector.broadcast %593 : vector<16x1xf32> to vector<16x16xf32>
    %595 = arith.mulf %590, %594 : vector<16x16xf32>
    %596 = arith.truncf %595 : vector<16x16xf32> to vector<16x16xbf16>
    %597 = arith.truncf %578 : vector<16x8xf32> to vector<16x8xbf16>
    %cst_254 = arith.constant dense<0.000000e+00> : vector<16x8xf32>
    %598 = tpu.matmul %596, %597, %cst_254 {dimension_numbers = #tpu.dot_dimension_numbers<[1], [0], [0], [1], [0, 0, 1, 1], [], []>} : vector<16x16xbf16>, vector<16x8xbf16>, vector<16x8xf32> -> vector<16x8xf32>
    %c0_255 = arith.constant 0 : index
    %c24_256 = arith.constant 24 : index
    %599 = vector.load %arg33[%c0_255, %c24_256] : memref<16x32xf32, #tpu.memory_space<vmem>>, vector<16x8xf32>
    tpu.vector_store %arg33[%c0_255, %c24_256], %598 {strides = array<i32>} : memref<16x32xf32, #tpu.memory_space<vmem>>, vector<16x8xf32>,
    %c0_257 = arith.constant 0 : index
    %c0_258 = arith.constant 0 : index
    %600 = vector.load %arg33[%c0_257, %c0_258] : memref<16x32xf32, #tpu.memory_space<vmem>>, vector<16x32xf32>
    %c1_259 = arith.constant 1 : index
    %c0_260 = arith.constant 0 : index
    %c0_261 = arith.constant 0 : index
    %601 = vector.load %arg18[%c1_259, %c0_260, %c0_261] : memref<2x32x32xbf16, #tpu.memory_space<vmem>>, vector<1x32x32xbf16>
    %602 = vector.shape_cast %601 : vector<1x32x32xbf16> to vector<32x32xbf16>
    %c1_262 = arith.constant 1 : index
    %c0_263 = arith.constant 0 : index
    %c0_264 = arith.constant 0 : index
    %603 = vector.load %arg19[%c1_262, %c0_263, %c0_264] : memref<2x1x32xf32, #tpu.memory_space<vmem>>, vector<1x1x32xf32>
    %604 = vector.shape_cast %603 : vector<1x1x32xf32> to vector<1x32xf32>
    %605 = arith.truncf %600 : vector<16x32xf32> to vector<16x32xbf16>
    %cst_265 = arith.constant dense<0.000000e+00> : vector<16x32xf32>
    %606 = tpu.matmul %605, %602, %cst_265 {dimension_numbers = #tpu.dot_dimension_numbers<[1], [1], [0], [0], [0, 0, 1, 0], [], []>} : vector<16x32xbf16>, vector<32x32xbf16>, vector<16x32xf32> -> vector<16x32xf32>
    %607 = vector.broadcast %604 : vector<1x32xf32> to vector<16x32xf32>
    %608 = arith.addf %606, %607 : vector<16x32xf32>
    %609 = arith.addf %488, %608 : vector<16x32xf32>
    %c1_266 = arith.constant 1 : index
    %c0_267 = arith.constant 0 : index
    %c0_268 = arith.constant 0 : index
    %610 = vector.load %arg26[%c1_266, %c0_267, %c0_268] : memref<2x1x32xf32, #tpu.memory_space<vmem>>, vector<1x1x32xf32>
    %611 = vector.shape_cast %610 : vector<1x1x32xf32> to vector<1x32xf32>
    %c1_269 = arith.constant 1 : index
    %c0_270 = arith.constant 0 : index
    %c0_271 = arith.constant 0 : index
    %612 = vector.load %arg27[%c1_269, %c0_270, %c0_271] : memref<2x1x32xf32, #tpu.memory_space<vmem>>, vector<1x1x32xf32>
    %613 = vector.shape_cast %612 : vector<1x1x32xf32> to vector<1x32xf32>
    %cst_272 = arith.constant dense<0.000000e+00> : vector<16xf32>
    %614 = vector.multi_reduction <add>, %609, %cst_272 [1] : vector<16x32xf32> to vector<16xf32>
    %615 = vector.shape_cast %614 : vector<16xf32> to vector<16x1xf32>
    %cst_273 = arith.constant 3.200000e+01 : f32
    %616 = vector.broadcast %cst_273 : f32 to vector<16x1xf32>
    %617 = arith.divf %615, %616 : vector<16x1xf32>
    %618 = vector.broadcast %617 : vector<16x1xf32> to vector<16x32xf32>
    %619 = arith.subf %609, %618 : vector<16x32xf32>
    %620 = arith.mulf %619, %619 : vector<16x32xf32>
    %cst_274 = arith.constant dense<0.000000e+00> : vector<16xf32>
    %621 = vector.multi_reduction <add>, %620, %cst_274 [1] : vector<16x32xf32> to vector<16xf32>
    %622 = vector.shape_cast %621 : vector<16xf32> to vector<16x1xf32>
    %cst_275 = arith.constant 3.200000e+01 : f32
    %623 = vector.broadcast %cst_275 : f32 to vector<16x1xf32>
    %624 = arith.divf %622, %623 : vector<16x1xf32>
    %625 = vector.broadcast %617 : vector<16x1xf32> to vector<16x32xf32>
    %626 = arith.subf %609, %625 : vector<16x32xf32>
    %cst_276 = arith.constant 9.99999974E-6 : f32
    %627 = vector.broadcast %cst_276 : f32 to vector<16x1xf32>
    %628 = arith.addf %624, %627 : vector<16x1xf32>
    %629 = math.rsqrt %628 : vector<16x1xf32>
    %630 = vector.broadcast %629 : vector<16x1xf32> to vector<16x32xf32>
    %631 = arith.mulf %626, %630 : vector<16x32xf32>
    %632 = vector.broadcast %611 : vector<1x32xf32> to vector<16x32xf32>
    %633 = arith.mulf %631, %632 : vector<16x32xf32>
    %634 = vector.broadcast %613 : vector<1x32xf32> to vector<16x32xf32>
    %635 = arith.addf %633, %634 : vector<16x32xf32>
    %c1_277 = arith.constant 1 : index
    %c0_278 = arith.constant 0 : index
    %c0_279 = arith.constant 0 : index
    %636 = vector.load %arg20[%c1_277, %c0_278, %c0_279] : memref<2x64x32xbf16, #tpu.memory_space<vmem>>, vector<1x64x32xbf16>
    %637 = vector.shape_cast %636 : vector<1x64x32xbf16> to vector<64x32xbf16>
    %c1_280 = arith.constant 1 : index
    %c0_281 = arith.constant 0 : index
    %c0_282 = arith.constant 0 : index
    %638 = vector.load %arg21[%c1_280, %c0_281, %c0_282] : memref<2x1x64xf32, #tpu.memory_space<vmem>>, vector<1x1x64xf32>
    %639 = vector.shape_cast %638 : vector<1x1x64xf32> to vector<1x64xf32>
    %640 = arith.truncf %635 : vector<16x32xf32> to vector<16x32xbf16>
    %cst_283 = arith.constant dense<0.000000e+00> : vector<16x64xf32>
    %641 = tpu.matmul %640, %637, %cst_283 {dimension_numbers = #tpu.dot_dimension_numbers<[1], [1], [0], [0], [0, 0, 1, 0], [], []>} : vector<16x32xbf16>, vector<64x32xbf16>, vector<16x64xf32> -> vector<16x64xf32>
    %642 = vector.broadcast %639 : vector<1x64xf32> to vector<16x64xf32>
    %643 = arith.addf %641, %642 : vector<16x64xf32>
    %cst_284 = arith.constant 0.000000e+00 : f32
    %644 = vector.broadcast %cst_284 : f32 to vector<16x64xf32>
    %645 = arith.maximumf %643, %644 : vector<16x64xf32>
    %c1_285 = arith.constant 1 : index
    %c0_286 = arith.constant 0 : index
    %c0_287 = arith.constant 0 : index
    %646 = vector.load %arg22[%c1_285, %c0_286, %c0_287] : memref<2x32x64xbf16, #tpu.memory_space<vmem>>, vector<1x32x64xbf16>
    %647 = vector.shape_cast %646 : vector<1x32x64xbf16> to vector<32x64xbf16>
    %c1_288 = arith.constant 1 : index
    %c0_289 = arith.constant 0 : index
    %c0_290 = arith.constant 0 : index
    %648 = vector.load %arg23[%c1_288, %c0_289, %c0_290] : memref<2x1x32xf32, #tpu.memory_space<vmem>>, vector<1x1x32xf32>
    %649 = vector.shape_cast %648 : vector<1x1x32xf32> to vector<1x32xf32>
    %650 = arith.truncf %645 : vector<16x64xf32> to vector<16x64xbf16>
    %cst_291 = arith.constant dense<0.000000e+00> : vector<16x32xf32>
    %651 = tpu.matmul %650, %647, %cst_291 {dimension_numbers = #tpu.dot_dimension_numbers<[1], [1], [0], [0], [0, 0, 1, 0], [], []>} : vector<16x64xbf16>, vector<32x64xbf16>, vector<16x32xf32> -> vector<16x32xf32>
    %652 = vector.broadcast %649 : vector<1x32xf32> to vector<16x32xf32>
    %653 = arith.addf %651, %652 : vector<16x32xf32>
    %654 = arith.addf %635, %653 : vector<16x32xf32>
    %c1_292 = arith.constant 1 : index
    %c0_293 = arith.constant 0 : index
    %c0_294 = arith.constant 0 : index
    %655 = vector.load %arg28[%c1_292, %c0_293, %c0_294] : memref<2x1x32xf32, #tpu.memory_space<vmem>>, vector<1x1x32xf32>
    %656 = vector.shape_cast %655 : vector<1x1x32xf32> to vector<1x32xf32>
    %c1_295 = arith.constant 1 : index
    %c0_296 = arith.constant 0 : index
    %c0_297 = arith.constant 0 : index
    %657 = vector.load %arg29[%c1_295, %c0_296, %c0_297] : memref<2x1x32xf32, #tpu.memory_space<vmem>>, vector<1x1x32xf32>
    %658 = vector.shape_cast %657 : vector<1x1x32xf32> to vector<1x32xf32>
    %cst_298 = arith.constant dense<0.000000e+00> : vector<16xf32>
    %659 = vector.multi_reduction <add>, %654, %cst_298 [1] : vector<16x32xf32> to vector<16xf32>
    %660 = vector.shape_cast %659 : vector<16xf32> to vector<16x1xf32>
    %cst_299 = arith.constant 3.200000e+01 : f32
    %661 = vector.broadcast %cst_299 : f32 to vector<16x1xf32>
    %662 = arith.divf %660, %661 : vector<16x1xf32>
    %663 = vector.broadcast %662 : vector<16x1xf32> to vector<16x32xf32>
    %664 = arith.subf %654, %663 : vector<16x32xf32>
    %665 = arith.mulf %664, %664 : vector<16x32xf32>
    %cst_300 = arith.constant dense<0.000000e+00> : vector<16xf32>
    %666 = vector.multi_reduction <add>, %665, %cst_300 [1] : vector<16x32xf32> to vector<16xf32>
    %667 = vector.shape_cast %666 : vector<16xf32> to vector<16x1xf32>
    %cst_301 = arith.constant 3.200000e+01 : f32
    %668 = vector.broadcast %cst_301 : f32 to vector<16x1xf32>
    %669 = arith.divf %667, %668 : vector<16x1xf32>
    %670 = vector.broadcast %662 : vector<16x1xf32> to vector<16x32xf32>
    %671 = arith.subf %654, %670 : vector<16x32xf32>
    %cst_302 = arith.constant 9.99999974E-6 : f32
    %672 = vector.broadcast %cst_302 : f32 to vector<16x1xf32>
    %673 = arith.addf %669, %672 : vector<16x1xf32>
    %674 = math.rsqrt %673 : vector<16x1xf32>
    %675 = vector.broadcast %674 : vector<16x1xf32> to vector<16x32xf32>
    %676 = arith.mulf %671, %675 : vector<16x32xf32>
    %677 = vector.broadcast %656 : vector<1x32xf32> to vector<16x32xf32>
    %678 = arith.mulf %676, %677 : vector<16x32xf32>
    %679 = vector.broadcast %658 : vector<1x32xf32> to vector<16x32xf32>
    %680 = arith.addf %678, %679 : vector<16x32xf32>
    %c0_303 = arith.constant 0 : index
    %c0_304 = arith.constant 0 : index
    %681 = vector.load %arg30[%c0_303, %c0_304] : memref<128x32xbf16, #tpu.memory_space<vmem>>, vector<128x32xbf16>
    %c0_305 = arith.constant 0 : index
    %c0_306 = arith.constant 0 : index
    %682 = vector.load %arg31[%c0_305, %c0_306] : memref<1x128xf32, #tpu.memory_space<vmem>>, vector<1x128xf32>
    %683 = arith.truncf %680 : vector<16x32xf32> to vector<16x32xbf16>
    %cst_307 = arith.constant dense<0.000000e+00> : vector<16x128xf32>
    %684 = tpu.matmul %683, %681, %cst_307 {dimension_numbers = #tpu.dot_dimension_numbers<[1], [1], [0], [0], [0, 0, 1, 0], [], []>} : vector<16x32xbf16>, vector<128x32xbf16>, vector<16x128xf32> -> vector<16x128xf32>
    %685 = vector.broadcast %682 : vector<1x128xf32> to vector<16x128xf32>
    %686 = arith.addf %684, %685 : vector<16x128xf32>
    %687 = vector.shape_cast %686 : vector<16x128xf32> to vector<1x16x128xf32>
    %c0_308 = arith.constant 0 : index
    %c0_309 = arith.constant 0 : index
    %c0_310 = arith.constant 0 : index
    %688 = vector.load %arg32[%c0_308, %c0_309, %c0_310] : memref<1x16x128xf32, #tpu.memory_space<vmem>>, vector<1x16x128xf32>
    tpu.vector_store %arg32[%c0_308, %c0_309, %c0_310], %687 {strides = array<i32>} : memref<1x16x128xf32, #tpu.memory_space<vmem>>, vector<1x16x128xf32>,
    return
  }
  func.func @transform_0(%arg0: i32) -> (i32, i32, i32) {
    %c0_i32 = arith.constant 0 : i32
    %c0_i32_0 = arith.constant 0 : i32
    %c0_i32_1 = arith.constant 0 : i32
    return %arg0, %c0_i32, %c0_i32_0 : i32, i32, i32
  }
  func.func @transform_1(%arg0: i32) -> (i32, i32, i32) {
    %c0_i32 = arith.constant 0 : i32
    %c0_i32_0 = arith.constant 0 : i32
    %c0_i32_1 = arith.constant 0 : i32
    return %arg0, %c0_i32, %c0_i32_0 : i32, i32, i32
  }
  func.func @transform_2(%arg0: i32) -> (i32, i32) {
    %c0_i32 = arith.constant 0 : i32
    %c0_i32_0 = arith.constant 0 : i32
    %c0_i32_1 = arith.constant 0 : i32
    return %c0_i32, %c0_i32_0 : i32, i32
  }
  func.func @transform_3(%arg0: i32) -> (i32, i32) {
    %c0_i32 = arith.constant 0 : i32
    %c0_i32_0 = arith.constant 0 : i32
    %c0_i32_1 = arith.constant 0 : i32
    return %c0_i32, %c0_i32_0 : i32, i32
  }
  func.func @transform_4(%arg0: i32) -> (i32, i32) {
    %c0_i32 = arith.constant 0 : i32
    %c0_i32_0 = arith.constant 0 : i32
    %c0_i32_1 = arith.constant 0 : i32
    return %c0_i32, %c0_i32_0 : i32, i32
  }
  func.func @transform_5(%arg0: i32) -> (i32, i32) {
    %c0_i32 = arith.constant 0 : i32
    %c0_i32_0 = arith.constant 0 : i32
    %c0_i32_1 = arith.constant 0 : i32
    return %c0_i32, %c0_i32_0 : i32, i32
  }
  func.func @transform_6(%arg0: i32) -> (i32, i32) {
    %c0_i32 = arith.constant 0 : i32
    %c0_i32_0 = arith.constant 0 : i32
    %c0_i32_1 = arith.constant 0 : i32
    return %c0_i32, %c0_i32_0 : i32, i32
  }
  func.func @transform_7(%arg0: i32) -> (i32, i32) {
    %c0_i32 = arith.constant 0 : i32
    %c0_i32_0 = arith.constant 0 : i32
    %c0_i32_1 = arith.constant 0 : i32
    return %c0_i32, %c0_i32_0 : i32, i32
  }
  func.func @transform_8(%arg0: i32) -> (i32, i32) {
    %c0_i32 = arith.constant 0 : i32
    %c0_i32_0 = arith.constant 0 : i32
    %c0_i32_1 = arith.constant 0 : i32
    return %c0_i32, %c0_i32_0 : i32, i32
  }
  func.func @transform_9(%arg0: i32) -> (i32, i32, i32) {
    %c0_i32 = arith.constant 0 : i32
    %c0_i32_0 = arith.constant 0 : i32
    %c0_i32_1 = arith.constant 0 : i32
    %c0_i32_2 = arith.constant 0 : i32
    return %c0_i32, %c0_i32_0, %c0_i32_1 : i32, i32, i32
  }
  func.func @transform_10(%arg0: i32) -> (i32, i32, i32) {
    %c0_i32 = arith.constant 0 : i32
    %c0_i32_0 = arith.constant 0 : i32
    %c0_i32_1 = arith.constant 0 : i32
    %c0_i32_2 = arith.constant 0 : i32
    return %c0_i32, %c0_i32_0, %c0_i32_1 : i32, i32, i32
  }
  func.func @transform_11(%arg0: i32) -> (i32, i32, i32) {
    %c0_i32 = arith.constant 0 : i32
    %c0_i32_0 = arith.constant 0 : i32
    %c0_i32_1 = arith.constant 0 : i32
    %c0_i32_2 = arith.constant 0 : i32
    return %c0_i32, %c0_i32_0, %c0_i32_1 : i32, i32, i32
  }
  func.func @transform_12(%arg0: i32) -> (i32, i32, i32) {
    %c0_i32 = arith.constant 0 : i32
    %c0_i32_0 = arith.constant 0 : i32
    %c0_i32_1 = arith.constant 0 : i32
    %c0_i32_2 = arith.constant 0 : i32
    return %c0_i32, %c0_i32_0, %c0_i32_1 : i32, i32, i32
  }
  func.func @transform_13(%arg0: i32) -> (i32, i32, i32) {
    %c0_i32 = arith.constant 0 : i32
    %c0_i32_0 = arith.constant 0 : i32
    %c0_i32_1 = arith.constant 0 : i32
    %c0_i32_2 = arith.constant 0 : i32
    return %c0_i32, %c0_i32_0, %c0_i32_1 : i32, i32, i32
  }
  func.func @transform_14(%arg0: i32) -> (i32, i32, i32) {
    %c0_i32 = arith.constant 0 : i32
    %c0_i32_0 = arith.constant 0 : i32
    %c0_i32_1 = arith.constant 0 : i32
    %c0_i32_2 = arith.constant 0 : i32
    return %c0_i32, %c0_i32_0, %c0_i32_1 : i32, i32, i32
  }
  func.func @transform_15(%arg0: i32) -> (i32, i32, i32) {
    %c0_i32 = arith.constant 0 : i32
    %c0_i32_0 = arith.constant 0 : i32
    %c0_i32_1 = arith.constant 0 : i32
    %c0_i32_2 = arith.constant 0 : i32
    return %c0_i32, %c0_i32_0, %c0_i32_1 : i32, i32, i32
  }
  func.func @transform_16(%arg0: i32) -> (i32, i32, i32) {
    %c0_i32 = arith.constant 0 : i32
    %c0_i32_0 = arith.constant 0 : i32
    %c0_i32_1 = arith.constant 0 : i32
    %c0_i32_2 = arith.constant 0 : i32
    return %c0_i32, %c0_i32_0, %c0_i32_1 : i32, i32, i32
  }
  func.func @transform_17(%arg0: i32) -> (i32, i32, i32) {
    %c0_i32 = arith.constant 0 : i32
    %c0_i32_0 = arith.constant 0 : i32
    %c0_i32_1 = arith.constant 0 : i32
    %c0_i32_2 = arith.constant 0 : i32
    return %c0_i32, %c0_i32_0, %c0_i32_1 : i32, i32, i32
  }
  func.func @transform_18(%arg0: i32) -> (i32, i32, i32) {
    %c0_i32 = arith.constant 0 : i32
    %c0_i32_0 = arith.constant 0 : i32
    %c0_i32_1 = arith.constant 0 : i32
    %c0_i32_2 = arith.constant 0 : i32
    return %c0_i32, %c0_i32_0, %c0_i32_1 : i32, i32, i32
  }
  func.func @transform_19(%arg0: i32) -> (i32, i32, i32) {
    %c0_i32 = arith.constant 0 : i32
    %c0_i32_0 = arith.constant 0 : i32
    %c0_i32_1 = arith.constant 0 : i32
    %c0_i32_2 = arith.constant 0 : i32
    return %c0_i32, %c0_i32_0, %c0_i32_1 : i32, i32, i32
  }
  func.func @transform_20(%arg0: i32) -> (i32, i32, i32) {
    %c0_i32 = arith.constant 0 : i32
    %c0_i32_0 = arith.constant 0 : i32
    %c0_i32_1 = arith.constant 0 : i32
    %c0_i32_2 = arith.constant 0 : i32
    return %c0_i32, %c0_i32_0, %c0_i32_1 : i32, i32, i32
  }
  func.func @transform_21(%arg0: i32) -> (i32, i32, i32) {
    %c0_i32 = arith.constant 0 : i32
    %c0_i32_0 = arith.constant 0 : i32
    %c0_i32_1 = arith.constant 0 : i32
    %c0_i32_2 = arith.constant 0 : i32
    return %c0_i32, %c0_i32_0, %c0_i32_1 : i32, i32, i32
  }
  func.func @transform_22(%arg0: i32) -> (i32, i32, i32) {
    %c0_i32 = arith.constant 0 : i32
    %c0_i32_0 = arith.constant 0 : i32
    %c0_i32_1 = arith.constant 0 : i32
    %c0_i32_2 = arith.constant 0 : i32
    return %c0_i32, %c0_i32_0, %c0_i32_1 : i32, i32, i32
  }
  func.func @transform_23(%arg0: i32) -> (i32, i32, i32) {
    %c0_i32 = arith.constant 0 : i32
    %c0_i32_0 = arith.constant 0 : i32
    %c0_i32_1 = arith.constant 0 : i32
    %c0_i32_2 = arith.constant 0 : i32
    return %c0_i32, %c0_i32_0, %c0_i32_1 : i32, i32, i32
  }
  func.func @transform_24(%arg0: i32) -> (i32, i32, i32) {
    %c0_i32 = arith.constant 0 : i32
    %c0_i32_0 = arith.constant 0 : i32
    %c0_i32_1 = arith.constant 0 : i32
    %c0_i32_2 = arith.constant 0 : i32
    return %c0_i32, %c0_i32_0, %c0_i32_1 : i32, i32, i32
  }
  func.func @transform_25(%arg0: i32) -> (i32, i32, i32) {
    %c0_i32 = arith.constant 0 : i32
    %c0_i32_0 = arith.constant 0 : i32
    %c0_i32_1 = arith.constant 0 : i32
    %c0_i32_2 = arith.constant 0 : i32
    return %c0_i32, %c0_i32_0, %c0_i32_1 : i32, i32, i32
  }
  func.func @transform_26(%arg0: i32) -> (i32, i32, i32) {
    %c0_i32 = arith.constant 0 : i32
    %c0_i32_0 = arith.constant 0 : i32
    %c0_i32_1 = arith.constant 0 : i32
    %c0_i32_2 = arith.constant 0 : i32
    return %c0_i32, %c0_i32_0, %c0_i32_1 : i32, i32, i32
  }
  func.func @transform_27(%arg0: i32) -> (i32, i32, i32) {
    %c0_i32 = arith.constant 0 : i32
    %c0_i32_0 = arith.constant 0 : i32
    %c0_i32_1 = arith.constant 0 : i32
    %c0_i32_2 = arith.constant 0 : i32
    return %c0_i32, %c0_i32_0, %c0_i32_1 : i32, i32, i32
  }
  func.func @transform_28(%arg0: i32) -> (i32, i32, i32) {
    %c0_i32 = arith.constant 0 : i32
    %c0_i32_0 = arith.constant 0 : i32
    %c0_i32_1 = arith.constant 0 : i32
    %c0_i32_2 = arith.constant 0 : i32
    return %c0_i32, %c0_i32_0, %c0_i32_1 : i32, i32, i32
  }
  func.func @transform_29(%arg0: i32) -> (i32, i32) {
    %c0_i32 = arith.constant 0 : i32
    %c0_i32_0 = arith.constant 0 : i32
    %c0_i32_1 = arith.constant 0 : i32
    return %c0_i32, %c0_i32_0 : i32, i32
  }
  func.func @transform_30(%arg0: i32) -> (i32, i32) {
    %c0_i32 = arith.constant 0 : i32
    %c0_i32_0 = arith.constant 0 : i32
    %c0_i32_1 = arith.constant 0 : i32
    return %c0_i32, %c0_i32_0 : i32, i32
  }
  func.func @transform_31(%arg0: i32) -> (i32, i32, i32) {
    %c0_i32 = arith.constant 0 : i32
    %c0_i32_0 = arith.constant 0 : i32
    %c0_i32_1 = arith.constant 0 : i32
    return %arg0, %c0_i32, %c0_i32_0 : i32, i32, i32
  }
}

</mosaic_0001>

<bundles_post_ra>
// kernel: stroke_transformer_forward.1
= control target key start
LH: loop header
LB: loop body
LE: loop exit
PB: predicated region body
PF: predicated region fallthrough
CT: control target
= control target key end

     0   :  { %s5982_s6 = smov 1   ;;  %s5983_s10 = smov 2   ;;  %s6930_s0 = inlined_call_operand.smem [shape: u32[32], index: -1, kind: input, shape index: {}] }
   0x1   :  { %s6037_s5 = sld [smem:[%s6930_s0]]   ;;  %s5984_s14 = smov 3  }
   0x2   :  { %s6042_s9 = sld [smem:[%s6930_s0 + %s5982_s6]]   ;;  %s5985_s18 = smov 4  }
   0x3   :  { %s6047_s13 = sld [smem:[%s6930_s0 + %s5983_s10]]   ;;  %s5986_s22 = smov 5  }
   0x4   :  { %s6052_s17 = sld [smem:[%s6930_s0 + %s5984_s14]]   ;;  %s5987_s26 = smov 6  }
   0x5   :  { %s6057_s21 = sld [smem:[%s6930_s0 + %s5985_s18]]   ;;  %s5988_s30 = smov 7  }
   0x6   :  { %s6062_s25 = sld [smem:[%s6930_s0 + %s5986_s22]]   ;;  %s5989_s4 = smov 8  }
   0x7   :  { %6978 = sst [smem:[#allocation3_spill]] %s6037_s5  ;;  %s5990_s10 = smov 9  }
   0x8   :  { %6979 = sst [smem:[#allocation4_spill]] %s6042_s9  ;;  %s5991_s15 = smov 10  }
   0x9   :  { %6980 = sst [smem:[#allocation5_spill]] %s6047_s13  ;;  %s5992_s20 = smov 11  }
   0xa   :  { %6981 = sst [smem:[#allocation6_spill]] %s6052_s17  ;;  %s5994_s1 = smov 13  }
   0xb   :  { %6982 = sst [smem:[#allocation7_spill]] %s6057_s21  ;;  %s5995_s7 = smov 14  }
   0xc   :  { %6983 = sst [smem:[#allocation8_spill]] %s6062_s25  ;;  %s5997_s22 = smov 16  }
   0xd   :  { %s6067_s29 = sld [smem:[%s6930_s0 + %s5987_s26]]   ;;  %s5993_s26 = smov 12  }
   0xe   :  { %s6072_s3 = sld [smem:[%s6930_s0 + %s5988_s30]]   ;;  %s5998_s28 = smov 17  }
   0xf   :  { %s6077_s8 = sld [smem:[%s6930_s0 + %s5989_s4]]  }
  0x10   :  { %s6082_s14 = sld [smem:[%s6930_s0 + %s5990_s10]]  }
  0x11   :  { %s6087_s19 = sld [smem:[%s6930_s0 + %s5991_s15]]   ;;  %s5996_s15 = smov 15  }
  0x12   :  { %s6092_s24 = sld [smem:[%s6930_s0 + %s5992_s20]]  }
  0x13   :  { %6984 = sst [smem:[#allocation9_spill]] %s6067_s29 }
  0x14   :  { %6985 = sst [smem:[#allocation10_spill]] %s6072_s3 }
  0x15   :  { %6986 = sst [smem:[#allocation11_spill]] %s6077_s8 }
  0x16   :  { %6987 = sst [smem:[#allocation12_spill]] %s6082_s14 }
  0x17   :  { %6988 = sst [smem:[#allocation13_spill]] %s6087_s19 }
  0x18   :  { %s6097_s30 = sld [smem:[%s6930_s0 + %s5993_s26]]  }
  0x19   :  { %s6102_s6 = sld [smem:[%s6930_s0 + %s5994_s1]]  }
  0x1a   :  { %s6107_s12 = sld [smem:[%s6930_s0 + %s5995_s7]]   ;;  %s5999_s7 = smov 18  }
  0x1b   :  { %s6112_s20 = sld [smem:[%s6930_s0 + %s5996_s15]]   ;;  %s6000_s15 = smov 19  }
  0x1c   :  { %s6117_s27 = sld [smem:[%s6930_s0 + %s5997_s22]]   ;;  %s6001_s22 = smov 20  }
  0x1d   :  { %s6122_s4 = sld [smem:[%s6930_s0 + %s5998_s28]]   ;;  %s6002_s28 = smov 21  }
  0x1e   :  { %s6127_s21 = sld [smem:[%s6930_s0 + %s5999_s7]]   ;;  %s6003_s7 = smov 22  }
  0x20   :  { %6989 = sst [smem:[#allocation14_spill]] %s6107_s12 }
  0x21   :  { %6990 = sst [smem:[#allocation15_spill]] %s6112_s20 }
  0x22   :  { %6991 = sst [smem:[#allocation16_spill]] %s6117_s27 }
  0x23   :  { %6992 = sst [smem:[#allocation17_spill]] %s6122_s4 }
  0x24   :  { %6993 = sst [smem:[#allocation18_spill]] %s6127_s21 }
  0x25   :  { %s6132_s12 = sld [smem:[%s6930_s0 + %s6000_s15]]   ;;  %s6004_s15 = smov 23  }
  0x26   :  { %s6137_s27 = sld [smem:[%s6930_s0 + %s6001_s22]]   ;;  %s6005_s22 = smov 24  }
  0x27   :  { %s6142_s4 = sld [smem:[%s6930_s0 + %s6002_s28]]   ;;  %s6006_s28 = smov 25  }
  0x28   :  { %s6147_s21 = sld [smem:[%s6930_s0 + %s6003_s7]]   ;;  %s6007_s7 = smov 26  }
  0x2b   :  { %6994 = sst [smem:[#allocation19_spill]] %s6132_s12 }
  0x2c   :  { %6995 = sst [smem:[#allocation20_spill]] %s6137_s27 }
  0x2d   :  { %6996 = sst [smem:[#allocation21_spill]] %s6142_s4 }
  0x2e   :  { %6997 = sst [smem:[#allocation22_spill]] %s6147_s21 }
  0x2f   :  { %s6152_s12 = sld [smem:[%s6930_s0 + %s6004_s15]]   ;;  %s6008_s15 = smov 27  }
  0x30   :  { %s6157_s27 = sld [smem:[%s6930_s0 + %s6005_s22]]   ;;  %s6009_s22 = smov 28  }
  0x31   :  { %s6162_s4 = sld [smem:[%s6930_s0 + %s6006_s28]]   ;;  %s6010_s28 = smov 29  }
  0x32   :  { %s6167_s21 = sld [smem:[%s6930_s0 + %s6007_s7]]   ;;  %s6011_s7 = smov 30  }
  0x33   :  { %s6172_s20 = sld [smem:[%s6930_s0 + %s6008_s15]]   ;;  %s6012_s15 = smov 31  }
  0x36   :  { %6998 = sst [smem:[#allocation23_spill]] %s6157_s27 }
  0x37   :  { %6999 = sst [smem:[#allocation24_spill]] %s6162_s4 }
  0x38   :  { %7000 = sst [smem:[#allocation25_spill]] %s6167_s21 }
  0x39   :  { %7001 = sst [smem:[#allocation26_spill]] %s6172_s20 }
  0x3a   :  { %s6177_s27 = sld [smem:[%s6930_s0 + %s6009_s22]]   ;;  %s6194_s22 = smov 0  }
  0x3b   :  { %s6182_s4 = sld [smem:[%s6930_s0 + %s6010_s28]]  }
  0x3c   :  { %s6187_s21 = sld [smem:[%s6930_s0 + %s6011_s7]]  }
  0x3d   :  { %s6192_s20 = sld [smem:[%s6930_s0 + %s6012_s15]]  }
  0x40   :  { %7002 = sst [smem:[#allocation27_spill]] %s6177_s27 }
  0x42   :  { %7003 = sst [smem:[#allocation28_spill]] %s6187_s21 }
  0x43   :  { %7004 = sst [smem:[#allocation29_spill]] %s6192_s20 }
  0x44 LB: > { %s7005_s19 = sld [smem:[#allocation13_spill]]  ;;  %s4988_s23 = sadd.s32 4294967295, %s5980_s22   ;;  %s5980_s22 = sphi %s6194_s22, %s73_s22  }
  0x45   : > { %s7006_s17 = sld [smem:[#allocation6_spill]]  ;;  %p4992_p0 = scmp.ge.s32.totalorder %s5980_s22, 1 }
  0x46   : > { %s7007_s14 = sld [smem:[#allocation12_spill]]  ;;  %p879_p1 = scmp.lt.s32.totalorder %s5980_s22, 3 }
  0x47   : > { %s7008_s25 = sld [smem:[#allocation8_spill]] }
  0x48   : > { %s7009_s13 = sld [smem:[#allocation5_spill]]  ;;  %p880_p2 = pnand %p4992_p0, %p879_p1 }
  0x49   : > { %s7010_s3 = sld [smem:[#allocation10_spill]] }
  0x4a   : > { %7011 = sst [smem:[#allocation30_spill]] %s5980_s22  ;;  %883 = sbr.rel (%p880_p2) target bundleno = 11828 (0x2e34), region = 144 }
  0x4f   : > { %v5761_v0 = vld [vmem:[%s7008_s25 + $0x8] sm:$0xff]   ;;  %v6013_v1 = vmov 0.0   ;;  %vm1009_vm0 = vcmask 23552   ;;  %s7012_s9 = sld [smem:[#allocation4_spill]]  ;;  %p964_p3 = scmp.lt.s32.totalorder %s4988_s23, 1  ;;  %v5762_v4 = vld [vmem:[%s7008_s25] sm:$0xff]  }
  0x50   : > { %5334 = vmatprep.subr.bf16.mxu0 %v6013_v1  ;;  %5342 = vmatprep.subr.bf16.mxu1 %v6013_v1  ;;  %v1017_v2 = vsel %vm1009_vm0, %v5761_v0, 0  ;;  %v5763_v3 = vld [vmem:[%s7010_s3 + $0x8] sm:$0xff]   ;;  %vm6014_vm1 = vmmov 0   ;;  %vm1084_vm2 = vcmask 261120   ;;  %v1014_v6 = vsel %vm1009_vm0, %v5762_v4, 0  ;;  %v5764_v10 = vld [vmem:[%s7010_s3] sm:$0xff]  }
  0x51   : > { %5335 = vmatpush3.bf16.xpose.msra.mxu0 %v1017_v2  ;;  %5338 = vmatprep.mubr.msk.bf16.mxu0 %vm6014_vm1, %v6013_v1  ;;  %s7055_s23 = smov (!%p964_p3, %s4988_s23), 1  ;;  %v1092_v5 = vsel %vm1084_vm2, %v5763_v3, 0  ;;  %v1089_v11 = vsel %vm1084_vm2, %v5764_v10, 0  ;;  %v5765_v12 = vld [vmem:[%s7007_s14 + $0x28] sm:$0xff]   ;;  %v5766_v14 = vld [vmem:[%s7007_s14 + $0x20] sm:$0xff]   ;;  %s7014_s29 = sld [smem:[#allocation9_spill]] }
  0x52   : > { %5336 = vmatprep.subr.bf16.mxu0 %v6013_v1  ;;  %7013 = sst [smem:[#allocation31_spill]] %s7055_s23  ;;  %5346 = vmatprep.mubr.msk.bf16.mxu1 %vm6014_vm1, %v6013_v1  ;;  %s6945_s0 = sshll.u32 %s7055_s23, 4  ;;  %v1208_v13 = vsel %vm1084_vm2, %v5765_v12, 0  ;;  %v1205_v15 = vsel %vm1084_vm2, %v5766_v14, 0  ;;  %v5767_v16 = vld [vmem:[%s7007_s14 + $0x18] sm:$0xff]   ;;  %v5768_v18 = vld [vmem:[%s7007_s14 + $0x10] sm:$0xff]  }
  0x53   : > { %5343 = vmatpush3.bf16.xpose.msra.mxu1 %v1092_v5  ;;  %v1202_v17 = vsel %vm1084_vm2, %v5767_v16, 0  ;;  %v1199_v19 = vsel %vm1084_vm2, %v5768_v18, 0  ;;  %v5769_v20 = vld [vmem:[%s7007_s14 + $0x8] sm:$0xff]   ;;  %s7015_s8 = sld [smem:[#allocation11_spill]]  ;;  %v5770_v32 = vld [vmem:[%s7007_s14] sm:$0xff]   ;;  %s6968_s28 = smov 96  }
  0x54   : > { %5344 = vmatprep.subr.bf16.mxu1 %v6013_v1  ;;  %v1196_v21 = vsel %vm1084_vm2, %v5769_v20, 0  ;;  %v1193_v33 = vsel %vm1084_vm2, %v5770_v32, 0  ;;  %v1135_v38 = vld [vmem:[%s7009_s13] sm:$0xff]  ;;  %v1136_v40 = vld [vmem:[%s7009_s13 + $0x8] sm:$0xff]  ;;  %vm1255_vm3 = vcmask 64512   ;;  %vm1307_vm4 = vcmask 130048  }
  0x55   : > { %s973_s26 = scalar_lea.vmem %s7012_s9, %s6945_s0  ;;  %v5007_v47 = vld [vmem:[%s7005_s19] ss:$0 sm:$0xff]  ;;  %v6279_v62 = vld [vmem:[%s7006_s17 + $0x8] sm:$0xff]  ;;  %s6949_s1 = smov 64   ;;  %vm1513_vm5 = vcmask 130112   ;;  %vm1649_vm6 = vcmask 195712  }
  0x56   : > { %v980_v7 = vld [vmem:[%s973_s26] sm:$0xff]  ;;  %v981_v8 = vld [vmem:[%s973_s26 + $0x8] sm:$0xff]  ;;  %s6956_s2 = smov 88   ;;  %s6966_s7 = smov 120   ;;  %vm1785_vm7 = vcmask 261312   ;;  %vm2851_vm8 = vcmask 523264  }
  0x57   : > { %v992_v9 = vpack.c.bf16 %v981_v8, %v980_v7  ;;  %v4999_v22 = vld [vmem:[%s7014_s29] ss:$0 sm:$0xff]  ;;  %s6958_s10 = smov 72   ;;  %s6946_s11 = smov 56  }
  0x58   : > { %v6275_v57 = vld [vmem:[%s7006_s17] sm:$0xff]  ;;  %s6964_s15 = smov 80   ;;  %s6960_s16 = smov 112  }
  0x59   : > { %5337 = vmatpush3.bf16.xpose.msra.mxu0 %v1014_v6  ;;  %v5003_v34 = vld [vmem:[%s7015_s8] ss:$0 sm:$0xff]  ;;  %s6962_s18 = smov 104   ;;  %s6947_s26 = smov 48  }
  0x5a   : > { %5350 = vmatprep.subr.bf16.mxu0 %v6013_v1  ;;  %s6954_s0 = smov 8   ;;  %s7016_s5 = sld [smem:[#allocation3_spill]] }
  0x5b   : > { %5345 = vmatpush3.bf16.xpose.msra.mxu1 %v1089_v11  ;;  %s7027_s3 = smov 24   ;;  %s7029_s8 = sld [smem:[#allocation19_spill]] }
  0x5c   : > { %5366 = vmatprep.subr.bf16.mxu1 %v6013_v1  ;;  %s7030_s9 = sld [smem:[#allocation21_spill]]  ;;  %s7040_s21 = smov 120  }
  0x5d   : > { %s7031_s13 = sld [smem:[#allocation24_spill]] }
  0x5e   : > { %s7032_s25 = sld [smem:[#allocation25_spill]] }
  0x5f   : > { %s7033_s29 = sld [smem:[#allocation20_spill]] }
  0x60   : > { %5339 = vmatmul.mubr.msk.bf16.vlgmr.msra.gmra.mxu0 %vm1009_vm0, %v992_v9  ;;  %s7034_s22 = sld [smem:[#allocation22_spill]] }
  0x61   : > { %5362 = vmatprep.mubr.msk.bf16.mxu0 %vm6014_vm1, %v6013_v1  ;;  %5351 = vmatpush3.bf16.xpose.msra.mxu0 %v1208_v13  ;;  %s7037_s27 = sld [smem:[#allocation27_spill]] }
  0x62   : > { %5352 = vmatprep.subr.bf16.mxu0 %v6013_v1 }
  0x66   : > { %s7035_s20 = smov %s7034_s22 }
  0x69   : > { %5353 = vmatpush3.bf16.xpose.msra.mxu0 %v1205_v15 }
  0x6a   : > { %5354 = vmatprep.subr.bf16.mxu0 %v6013_v1 }
  0x71   : > { %5355 = vmatpush3.bf16.xpose.msra.mxu0 %v1202_v17 }
  0x72   : > { %5356 = vmatprep.subr.bf16.mxu0 %v6013_v1 }
  0x79   : > { %5357 = vmatpush3.bf16.xpose.msra.mxu0 %v1199_v19 }
  0x7a   : > { %5358 = vmatprep.subr.bf16.mxu0 %v6013_v1 }
  0x81   : > { %5359 = vmatpush3.bf16.xpose.msra.mxu0 %v1196_v21 }
  0x82   : > { %5360 = vmatprep.subr.bf16.mxu0 %v6013_v1 }
  0x89   : > { %5361 = vmatpush3.bf16.xpose.msra.mxu0 %v1193_v33 }
  0x8a   : > { %5402 = vmatprep.subr.bf16.mxu0 %v6013_v1 }
 0x120   : > { %v1053_v23 = vpop.f32.mrf.mxu0 }
 0x121   : > { %v1054_v25 = vadd.f32 %v4999_v22, %v1053_v23 }
 0x122   : > { %v5340_v24 = vpop.f32.mrf.mxu0 }
 0x123   : > { %v1060_v29 = vmax.f32 %v1054_v25, 0.0 }
 0x124   : > { %v1056_v26 = vpop.f32.mrf.mxu0 }
 0x125   : > { %v1057_v27 = vadd.f32 %v4999_v22, %v1056_v26 }
 0x126   : > { %v5341_v28 = vpop.f32.mrf.mxu0 }
 0x127   : > { %v1061_v30 = vmax.f32 %v1057_v27, 0.0 }
 0x129   : > { %v1067_v31 = vpack.c.bf16 %v1061_v30, %v1060_v29 }
 0x12b   : > { %5347 = vmatmul.mubr.msk.bf16.vlgmr.msra.gmra.mxu1 %vm1084_vm2, %v1067_v31 }
 0x12c   : > { %5368 = vmatprep.mubr.msk.bf16.mxu1 %vm6014_vm1, %v6013_v1 }
 0x1eb   : > { %v1128_v35 = vpop.f32.mrf.mxu1 }
 0x1ec   : > { %v1129_v37 = vadd.f32 %v5003_v34, %v1128_v35 }
 0x1ed   : > { %v5348_v36 = vpop.f32.mrf.mxu1 }
 0x1ee   : > { %v6254_v43 = vadd.f32 %v1135_v38, %v1129_v37 }
 0x1ef   : > { %v1131_v39 = vpop.f32.mrf.mxu1 }
 0x1f0   : > { %v1132_v41 = vadd.f32 %v5003_v34, %v1131_v39 }
 0x1f1   : > { %v5349_v42 = vpop.f32.mrf.mxu1 }
 0x1f2   : > { %v6256_v44 = vadd.f32 %v1136_v40, %v1132_v41 }
 0x1f4   : > { %v1152_v45 = vpack.c.bf16 %v6256_v44, %v6254_v43 }
 0x1f6   : > { %5363 = vmatmul.mubr.msk.bf16.vlgmr.msra.gmra.mxu0 %vm1084_vm2, %v1152_v45 }
 0x1f7   : > { %5404 = vmatprep.mubr.msk.bf16.mxu0 %vm6014_vm1, %v6013_v1 }
 0x2b6   : > { %v1244_v46 = vpop.f32.mrf.mxu0 }
 0x2b7   : > { %v1245_v50 = vadd.f32 %v5007_v47, %v1244_v46 }
 0x2b8   : > { %v5364_v48 = vpop.f32.mrf.mxu0 }
 0x2ba   : > { %v1247_v49 = vpop.f32.mrf.mxu0 }
 0x2bb   : > { %v1248_v51 = vadd.f32 %v5007_v47, %v1247_v49 }
 0x2bc   : > { %v5365_v52 = vpop.f32.mrf.mxu0 }
 0x2bd   : > { %v6264_v53 = vpack.c.bf16 %v1248_v51, %v1245_v50 }
 0x2bf   : > { %1253 = vrot.lane.b32.xlu0 %v6264_v53, %s6968_s28 }
 0x331   : > { %v1254_v54 = vpop.permute.xlu0 %1253 }
 0x332   : > { %v1260_v55 = vsel %vm1255_vm3, %v1254_v54, 0 }
 0x333   : > { %5367 = vmatpush3.bf16.xpose.msra.mxu1 %v1260_v55 }
 0x334   : > { %5372 = vmatprep.subr.bf16.mxu1 %v6013_v1 }
 0x33a   : > { %5369 = vmatmul.mubr.msk.bf16.vlgmr.msra.gmra.mxu1 %vm1255_vm3, %v6264_v53 }
 0x33b   : > { %5374 = vmatprep.mubr.msk.bf16.mxu1 %vm6014_vm1, %v6013_v1 }
 0x3fa   : > { %v1296_v56 = vpop.f32.mrf.mxu1 }
 0x3fb   : > { %v1303_v58 = vmul.f32 0.35355338, %v1296_v56 }
 0x3fc   : > { %v5370_v59 = vpop.f32.mrf.mxu1 }
 0x3fd   : > { %v1305_v60 = vadd.f32 %v1303_v58, %v6275_v57 }
 0x3fe   : > { %v1299_v61 = vpop.f32.mrf.mxu1 }
 0x3ff   : > { %v1304_v63 = vmul.f32 0.35355338, %v1299_v61  ;;  %v1308_v0 = vsel %vm1307_vm4, %v1305_v60, -inf }
 0x400   : > { %1309 = vmax.xlane.f32.xlu0 %v1308_v0  ;;  %v5371_v2 = vpop.f32.mrf.mxu1 }
 0x401   : > { %v1306_v3 = vadd.f32 %v1304_v63, %v6279_v62 }
 0x403   : > { %v1311_v4 = vsel %vm1307_vm4, %v1306_v3, -inf }
 0x404   : > { %1312 = vmax.xlane.f32.xlu1 %v1311_v4 }
 0x415   : > { %1331 = vrot.lane.b32.xlu1 %v6264_v53, %s6949_s1  ;;  %s5194_s1 = sshll.u32 %s7055_s23, 3  ;;  %s7046_s23 = smov 48  }
 0x489   : > { %v1310_v5 = vpop.xlane.xlu0 %1309 }
 0x48a   : > { %v1314_v6 = vsub.f32 %v1305_v60, %v1310_v5 }
 0x48c   : > { %v1316_v7 = vmul.f32 1.442695, %v1314_v6 }
 0x48d   : > { %v1313_v8 = vpop.xlane.xlu1 %1312 }
 0x48e   : > { %5818 = vpow2.f32 %v1316_v7  ;;  %v1315_v9 = vsub.f32 %v1306_v3, %v1313_v8 }
 0x490   : > { %v1318_v10 = vmul.f32 1.442695, %v1315_v9 }
 0x491   : > { %v1332_v11 = vpop.permute.xlu1 %1331 }
 0x492   : > { %5820 = vpow2.f32 %v1318_v10  ;;  %5373 = vmatpush3.bf16.msra.mxu1 %v1332_v11 }
 0x493   : > { %5378 = vmatprep.subr.bf16.mxu1 %v6013_v1 }
 0x49b   : > { %v5819_v12 = vpop.eup %5818 }
 0x49c   : > { %v1320_v13 = vsel %vm1307_vm4, %v5819_v12, 0.0 }
 0x49d   : > { %1321 = vadd.xlane.f32.xlu1 %v1320_v13 }
 0x49f   : > { %v5821_v14 = vpop.eup %5820 }
 0x4a0   : > { %v1323_v15 = vsel %vm1307_vm4, %v5821_v14, 0.0 }
 0x4a1   : > { %1324 = vadd.xlane.f32.xlu1 %v1323_v15 }
 0x4b2   : > { %1382 = vrot.lane.b32.xlu1 %v6264_v53, %s6956_s2  ;;  %s7020_s2 = sld [smem:[#allocation14_spill]] }
 0x4b6   : > { %1380 = vrot.lane.b32.xlu1 %v6264_v53, %s6966_s7 }
 0x526   : > { %v1322_v16 = vpop.xlane.xlu1 %1321 }
 0x527   : > { %5822 = vrcp.f32 %v1322_v16 }
 0x52a   : > { %v1325_v17 = vpop.xlane.xlu1 %1324 }
 0x52b   : > { %5824 = vrcp.f32 %v1325_v17 }
 0x52e   : > { %v1383_v22 = vpop.permute.xlu1 %1382 }
 0x52f   : > { %v1388_v24 = vsel %vm1255_vm3, %v1383_v22, 0 }
 0x532   : > { %v1381_v25 = vpop.permute.xlu1 %1380 }
 0x534   : > { %v5823_v18 = vpop.eup %5822 }
 0x535   : > { %v1328_v20 = vmul.f32 %v5823_v18, %v5819_v12 }
 0x538   : > { %v5825_v19 = vpop.eup %5824 }
 0x539   : > { %v1329_v21 = vmul.f32 %v5825_v19, %v5821_v14 }
 0x53b   : > { %v1330_v23 = vpack.c.bf16 %v1329_v21, %v1328_v20 }
 0x53d   : > { %5375 = vmatmul.mubr.msk.bf16.vlgmr.msra.gmra.mxu1 %vm1307_vm4, %v1330_v23 }
 0x53e   : > { %5379 = vmatpush3.bf16.xpose.msra.mxu1 %v1388_v24  ;;  %5380 = vmatprep.mubr.msk.bf16.mxu1 %vm6014_vm1, %v6013_v1 }
 0x53f   : > { %5384 = vmatprep.subr.bf16.mxu1 %v6013_v1 }
 0x545   : > { %5381 = vmatmul.mubr.msk.bf16.vlgmr.msra.gmra.mxu1 %vm1255_vm3, %v1381_v25 }
 0x546   : > { %5386 = vmatprep.mubr.msk.bf16.mxu1 %vm6014_vm1, %v6013_v1 }
 0x5fd   : > { %v1371_v26 = vpop.f32.mrf.mxu1 }
 0x5fe   : > { %1378 = vst.msk [vmem:[#allocation2] sm:$0xff] %vm1255_vm3, %v1371_v26 }
 0x5ff   : > { %v5376_v27 = vpop.f32.mrf.mxu1 }
 0x601   : > { %v1374_v28 = vpop.f32.mrf.mxu1 }
 0x602   : > { %1379 = vst.msk [vmem:[#allocation2 + $0x8] sm:$0xff] %vm1255_vm3, %v1374_v28 }
 0x603   : > { %v5377_v29 = vpop.f32.mrf.mxu1 }
 0x605   : > { %v1424_v30 = vpop.f32.mrf.mxu1 }
 0x606   : > { %v1431_v31 = vmul.f32 0.35355338, %v1424_v30 }
 0x607   : > { %v5382_v32 = vpop.f32.mrf.mxu1 }
 0x608   : > { %v1433_v33 = vadd.f32 %v1431_v31, %v6275_v57 }
 0x609   : > { %v1427_v34 = vpop.f32.mrf.mxu1 }
 0x60a   : > { %v1432_v35 = vmul.f32 0.35355338, %v1427_v34  ;;  %v1435_v36 = vsel %vm1307_vm4, %v1433_v33, -inf }
 0x60b   : > { %1436 = vmax.xlane.f32.xlu0 %v1435_v36  ;;  %v5383_v37 = vpop.f32.mrf.mxu1 }
 0x60c   : > { %v1434_v38 = vadd.f32 %v1432_v35, %v6279_v62 }
 0x60e   : > { %v1438_v39 = vsel %vm1307_vm4, %v1434_v38, -inf }
 0x60f   : > { %1439 = vmax.xlane.f32.xlu1 %v1438_v39 }
 0x620   : > { %1654 = vrot.lane.b32.xlu1 %v6264_v53, %s6958_s10  ;;  %s7021_s10 = sld [smem:[#allocation7_spill]] }
 0x621   : > { %1458 = vrot.lane.b32.xlu0 %v6264_v53, %s6946_s11  ;;  %s6948_s11 = smov 40  }
 0x694   : > { %v1437_v40 = vpop.xlane.xlu0 %1436 }
 0x695   : > { %v1441_v41 = vsub.f32 %v1433_v33, %v1437_v40 }
 0x697   : > { %v1443_v42 = vmul.f32 1.442695, %v1441_v41 }
 0x698   : > { %v1459_v45 = vpop.permute.xlu0 %1458  ;;  %v1440_v46 = vpop.xlane.xlu1 %1439 }
 0x699   : > { %5826 = vpow2.f32 %v1443_v42  ;;  %v1442_v47 = vsub.f32 %v1434_v38, %v1440_v46  ;;  %5385 = vmatpush3.bf16.msra.mxu1 %v1459_v45 }
 0x69a   : > { %5390 = vmatprep.subr.bf16.mxu1 %v6013_v1 }
 0x69b   : > { %v1445_v48 = vmul.f32 1.442695, %v1442_v47 }
 0x69c   : > { %v1655_v49 = vpop.permute.xlu1 %1654 }
 0x69d   : > { %5828 = vpow2.f32 %v1445_v48  ;;  %v1660_v50 = vsel %vm1255_vm3, %v1655_v49, 0 }
 0x69e   : > { %5403 = vmatpush3.bf16.xpose.msra.mxu0 %v1660_v50 }
 0x69f   : > { %5414 = vmatprep.subr.bf16.mxu0 %v6013_v1 }
 0x6a6   : > { %v5827_v51 = vpop.eup %5826 }
 0x6a7   : > { %v1447_v52 = vsel %vm1307_vm4, %v5827_v51, 0.0 }
 0x6a8   : > { %1448 = vadd.xlane.f32.xlu0 %v1447_v52 }
 0x6aa   : > { %v5829_v54 = vpop.eup %5828 }
 0x6ab   : > { %v1450_v55 = vsel %vm1307_vm4, %v5829_v54, 0.0 }
 0x6ac   : > { %1451 = vadd.xlane.f32.xlu0 %v1450_v55 }
 0x6c2   : > { %1518 = vrot.lane.b32.xlu0 %v6264_v53, %s6964_s15 }
 0x6c6   : > { %1516 = vrot.lane.b32.xlu0 %v6264_v53, %s6960_s16 }
 0x6ca   : > { %1652 = vrot.lane.b32.xlu0 %v6264_v53, %s6962_s18 }
 0x731   : > { %v1449_v56 = vpop.xlane.xlu0 %1448 }
 0x732   : > { %5830 = vrcp.f32 %v1449_v56 }
 0x735   : > { %v1452_v58 = vpop.xlane.xlu0 %1451 }
 0x736   : > { %5832 = vrcp.f32 %v1452_v58 }
 0x739   : > { %v1519_v59 = vpop.permute.xlu0 %1518 }
 0x73a   : > { %v1524_v5 = vsel %vm1255_vm3, %v1519_v59, 0 }
 0x73d   : > { %v1517_v60 = vpop.permute.xlu0 %1516 }
 0x73f   : > { %v5831_v61 = vpop.eup %5830 }
 0x740   : > { %v1455_v2 = vmul.f32 %v5831_v61, %v5827_v51 }
 0x741   : > { %v1653_v63 = vpop.permute.xlu0 %1652 }
 0x742   : > { %5405 = vmatmul.mubr.msk.bf16.vlgmr.msra.gmra.mxu0 %vm1255_vm3, %v1653_v63 }
 0x743   : > { %v5833_v0 = vpop.eup %5832  ;;  %5418 = vmatprep.mubr.msk.bf16.mxu0 %vm6014_vm1, %v6013_v1 }
 0x744   : > { %v1456_v3 = vmul.f32 %v5833_v0, %v5829_v54 }
 0x746   : > { %v1457_v4 = vpack.c.bf16 %v1456_v3, %v1455_v2 }
 0x748   : > { %5387 = vmatmul.mubr.msk.bf16.vlgmr.msra.gmra.mxu1 %vm1307_vm4, %v1457_v4 }
 0x749   : > { %5391 = vmatpush3.bf16.xpose.msra.mxu1 %v1524_v5  ;;  %5392 = vmatprep.mubr.msk.bf16.mxu1 %vm6014_vm1, %v6013_v1 }
 0x74a   : > { %5396 = vmatprep.subr.bf16.mxu1 %v6013_v1 }
 0x750   : > { %5393 = vmatmul.mubr.msk.bf16.vlgmr.msra.gmra.mxu1 %vm1255_vm3, %v1517_v60 }
 0x751   : > { %5398 = vmatprep.mubr.msk.bf16.mxu1 %vm6014_vm1, %v6013_v1 }
 0x802   : > { %v1696_v6 = vpop.f32.mrf.mxu0 }
 0x803   : > { %v1703_v15 = vmul.f32 0.35355338, %v1696_v6 }
 0x804   : > { %v5406_v7 = vpop.f32.mrf.mxu0 }
 0x805   : > { %v1705_v23 = vadd.f32 %v1703_v15, %v6275_v57  ;;  %v5771_v7 = vld [vmem:[%s6092_s24 + $0x8] sm:$0xff]  }
 0x806   : > { %v1699_v8 = vpop.f32.mrf.mxu0 }
 0x807   : > { %v1704_v20 = vmul.f32 0.35355338, %v1699_v8  ;;  %v1707_v27 = vsel %vm1307_vm4, %v1705_v23, -inf  ;;  %v1819_v8 = vsel %vm1084_vm2, %v5771_v7, 0 }
 0x808   : > { %v1498_v9 = vpop.f32.mrf.mxu1  ;;  %v5407_v10 = vpop.f32.mrf.mxu0  ;;  %5415 = vmatpush3.bf16.xpose.msra.mxu0 %v1819_v8 }
 0x809   : > { %v1706_v28 = vadd.f32 %v1704_v20, %v6279_v62  ;;  %5416 = vmatprep.subr.bf16.mxu0 %v6013_v1  ;;  %v5772_v10 = vld [vmem:[%s6092_s24] sm:$0xff]  }
 0x80a   : > { %v5388_v11 = vpop.f32.mrf.mxu1 }
 0x80b   : > { %v1710_v29 = vsel %vm1307_vm4, %v1706_v28, -inf }
 0x80c   : > { %v1501_v12 = vpop.f32.mrf.mxu1 }
 0x80e   : > { %v5389_v13 = vpop.f32.mrf.mxu1 }
 0x810   : > { %v1560_v14 = vpop.f32.mrf.mxu1 }
 0x811   : > { %v1567_v16 = vmul.f32 0.35355338, %v1560_v14 }
 0x812   : > { %v5394_v17 = vpop.f32.mrf.mxu1 }
 0x813   : > { %v1569_v18 = vadd.f32 %v1567_v16, %v6275_v57 }
 0x814   : > { %v1563_v19 = vpop.f32.mrf.mxu1 }
 0x815   : > { %v1568_v21 = vmul.f32 0.35355338, %v1563_v19  ;;  %v1571_v22 = vsel %vm1307_vm4, %v1569_v18, -inf }
 0x816   : > { %1572 = vmax.xlane.f32.xlu0 %v1571_v22  ;;  %v5395_v24 = vpop.f32.mrf.mxu1 }
 0x817   : > { %v1570_v25 = vadd.f32 %v1568_v21, %v6279_v62 }
 0x819   : > { %v1574_v26 = vsel %vm1307_vm4, %v1570_v25, -inf }
 0x81a   : > { %1575 = vmax.xlane.f32.xlu1 %v1574_v26  ;;  %1708 = vmax.xlane.f32.xlu0 %v1707_v27  ;;  %v5023_v26 = vld [vmem:[%s6097_s30] ss:$0 sm:$0xff] }
 0x81e   : > { %1711 = vmax.xlane.f32.xlu0 %v1710_v29 }
 0x89f   : > { %v1573_v30 = vpop.xlane.xlu0 %1572 }
 0x8a0   : > { %v1577_v31 = vsub.f32 %v1569_v18, %v1573_v30 }
 0x8a2   : > { %v1579_v32 = vmul.f32 1.442695, %v1577_v31 }
 0x8a3   : > { %v1576_v33 = vpop.xlane.xlu1 %1575  ;;  %v1709_v57 = vpop.xlane.xlu0 %1708 }
 0x8a4   : > { %5834 = vpow2.f32 %v1579_v32  ;;  %v1578_v34 = vsub.f32 %v1570_v25, %v1576_v33  ;;  %v1713_v35 = vsub.f32 %v1705_v23, %v1709_v57 }
 0x8a6   : > { %v1581_v36 = vmul.f32 1.442695, %v1578_v34  ;;  %v1715_v37 = vmul.f32 1.442695, %v1713_v35 }
 0x8a7   : > { %v1712_v38 = vpop.xlane.xlu0 %1711 }
 0x8a8   : > { %5836 = vpow2.f32 %v1581_v36  ;;  %v1714_v39 = vsub.f32 %v1706_v28, %v1712_v38 }
 0x8a9   : > { %5838 = vpow2.f32 %v1715_v37 }
 0x8aa   : > { %v1717_v62 = vmul.f32 1.442695, %v1714_v39 }
 0x8ac   : > { %5840 = vpow2.f32 %v1717_v62 }
 0x8b1   : > { %v5835_v40 = vpop.eup %5834 }
 0x8b2   : > { %v1583_v41 = vsel %vm1307_vm4, %v5835_v40, 0.0 }
 0x8b3   : > { %1584 = vadd.xlane.f32.xlu0 %v1583_v41 }
 0x8b5   : > { %v5837_v42 = vpop.eup %5836 }
 0x8b6   : > { %v5839_v45 = vpop.eup %5838  ;;  %v1586_v46 = vsel %vm1307_vm4, %v5837_v42, 0.0 }
 0x8b7   : > { %v1719_v47 = vsel %vm1307_vm4, %v5839_v45, 0.0  ;;  %1587 = vadd.xlane.f32.xlu0 %v1586_v46 }
 0x8b8   : > { %1720 = vadd.xlane.f32.xlu1 %v1719_v47  ;;  %v5774_v47 = vld [vmem:[%s6102_s6] sm:$0xff]  }
 0x8b9   : > { %v5841_v48 = vpop.eup %5840 }
 0x8ba   : > { %v1722_v49 = vsel %vm1307_vm4, %v5841_v48, 0.0 }
 0x8bb   : > { %1723 = vadd.xlane.f32.xlu0 %v1722_v49 }
 0x8c9   : > { %1594 = vrot.lane.b32.xlu1 %v6264_v53, %s6947_s26  ;;  %s6952_s26 = smov 16  }
 0x8cd   : > { %1507 = vrot.lane.b32.xlu1 %v1498_v9, %s6954_s0 }
 0x8d1   : > { %1509 = vrot.lane.b32.xlu1 %v1501_v12, %s6954_s0  ;;  %1730 = vrot.lane.b32.xlu0 %v6264_v53, %s6948_s11  ;;  %v1816_v12 = vsel %vm1084_vm2, %v5772_v10, 0  ;;  %s6950_s11 = smov 24   ;;  %s7018_s0 = sld [smem:[#allocation15_spill]] }
 0x8d2   : > { %5417 = vmatpush3.bf16.xpose.msra.mxu0 %v1816_v12 }
 0x8d3   : > { %5466 = vmatprep.subr.bf16.mxu0 %v6013_v1 }
 0x8d7   : > { %v5776_v7 = vld [vmem:[%s7018_s0 + $0x10] sm:$0xff]  }
 0x8d8   : > { %v2031_v8 = vsel %vm1084_vm2, %v5776_v7, 0 }
 0x93c   : > { %v1585_v50 = vpop.xlane.xlu0 %1584 }
 0x93d   : > { %5842 = vrcp.f32 %v1585_v50 }
 0x940   : > { %v1588_v51 = vpop.xlane.xlu0 %1587 }
 0x941   : > { %v1721_v52 = vpop.xlane.xlu1 %1720  ;;  %5844 = vrcp.f32 %v1588_v51 }
 0x944   : > { %v1724_v54 = vpop.xlane.xlu0 %1723 }
 0x945   : > { %v1595_v55 = vpop.permute.xlu1 %1594  ;;  %5846 = vrcp.f32 %v1724_v54 }
 0x946   : > { %5397 = vmatpush3.bf16.msra.mxu1 %v1595_v55  ;;  %5848 = vrcp.f32 %v1721_v52 }
 0x947   : > { %5408 = vmatprep.subr.bf16.mxu1 %v6013_v1 }
 0x948   : > { %v1731_v2 = vpop.permute.xlu0 %1730 }
 0x949   : > { %v1508_v56 = vpop.permute.xlu1 %1507 }
 0x94a   : > { %1514 = vst.msk [vmem:[#allocation2] sm:$0xff] %vm1513_vm5, %v1508_v56  ;;  %v5843_v58 = vpop.eup %5842 }
 0x94b   : > { %v1591_v53 = vmul.f32 %v5843_v58, %v5835_v40 }
 0x94d   : > { %v1510_v59 = vpop.permute.xlu1 %1509 }
 0x94e   : > { %v5845_v60 = vpop.eup %5844  ;;  %1515 = vst.msk [vmem:[#allocation2 + $0x8] sm:$0xff] %vm1513_vm5, %v1510_v59  ;;  %v5027_v59 = vld [vmem:[%s6152_s12] ss:$0 sm:$0xff] }
 0x94f   : > { %v1592_v61 = vmul.f32 %v5845_v60, %v5837_v42 }
 0x951   : > { %v1593_v63 = vpack.c.bf16 %v1592_v61, %v1591_v53 }
 0x952   : > { %v5847_v0 = vpop.eup %5846 }
 0x953   : > { %5399 = vmatmul.mubr.msk.bf16.vlgmr.msra.gmra.mxu1 %vm1307_vm4, %v1593_v63  ;;  %v5849_v3 = vpop.eup %5848  ;;  %v1728_v4 = vmul.f32 %v5847_v0, %v5841_v48  ;;  %v1935_v48 = vsel %vm1084_vm2, %v5774_v47, 0 }
 0x954   : > { %5409 = vmatpush3.bf16.msra.mxu1 %v1731_v2  ;;  %5410 = vmatprep.mubr.msk.bf16.mxu1 %vm6014_vm1, %v6013_v1  ;;  %v1727_v5 = vmul.f32 %v5849_v3, %v5839_v45  ;;  %v5775_v2 = vld [vmem:[%s7018_s0 + $0x18] sm:$0xff]  }
 0x955   : > { %5422 = vmatprep.subr.bf16.mxu1 %v6013_v1 }
 0x956   : > { %v1729_v6 = vpack.c.bf16 %v1728_v4, %v1727_v5 }
 0x95b   : > { %5411 = vmatmul.mubr.msk.bf16.vlgmr.msra.gmra.mxu1 %vm1307_vm4, %v1729_v6  ;;  %v2034_v6 = vsel %vm1084_vm2, %v5775_v2, 0 }
 0x95c   : > { %5426 = vmatprep.mubr.msk.bf16.mxu1 %vm6014_vm1, %v6013_v1 }
 0xa13   : > { %v1634_v9 = vpop.f32.mrf.mxu1 }
 0xa14   : > { %1643 = vrot.lane.b32.xlu0 %v1634_v9, %s6952_s26  ;;  %v5777_v9 = vld [vmem:[%s7018_s0 + $0x8] sm:$0xff]  }
 0xa15   : > { %v5400_v11 = vpop.f32.mrf.mxu1  ;;  %v2028_v10 = vsel %vm1084_vm2, %v5777_v9, 0 }
 0xa16   : > { %v5778_v11 = vld [vmem:[%s7018_s0] sm:$0xff]  }
 0xa17   : > { %v1637_v13 = vpop.f32.mrf.mxu1  ;;  %v2025_v12 = vsel %vm1084_vm2, %v5778_v11, 0 }
 0xa18   : > { %1645 = vrot.lane.b32.xlu1 %v1637_v13, %s6952_s26  ;;  %s6393_s26 = scalar_lea.vmem %s7016_s5, %s5194_s1  ;;  %s7019_s1 = sld [smem:[#allocation16_spill]] }
 0xa19   : > { %v5401_v14 = vpop.f32.mrf.mxu1  ;;  %v5779_v13 = vld [vmem:[%s6393_s26] sm:$0xff]   ;;  %s7028_s5 = sld [smem:[#allocation18_spill]] }
 0xa1b   : > { %v1770_v15 = vpop.f32.mrf.mxu1 }
 0xa1c   : > { %1779 = vrot.lane.b32.xlu0 %v1770_v15, %s6950_s11 }
 0xa1d   : > { %v5412_v16 = vpop.f32.mrf.mxu1 }
 0xa1f   : > { %v1773_v17 = vpop.f32.mrf.mxu1 }
 0xa20   : > { %1781 = vrot.lane.b32.xlu1 %v1773_v17, %s6950_s11  ;;  %s7017_s11 = sld [smem:[#allocation23_spill]] }
 0xa21   : > { %v5413_v18 = vpop.f32.mrf.mxu1 }
 0xa26   : > { %v5028_v63 = vld [vmem:[%s7017_s11] ss:$0 sm:$0xff] }
 0xa86   : > { %v1644_v19 = vpop.permute.xlu0 %1643 }
 0xa87   : > { %1650 = vst.msk [vmem:[#allocation2] sm:$0xff] %vm1649_vm6, %v1644_v19  ;;  %v5033_v19 = vld [vmem:[%s7019_s1] ss:$0 sm:$0xff] }
 0xa8a   : > { %v1646_v20 = vpop.permute.xlu1 %1645 }
 0xa8b   : > { %1651 = vst.msk [vmem:[#allocation2 + $0x8] sm:$0xff] %vm1649_vm6, %v1646_v20 }
 0xa8e   : > { %v1780_v21 = vpop.permute.xlu0 %1779 }
 0xa8f   : > { %1786 = vst.msk [vmem:[#allocation2] sm:$0xff] %vm1785_vm7, %v1780_v21 }
 0xa92   : > { %v1782_v22 = vpop.permute.xlu1 %1781 }
 0xa93   : > { %1787 = vst.msk [vmem:[#allocation2 + $0x8] sm:$0xff] %vm1785_vm7, %v1782_v22 }
 0xa96   : > { %v1788_v23 = vld [vmem:[#allocation2] sm:$0xff] }
 0xa9a   : > { %v1789_v24 = vld [vmem:[#allocation2 + $0x8] sm:$0xff] }
 0xa9b   : > { %v1795_v25 = vpack.c.bf16 %v1789_v24, %v1788_v23 }
 0xa9d   : > { %5419 = vmatmul.mubr.msk.bf16.vlgmr.msra.gmra.mxu0 %vm1084_vm2, %v1795_v25 }
 0xa9e   : > { %5468 = vmatprep.mubr.msk.bf16.mxu0 %vm6014_vm1, %v6013_v1 }
 0xb5d   : > { %v1855_v27 = vpop.f32.mrf.mxu0 }
 0xb5e   : > { %v1856_v28 = vadd.f32 %v5023_v26, %v1855_v27  ;;  %v5029_v27 = vld [vmem:[%s7020_s2] ss:$0 sm:$0xff] }
 0xb5f   : > { %v5420_v29 = vpop.f32.mrf.mxu0 }
 0xb60   : > { %v1862_v30 = vadd.f32 %v1856_v28, %v6254_v43 }
 0xb61   : > { %v1858_v31 = vpop.f32.mrf.mxu0 }
 0xb62   : > { %v1859_v32 = vadd.f32 %v5023_v26, %v1858_v31  ;;  %v1866_v33 = vsel %vm1084_vm2, %v1862_v30, 0.0 }
 0xb63   : > { %1867 = vadd.xlane.f32.xlu0 %v1866_v33  ;;  %v5421_v57 = vpop.f32.mrf.mxu0 }
 0xb64   : > { %v1863_v34 = vadd.f32 %v1859_v32, %v6256_v44  ;;  %v5773_v44 = vld [vmem:[%s6102_s6 + $0x8] sm:$0xff]   ;;  %v6433_v32 = vld [vmem:[%s7021_s10] ss:$0 sm:$0xff] }
 0xb65   : > { %v1938_v46 = vsel %vm1084_vm2, %v5773_v44, 0 }
 0xb66   : > { %v1869_v35 = vsel %vm1084_vm2, %v1863_v34, 0.0  ;;  %5423 = vmatpush3.bf16.xpose.msra.mxu1 %v1938_v46 }
 0xb67   : > { %1870 = vadd.xlane.f32.xlu1 %v1869_v35  ;;  %5424 = vmatprep.subr.bf16.mxu1 %v6013_v1 }
 0xb6e   : > { %5425 = vmatpush3.bf16.xpose.msra.mxu1 %v1935_v48 }
 0xb6f   : > { %5430 = vmatprep.subr.bf16.mxu1 %v6013_v1 }
 0xbec   : > { %v1868_v36 = vpop.xlane.xlu0 %1867 }
 0xbed   : > { %v1873_v37 = vmul.f32 0.03125, %v1868_v36 }
 0xbef   : > { %v1875_v38 = vsub.f32 %v1862_v30, %v1873_v37 }
 0xbf0   : > { %v1871_v39 = vpop.xlane.xlu1 %1870 }
 0xbf1   : > { %v1874_v62 = vmul.f32 0.03125, %v1871_v39  ;;  %v1877_v43 = vmul.f32 %v1875_v38, %v1875_v38 }
 0xbf3   : > { %v1876_v40 = vsub.f32 %v1863_v34, %v1874_v62  ;;  %v1879_v41 = vsel %vm1084_vm2, %v1877_v43, 0.0 }
 0xbf4   : > { %1880 = vadd.xlane.f32.xlu0 %v1879_v41 }
 0xbf5   : > { %v1878_v42 = vmul.f32 %v1876_v40, %v1876_v40 }
 0xbf7   : > { %v1882_v45 = vsel %vm1084_vm2, %v1878_v42, 0.0 }
 0xbf8   : > { %1883 = vadd.xlane.f32.xlu0 %v1882_v45 }
 0xc7d   : > { %v1881_v49 = vpop.xlane.xlu0 %1880 }
 0xc7e   : > { %v1885_v50 = vmul.f32 0.03125, %v1881_v49 }
 0xc80   : > { %v1887_v51 = vadd.f32 1e-05, %v1885_v50 }
 0xc81   : > { %v1884_v52 = vpop.xlane.xlu0 %1883 }
 0xc82   : > { %5850 = vrsqrt.f32 %v1887_v51  ;;  %v1886_v54 = vmul.f32 0.03125, %v1884_v52 }
 0xc84   : > { %v1888_v55 = vadd.f32 1e-05, %v1886_v54 }
 0xc86   : > { %5852 = vrsqrt.f32 %v1888_v55 }
 0xc8f   : > { %v5851_v56 = vpop.eup %5850 }
 0xc90   : > { %v1891_v58 = vmul.f32 %v5851_v56, %v1875_v38 }
 0xc92   : > { %v1899_v61 = vmul.f32 %v5027_v59, %v1891_v58 }
 0xc93   : > { %v5853_v60 = vpop.eup %5852 }
 0xc94   : > { %v1892_v53 = vmul.f32 %v5853_v60, %v1876_v40  ;;  %v6398_v3 = vadd.f32 %v5028_v63, %v1899_v61 }
 0xc96   : > { %v1900_v0 = vmul.f32 %v5027_v59, %v1892_v53 }
 0xc98   : > { %v6400_v4 = vadd.f32 %v5028_v63, %v1900_v0 }
 0xc9a   : > { %v1914_v5 = vpack.c.bf16 %v6400_v4, %v6398_v3 }
 0xc9c   : > { %5427 = vmatmul.mubr.msk.bf16.vlgmr.msra.gmra.mxu1 %vm1084_vm2, %v1914_v5 }
 0xc9d   : > { %5431 = vmatpush3.bf16.xpose.msra.mxu1 %v2034_v6  ;;  %5438 = vmatprep.mubr.msk.bf16.mxu1 %vm6014_vm1, %v6013_v1 }
 0xc9e   : > { %5432 = vmatprep.subr.bf16.mxu1 %v6013_v1 }
 0xca5   : > { %5433 = vmatpush3.bf16.xpose.msra.mxu1 %v2031_v8 }
 0xca6   : > { %5434 = vmatprep.subr.bf16.mxu1 %v6013_v1 }
 0xcad   : > { %5435 = vmatpush3.bf16.xpose.msra.mxu1 %v2028_v10 }
 0xcae   : > { %5436 = vmatprep.subr.bf16.mxu1 %v6013_v1 }
 0xcb5   : > { %5437 = vmatpush3.bf16.xpose.msra.mxu1 %v2025_v12 }
 0xcb6   : > { %5442 = vmatprep.subr.bf16.mxu1 %v6013_v1 }
 0xcbc   : > { %5439 = vmatmul.mubr.msk.bf16.vlgmr.msra.gmra.mxu1 %vm1084_vm2, %v5779_v13 }
 0xcbd   : > { %5444 = vmatprep.mubr.msk.bf16.mxu1 %vm6014_vm1, %v6013_v1 }
 0xd5c   : > { %v1974_v14 = vpop.f32.mrf.mxu1 }
 0xd5d   : > { %v1975_v29 = vadd.f32 %v5029_v27, %v1974_v14 }
 0xd5e   : > { %v5428_v15 = vpop.f32.mrf.mxu1 }
 0xd60   : > { %v1977_v16 = vpop.f32.mrf.mxu1 }
 0xd61   : > { %v1978_v28 = vadd.f32 %v5029_v27, %v1977_v16 }
 0xd62   : > { %v5429_v17 = vpop.f32.mrf.mxu1 }
 0xd63   : > { %v2077_v30 = vpack.c.bf16 %v1978_v28, %v1975_v29 }
 0xd7c   : > { %v2070_v18 = vpop.f32.mrf.mxu1 }
 0xd7d   : > { %v2071_v22 = vadd.f32 %v5033_v19, %v2070_v18 }
 0xd7e   : > { %v5440_v20 = vpop.f32.mrf.mxu1 }
 0xd80   : > { %v2073_v21 = vpop.f32.mrf.mxu1 }
 0xd81   : > { %v2074_v23 = vadd.f32 %v5033_v19, %v2073_v21 }
 0xd82   : > { %v5441_v24 = vpop.f32.mrf.mxu1 }
 0xd83   : > { %v6423_v25 = vpack.c.bf16 %v2074_v23, %v2071_v22 }
 0xd85   : > { %v2083_v26 = vsel %vm1255_vm3, %v6423_v25, 0 }
 0xd86   : > { %5443 = vmatpush3.bf16.xpose.msra.mxu1 %v2083_v26 }
 0xd87   : > { %5448 = vmatprep.subr.bf16.mxu1 %v6013_v1 }
 0xd8d   : > { %5445 = vmatmul.mubr.msk.bf16.vlgmr.msra.gmra.mxu1 %vm1255_vm3, %v2077_v30 }
 0xd8e   : > { %5450 = vmatprep.mubr.msk.bf16.mxu1 %vm6014_vm1, %v6013_v1 }
 0xe4d   : > { %v2119_v31 = vpop.f32.mrf.mxu1 }
 0xe4e   : > { %v2126_v33 = vmul.f32 0.35355338, %v2119_v31 }
 0xe4f   : > { %v5446_v57 = vpop.f32.mrf.mxu1 }
 0xe50   : > { %v2134_v34 = vadd.f32 %v6433_v32, %v2126_v33 }
 0xe51   : > { %v2122_v35 = vpop.f32.mrf.mxu1 }
 0xe52   : > { %v2127_v36 = vmul.f32 0.35355338, %v2122_v35  ;;  %v2136_v37 = vsel %vm1307_vm4, %v2134_v34, -inf }
 0xe53   : > { %2137 = vmax.xlane.f32.xlu1 %v2136_v37  ;;  %v5447_v38 = vpop.f32.mrf.mxu1 }
 0xe54   : > { %v2135_v39 = vadd.f32 %v6433_v32, %v2127_v36 }
 0xe56   : > { %v2139_v62 = vsel %vm1307_vm4, %v2135_v39, -inf }
 0xe57   : > { %2140 = vmax.xlane.f32.xlu0 %v2139_v62 }
 0xe64   : > { %2160 = vrot.lane.b32.xlu1 %v6423_v25, %s6968_s28  ;;  %s7026_s28 = smov 16  }
 0xedc   : > { %v2138_v43 = vpop.xlane.xlu1 %2137 }
 0xedd   : > { %v2142_v40 = vsub.f32 %v2134_v34, %v2138_v43 }
 0xedf   : > { %v2144_v41 = vmul.f32 1.442695, %v2142_v40 }
 0xee0   : > { %v2161_v42 = vpop.permute.xlu1 %2160  ;;  %v2141_v45 = vpop.xlane.xlu0 %2140 }
 0xee1   : > { %5854 = vpow2.f32 %v2144_v41  ;;  %v2143_v44 = vsub.f32 %v2135_v39, %v2141_v45  ;;  %5449 = vmatpush3.bf16.msra.mxu1 %v2161_v42 }
 0xee2   : > { %5454 = vmatprep.subr.bf16.mxu1 %v6013_v1 }
 0xee3   : > { %v2146_v46 = vmul.f32 1.442695, %v2143_v44 }
 0xee5   : > { %5856 = vpow2.f32 %v2146_v46 }
 0xeee   : > { %v5855_v47 = vpop.eup %5854 }
 0xeef   : > { %v2148_v48 = vsel %vm1307_vm4, %v5855_v47, 0.0 }
 0xef0   : > { %2149 = vadd.xlane.f32.xlu1 %v2148_v48 }
 0xef2   : > { %v5857_v49 = vpop.eup %5856 }
 0xef3   : > { %v2151_v50 = vsel %vm1307_vm4, %v5857_v49, 0.0 }
 0xef4   : > { %2152 = vadd.xlane.f32.xlu0 %v2151_v50 }
 0xf01   : > { %2210 = vrot.lane.b32.xlu1 %v2077_v30, %s6966_s7 }
 0xf05   : > { %2347 = vrot.lane.b32.xlu1 %v6423_v25, %s6960_s16 }
 0xf09   : > { %2482 = vrot.lane.b32.xlu1 %v6423_v25, %s6962_s18 }
 0xf0a   : > { %2212 = vrot.lane.b32.xlu0 %v6423_v25, %s6966_s7  ;;  %s7025_s7 = smov 8  }
 0xf0e   : > { %2345 = vrot.lane.b32.xlu0 %v2077_v30, %s6960_s16  ;;  %s7022_s16 = smov 72  }
 0xf12   : > { %2480 = vrot.lane.b32.xlu0 %v2077_v30, %s6962_s18  ;;  %s7023_s18 = smov 88  }
 0xf79   : > { %v2150_v51 = vpop.xlane.xlu1 %2149 }
 0xf7a   : > { %5858 = vrcp.f32 %v2150_v51 }
 0xf7d   : > { %v2211_v52 = vpop.permute.xlu1 %2210  ;;  %v2153_v54 = vpop.xlane.xlu0 %2152 }
 0xf7e   : > { %5860 = vrcp.f32 %v2153_v54 }
 0xf81   : > { %v2348_v55 = vpop.permute.xlu1 %2347  ;;  %v2213_v58 = vpop.permute.xlu0 %2212 }
 0xf82   : > { %v2353_v56 = vsel %vm1255_vm3, %v2348_v55, 0  ;;  %v2218_v6 = vsel %vm1255_vm3, %v2213_v58, 0 }
 0xf83   : > { %5467 = vmatpush3.bf16.xpose.msra.mxu0 %v2353_v56 }
 0xf84   : > { %5478 = vmatprep.subr.bf16.mxu0 %v6013_v1 }
 0xf85   : > { %v2483_v59 = vpop.permute.xlu1 %2482  ;;  %v2346_v53 = vpop.permute.xlu0 %2345 }
 0xf86   : > { %v2488_v61 = vsel %vm1255_vm3, %v2483_v59, 0 }
 0xf87   : > { %v5859_v60 = vpop.eup %5858 }
 0xf88   : > { %v2156_v0 = vmul.f32 %v5859_v60, %v5855_v47 }
 0xf89   : > { %v2481_v7 = vpop.permute.xlu0 %2480 }
 0xf8a   : > { %5469 = vmatmul.mubr.msk.bf16.vlgmr.msra.gmra.mxu0 %vm1255_vm3, %v2346_v53 }
 0xf8b   : > { %v5861_v63 = vpop.eup %5860  ;;  %5479 = vmatpush3.bf16.xpose.msra.mxu0 %v2488_v61  ;;  %5480 = vmatprep.mubr.msk.bf16.mxu0 %vm6014_vm1, %v6013_v1 }
 0xf8c   : > { %v2157_v2 = vmul.f32 %v5861_v63, %v5857_v49  ;;  %5490 = vmatprep.subr.bf16.mxu0 %v6013_v1 }
 0xf8e   : > { %v2158_v5 = vpack.c.bf16 %v2157_v2, %v2156_v0 }
 0xf90   : > { %5451 = vmatmul.mubr.msk.bf16.vlgmr.msra.gmra.mxu1 %vm1307_vm4, %v2158_v5 }
 0xf91   : > { %5455 = vmatpush3.bf16.xpose.msra.mxu1 %v2218_v6  ;;  %5456 = vmatprep.mubr.msk.bf16.mxu1 %vm6014_vm1, %v6013_v1 }
 0xf92   : > { %5481 = vmatmul.mubr.msk.bf16.vlgmr.msra.gmra.mxu0 %vm1255_vm3, %v2481_v7  ;;  %5460 = vmatprep.subr.bf16.mxu1 %v6013_v1 }
 0xf93   : > { %5494 = vmatprep.mubr.msk.bf16.mxu0 %vm6014_vm1, %v6013_v1 }
 0xf98   : > { %5457 = vmatmul.mubr.msk.bf16.vlgmr.msra.gmra.mxu1 %vm1255_vm3, %v2211_v52 }
 0xf99   : > { %5462 = vmatprep.mubr.msk.bf16.mxu1 %vm6014_vm1, %v6013_v1 }
0x104a   : > { %v2389_v8 = vpop.f32.mrf.mxu0 }
0x104b   : > { %v2396_v26 = vmul.f32 0.35355338, %v2389_v8 }
0x104c   : > { %v5470_v9 = vpop.f32.mrf.mxu0 }
0x104d   : > { %v2398_v34 = vadd.f32 %v6433_v32, %v2396_v26 }
0x104e   : > { %v2392_v10 = vpop.f32.mrf.mxu0 }
0x104f   : > { %v2397_v21 = vmul.f32 0.35355338, %v2392_v10  ;;  %v2400_v62 = vsel %vm1307_vm4, %v2398_v34, -inf }
0x1050   : > { %v2200_v11 = vpop.f32.mrf.mxu1  ;;  %v5471_v12 = vpop.f32.mrf.mxu0 }
0x1051   : > { %2207 = vst.msk [vmem:[#allocation2] sm:$0xff] %vm1255_vm3, %v2200_v11  ;;  %v2399_v31 = vadd.f32 %v6433_v32, %v2397_v21 }
0x1052   : > { %v5452_v13 = vpop.f32.mrf.mxu1  ;;  %v2524_v14 = vpop.f32.mrf.mxu0 }
0x1053   : > { %v2531_v35 = vmul.f32 0.35355338, %v2524_v14  ;;  %v2403_v36 = vsel %vm1307_vm4, %v2399_v31, -inf }
0x1054   : > { %v2203_v15 = vpop.f32.mrf.mxu1  ;;  %v5482_v16 = vpop.f32.mrf.mxu0 }
0x1055   : > { %2208 = vst.msk [vmem:[#allocation2 + $0x8] sm:$0xff] %vm1255_vm3, %v2203_v15  ;;  %v2533_v43 = vadd.f32 %v6433_v32, %v2531_v35 }
0x1056   : > { %v5453_v17 = vpop.f32.mrf.mxu1  ;;  %v2527_v18 = vpop.f32.mrf.mxu0 }
0x1057   : > { %v2532_v28 = vmul.f32 0.35355338, %v2527_v18  ;;  %v2535_v40 = vsel %vm1307_vm4, %v2533_v43, -inf }
0x1058   : > { %v2254_v19 = vpop.f32.mrf.mxu1  ;;  %v5483_v20 = vpop.f32.mrf.mxu0 }
0x1059   : > { %v2261_v22 = vmul.f32 0.35355338, %v2254_v19  ;;  %v2534_v38 = vadd.f32 %v6433_v32, %v2532_v28 }
0x105a   : > { %v5458_v23 = vpop.f32.mrf.mxu1 }
0x105b   : > { %v2263_v24 = vadd.f32 %v6433_v32, %v2261_v22  ;;  %v2538_v39 = vsel %vm1307_vm4, %v2534_v38, -inf }
0x105c   : > { %v2257_v27 = vpop.f32.mrf.mxu1 }
0x105d   : > { %v2262_v29 = vmul.f32 0.35355338, %v2257_v27  ;;  %v2265_v30 = vsel %vm1307_vm4, %v2263_v24, -inf }
0x105e   : > { %2266 = vmax.xlane.f32.xlu1 %v2265_v30  ;;  %v5459_v33 = vpop.f32.mrf.mxu1 }
0x105f   : > { %v2264_v57 = vadd.f32 %v6433_v32, %v2262_v29 }
0x1061   : > { %v2268_v37 = vsel %vm1307_vm4, %v2264_v57, -inf }
0x1062   : > { %2404 = vmax.xlane.f32.xlu1 %v2403_v36  ;;  %2269 = vmax.xlane.f32.xlu0 %v2268_v37 }
0x1066   : > { %2539 = vmax.xlane.f32.xlu1 %v2538_v39  ;;  %2401 = vmax.xlane.f32.xlu0 %v2400_v62 }
0x106a   : > { %2536 = vmax.xlane.f32.xlu0 %v2535_v40 }
0x10e7   : > { %v2267_v41 = vpop.xlane.xlu1 %2266 }
0x10e8   : > { %v2271_v32 = vsub.f32 %v2263_v24, %v2267_v41 }
0x10ea   : > { %v2273_v60 = vmul.f32 1.442695, %v2271_v32 }
0x10eb   : > { %v2405_v42 = vpop.xlane.xlu1 %2404  ;;  %v2270_v45 = vpop.xlane.xlu0 %2269 }
0x10ec   : > { %v2407_v44 = vsub.f32 %v2399_v31, %v2405_v42  ;;  %v2272_v47 = vsub.f32 %v2264_v57, %v2270_v45 }
0x10ee   : > { %v2410_v46 = vmul.f32 1.442695, %v2407_v44  ;;  %v2275_v52 = vmul.f32 1.442695, %v2272_v47 }
0x10ef   : > { %v2540_v48 = vpop.xlane.xlu1 %2539  ;;  %v2402_v49 = vpop.xlane.xlu0 %2401 }
0x10f0   : > { %5862 = vpow2.f32 %v2410_v46  ;;  %v2542_v50 = vsub.f32 %v2534_v38, %v2540_v48  ;;  %v2406_v51 = vsub.f32 %v2398_v34, %v2402_v49 }
0x10f2   : > { %v2545_v54 = vmul.f32 1.442695, %v2542_v50  ;;  %v2408_v55 = vmul.f32 1.442695, %v2406_v51 }
0x10f3   : > { %v2537_v56 = vpop.xlane.xlu0 %2536 }
0x10f4   : > { %5864 = vpow2.f32 %v2545_v54  ;;  %v2541_v58 = vsub.f32 %v2533_v43, %v2537_v56 }
0x10f5   : > { %5866 = vpow2.f32 %v2408_v55 }
0x10f6   : > { %5868 = vpow2.f32 %v2275_v52  ;;  %v2543_v59 = vmul.f32 1.442695, %v2541_v58 }
0x10f8   : > { %5870 = vpow2.f32 %v2543_v59 }
0x10f9   : > { %5872 = vpow2.f32 %v2273_v60 }
0x10fd   : > { %v5863_v53 = vpop.eup %5862 }
0x10fe   : > { %v2415_v61 = vsel %vm1307_vm4, %v5863_v53, 0.0 }
0x10ff   : > { %2416 = vadd.xlane.f32.xlu1 %v2415_v61 }
0x1101   : > { %v5865_v63 = vpop.eup %5864 }
0x1102   : > { %v5867_v0 = vpop.eup %5866  ;;  %v2550_v2 = vsel %vm1307_vm4, %v5865_v63, 0.0 }
0x1103   : > { %v5869_v5 = vpop.eup %5868  ;;  %2551 = vadd.xlane.f32.xlu1 %v2550_v2  ;;  %v2412_v6 = vsel %vm1307_vm4, %v5867_v0, 0.0 }
0x1104   : > { %2413 = vadd.xlane.f32.xlu0 %v2412_v6  ;;  %v2280_v8 = vsel %vm1307_vm4, %v5869_v5, 0.0 }
0x1105   : > { %v5871_v7 = vpop.eup %5870 }
0x1106   : > { %v2547_v9 = vsel %vm1307_vm4, %v5871_v7, 0.0  ;;  %v5873_v10 = vpop.eup %5872 }
0x1107   : > { %2281 = vadd.xlane.f32.xlu1 %v2280_v8  ;;  %v2277_v11 = vsel %vm1307_vm4, %v5873_v10, 0.0 }
0x1108   : > { %2548 = vadd.xlane.f32.xlu0 %v2547_v9 }
0x110c   : > { %2278 = vadd.xlane.f32.xlu0 %v2277_v11  ;;  %v5782_v11 = vld [vmem:[%s7029_s8 + $0x18] sm:$0xff]  }
0x1118   : > { %2423 = vrot.lane.b32.xlu1 %v6423_v25, %s6964_s15  ;;  %s7024_s15 = sld [smem:[#allocation17_spill]] }
0x111c   : > { %2558 = vrot.lane.b32.xlu1 %v6423_v25, %s7022_s16 }
0x111e   : > { %v5780_v37 = vld [vmem:[%s7024_s15 + $0x8] sm:$0xff]   ;;  %v5781_v41 = vld [vmem:[%s7024_s15] sm:$0xff]  }
0x111f   : > { %v2646_v39 = vsel %vm1084_vm2, %v5780_v37, 0  ;;  %v2643_v45 = vsel %vm1084_vm2, %v5781_v41, 0  ;;  %v5053_v37 = vld [vmem:[%s7031_s13] ss:$0 sm:$0xff] }
0x1120   : > { %5491 = vmatpush3.bf16.xpose.msra.mxu0 %v2646_v39 }
0x1121   : > { %5492 = vmatprep.subr.bf16.mxu0 %v6013_v1 }
0x1122   : > { %2288 = vrot.lane.b32.xlu0 %v6423_v25, %s7023_s18 }
0x1128   : > { %5493 = vmatpush3.bf16.xpose.msra.mxu0 %v2643_v45 }
0x1129   : > { %5510 = vmatprep.subr.bf16.mxu0 %v6013_v1 }
0x1188   : > { %v2417_v12 = vpop.xlane.xlu1 %2416 }
0x118c   : > { %v2552_v13 = vpop.xlane.xlu1 %2551 }
0x118d   : > { %v2414_v14 = vpop.xlane.xlu0 %2413 }
0x1190   : > { %v2282_v15 = vpop.xlane.xlu1 %2281 }
0x1191   : > { %v2549_v16 = vpop.xlane.xlu0 %2548  ;;  %5874 = vrcp.f32 %v2282_v15 }
0x1194   : > { %v2424_v24 = vpop.permute.xlu1 %2423 }
0x1195   : > { %v2279_v17 = vpop.xlane.xlu0 %2278 }
0x1196   : > { %5876 = vrcp.f32 %v2279_v17 }
0x1197   : > { %5878 = vrcp.f32 %v2414_v14 }
0x1198   : > { %5880 = vrcp.f32 %v2417_v12  ;;  %v2559_v31 = vpop.permute.xlu1 %2558  ;;  %v2784_v12 = vsel %vm1084_vm2, %v5782_v11, 0 }
0x1199   : > { %v2289_v18 = vpop.permute.xlu0 %2288  ;;  %5882 = vrcp.f32 %v2549_v16 }
0x119a   : > { %5461 = vmatpush3.bf16.msra.mxu1 %v2289_v18  ;;  %5884 = vrcp.f32 %v2552_v13 }
0x119b   : > { %5472 = vmatprep.subr.bf16.mxu1 %v6013_v1 }
0x119e   : > { %v5875_v19 = vpop.eup %5874 }
0x119f   : > { %v2286_v25 = vmul.f32 %v5875_v19, %v5869_v5 }
0x11a3   : > { %v5877_v20 = vpop.eup %5876 }
0x11a4   : > { %v2285_v21 = vmul.f32 %v5877_v20, %v5873_v10  ;;  %v5879_v23 = vpop.eup %5878 }
0x11a5   : > { %v5881_v26 = vpop.eup %5880  ;;  %v2420_v27 = vmul.f32 %v5879_v23, %v5867_v0 }
0x11a6   : > { %v2287_v22 = vpack.c.bf16 %v2286_v25, %v2285_v21  ;;  %v2421_v28 = vmul.f32 %v5881_v26, %v5863_v53  ;;  %v5883_v30 = vpop.eup %5882  ;;  %v5049_v53 = vld [vmem:[%s7028_s5] ss:$0 sm:$0xff]  ;;  %v5783_v21 = vld [vmem:[%s7029_s8 + $0x10] sm:$0xff]  }
0x11a7   : > { %v5885_v33 = vpop.eup %5884  ;;  %v2555_v57 = vmul.f32 %v5883_v30, %v5871_v7  ;;  %v2781_v25 = vsel %vm1084_vm2, %v5783_v21, 0 }
0x11a8   : > { %5463 = vmatmul.mubr.msk.bf16.vlgmr.msra.gmra.mxu1 %vm1307_vm4, %v2287_v22  ;;  %v2422_v29 = vpack.c.bf16 %v2421_v28, %v2420_v27  ;;  %v2556_v34 = vmul.f32 %v5885_v33, %v5865_v63  ;;  %v5784_v22 = vld [vmem:[%s7029_s8 + $0x8] sm:$0xff]  }
0x11a9   : > { %5473 = vmatpush3.bf16.msra.mxu1 %v2424_v24  ;;  %5474 = vmatprep.mubr.msk.bf16.mxu1 %vm6014_vm1, %v6013_v1  ;;  %v2778_v23 = vsel %vm1084_vm2, %v5784_v22, 0  ;;  %v5785_v24 = vld [vmem:[%s7029_s8] sm:$0xff]   ;;  %v5786_v27 = vld [vmem:[%s7030_s9 + $0x8] sm:$0xff]  }
0x11aa   : > { %5484 = vmatprep.subr.bf16.mxu1 %v6013_v1  ;;  %v2557_v35 = vpack.c.bf16 %v2556_v34, %v2555_v57  ;;  %v2775_v26 = vsel %vm1084_vm2, %v5785_v24, 0  ;;  %v2859_v28 = vsel %vm2851_vm8, %v5786_v27, 0 }
0x11b0   : > { %5475 = vmatmul.mubr.msk.bf16.vlgmr.msra.gmra.mxu1 %vm1307_vm4, %v2422_v29 }
0x11b1   : > { %5485 = vmatpush3.bf16.msra.mxu1 %v2559_v31  ;;  %5486 = vmatprep.mubr.msk.bf16.mxu1 %vm6014_vm1, %v6013_v1 }
0x11b2   : > { %5498 = vmatprep.subr.bf16.mxu1 %v6013_v1 }
0x11b8   : > { %5487 = vmatmul.mubr.msk.bf16.vlgmr.msra.gmra.mxu1 %vm1307_vm4, %v2557_v35 }
0x11b9   : > { %5506 = vmatprep.mubr.msk.bf16.mxu1 %vm6014_vm1, %v6013_v1  ;;  %5499 = vmatpush3.bf16.xpose.msra.mxu1 %v2784_v12  ;;  %v5790_v12 = vld [vmem:[%s7007_s14 + $0x48] sm:$0xff]  }
0x11ba   : > { %5500 = vmatprep.subr.bf16.mxu1 %v6013_v1 }
0x11c1   : > { %5501 = vmatpush3.bf16.xpose.msra.mxu1 %v2781_v25  ;;  %v5791_v25 = vld [vmem:[%s7007_s14 + $0x40] sm:$0xff]  }
0x11c2   : > { %5502 = vmatprep.subr.bf16.mxu1 %v6013_v1  ;;  %v3010_v22 = vsel %vm1084_vm2, %v5791_v25, 0 }
0x11c9   : > { %5503 = vmatpush3.bf16.xpose.msra.mxu1 %v2778_v23  ;;  %v5792_v23 = vld [vmem:[%s7007_s14 + $0x38] sm:$0xff]  }
0x11ca   : > { %5504 = vmatprep.subr.bf16.mxu1 %v6013_v1  ;;  %v3007_v24 = vsel %vm1084_vm2, %v5792_v23, 0 }
0x11d1   : > { %5505 = vmatpush3.bf16.xpose.msra.mxu1 %v2775_v26  ;;  %v5793_v26 = vld [vmem:[%s7007_s14 + $0x30] sm:$0xff]  }
0x11d2   : > { %5534 = vmatprep.subr.bf16.mxu1 %v6013_v1  ;;  %v3004_v27 = vsel %vm1084_vm2, %v5793_v26, 0 }
0x1268   : > { %v2328_v36 = vpop.f32.mrf.mxu1 }
0x1269   : > { %2337 = vrot.lane.b32.xlu0 %v2328_v36, %s7025_s7 }
0x126a   : > { %v5464_v38 = vpop.f32.mrf.mxu1 }
0x126c   : > { %v2331_v62 = vpop.f32.mrf.mxu1 }
0x126d   : > { %2339 = vrot.lane.b32.xlu1 %v2331_v62, %s7025_s7 }
0x126e   : > { %v5465_v43 = vpop.f32.mrf.mxu1 }
0x126f   : > { %v5054_v43 = vld [vmem:[%s7032_s25] ss:$0 sm:$0xff] }
0x1270   : > { %v2463_v40 = vpop.f32.mrf.mxu1 }
0x1271   : > { %2472 = vrot.lane.b32.xlu0 %v2463_v40, %s7026_s28 }
0x1272   : > { %v5476_v42 = vpop.f32.mrf.mxu1 }
0x1274   : > { %v2466_v44 = vpop.f32.mrf.mxu1 }
0x1275   : > { %2474 = vrot.lane.b32.xlu1 %v2466_v44, %s7026_s28  ;;  %v5787_v44 = vld [vmem:[%s7030_s9] sm:$0xff]  }
0x1276   : > { %v5477_v46 = vpop.f32.mrf.mxu1 }
0x1277   : > { %v2856_v46 = vsel %vm2851_vm8, %v5787_v44, 0  ;;  %v5080_v44 = vld [vmem:[%s7005_s19 + $0x1] ss:$0 sm:$0xff]  ;;  %s7043_s19 = smov 104  }
0x1278   : > { %v2598_v47 = vpop.f32.mrf.mxu1 }
0x1279   : > { %2607 = vrot.lane.b32.xlu0 %v2598_v47, %s7027_s3  ;;  %v5055_v47 = vld [vmem:[%s7033_s29] ss:$0 sm:$0xff] }
0x127a   : > { %v5488_v48 = vpop.f32.mrf.mxu1 }
0x127c   : > { %v2601_v49 = vpop.f32.mrf.mxu1 }
0x127d   : > { %2609 = vrot.lane.b32.xlu1 %v2601_v49, %s7027_s3 }
0x127e   : > { %v5489_v50 = vpop.f32.mrf.mxu1 }
0x12db   : > { %v2338_v51 = vpop.permute.xlu0 %2337 }
0x12dc   : > { %2343 = vst.msk [vmem:[#allocation2] sm:$0xff] %vm1513_vm5, %v2338_v51 }
0x12df   : > { %v2340_v52 = vpop.permute.xlu1 %2339 }
0x12e0   : > { %2344 = vst.msk [vmem:[#allocation2 + $0x8] sm:$0xff] %vm1513_vm5, %v2340_v52 }
0x12e3   : > { %v2473_v54 = vpop.permute.xlu0 %2472 }
0x12e4   : > { %2478 = vst.msk [vmem:[#allocation2] sm:$0xff] %vm1649_vm6, %v2473_v54 }
0x12e7   : > { %v2475_v55 = vpop.permute.xlu1 %2474 }
0x12e8   : > { %2479 = vst.msk [vmem:[#allocation2 + $0x8] sm:$0xff] %vm1649_vm6, %v2475_v55 }
0x12eb   : > { %v2608_v32 = vpop.permute.xlu0 %2607 }
0x12ec   : > { %2613 = vst.msk [vmem:[#allocation2] sm:$0xff] %vm1785_vm7, %v2608_v32 }
0x12ef   : > { %v2610_v56 = vpop.permute.xlu1 %2609 }
0x12f0   : > { %2614 = vst.msk [vmem:[#allocation2 + $0x8] sm:$0xff] %vm1785_vm7, %v2610_v56 }
0x12f3   : > { %v2615_v58 = vld [vmem:[#allocation2] sm:$0xff] }
0x12f7   : > { %v2616_v59 = vld [vmem:[#allocation2 + $0x8] sm:$0xff] }
0x12f8   : > { %v2622_v60 = vpack.c.bf16 %v2616_v59, %v2615_v58  ;;  %v5061_v58 = vld [vmem:[%s7034_s22] ss:$0 sm:$0xff]  ;;  %s7036_s22 = sld [smem:[#allocation26_spill]] }
0x12fa   : > { %5495 = vmatmul.mubr.msk.bf16.vlgmr.msra.gmra.mxu0 %vm1084_vm2, %v2622_v60 }
0x12fb   : > { %5514 = vmatprep.mubr.msk.bf16.mxu0 %vm6014_vm1, %v6013_v1  ;;  %5511 = vmatpush3.bf16.xpose.msra.mxu0 %v2859_v28 }
0x12fc   : > { %5512 = vmatprep.subr.bf16.mxu0 %v6013_v1 }
0x1303   : > { %5513 = vmatpush3.bf16.xpose.msra.mxu0 %v2856_v46 }
0x1304   : > { %5518 = vmatprep.subr.bf16.mxu0 %v6013_v1 }
0x13ba   : > { %v2682_v61 = vpop.f32.mrf.mxu0 }
0x13bb   : > { %v2683_v63 = vadd.f32 %v5049_v53, %v2682_v61 }
0x13bc   : > { %v5496_v0 = vpop.f32.mrf.mxu0 }
0x13bd   : > { %v2689_v2 = vadd.f32 %v2683_v63, %v6398_v3 }
0x13be   : > { %v2685_v5 = vpop.f32.mrf.mxu0 }
0x13bf   : > { %v2686_v6 = vadd.f32 %v5049_v53, %v2685_v5  ;;  %v2693_v7 = vsel %vm1084_vm2, %v2689_v2, 0.0 }
0x13c0   : > { %2694 = vadd.xlane.f32.xlu0 %v2693_v7  ;;  %v5497_v8 = vpop.f32.mrf.mxu0 }
0x13c1   : > { %v2690_v9 = vadd.f32 %v2686_v6, %v6400_v4  ;;  %v5788_v8 = vld [vmem:[%s7007_s14 + $0x58] sm:$0xff]  }
0x13c3   : > { %v2696_v10 = vsel %vm1084_vm2, %v2690_v9, 0.0 }
0x13c4   : > { %2697 = vadd.xlane.f32.xlu1 %v2696_v10  ;;  %v5789_v10 = vld [vmem:[%s7007_s14 + $0x50] sm:$0xff]   ;;  %s7039_s14 = smov 64  }
0x13c5   : > { %v3016_v11 = vsel %vm1084_vm2, %v5789_v10, 0 }
0x1449   : > { %v2695_v13 = vpop.xlane.xlu0 %2694 }
0x144a   : > { %v2699_v3 = vmul.f32 0.03125, %v2695_v13  ;;  %v3013_v13 = vsel %vm1084_vm2, %v5790_v12, 0 }
0x144c   : > { %v2701_v14 = vsub.f32 %v2689_v2, %v2699_v3 }
0x144d   : > { %v2698_v15 = vpop.xlane.xlu1 %2697 }
0x144e   : > { %v2700_v16 = vmul.f32 0.03125, %v2698_v15  ;;  %v2703_v17 = vmul.f32 %v2701_v14, %v2701_v14 }
0x1450   : > { %v2702_v18 = vsub.f32 %v2690_v9, %v2700_v16  ;;  %v2705_v4 = vsel %vm1084_vm2, %v2703_v17, 0.0  ;;  %v3019_v9 = vsel %vm1084_vm2, %v5788_v8, 0 }
0x1451   : > { %2706 = vadd.xlane.f32.xlu0 %v2705_v4 }
0x1452   : > { %v2704_v19 = vmul.f32 %v2702_v18, %v2702_v18 }
0x1454   : > { %v2708_v20 = vsel %vm1084_vm2, %v2704_v19, 0.0 }
0x1455   : > { %2709 = vadd.xlane.f32.xlu0 %v2708_v20 }
0x14da   : > { %v2707_v29 = vpop.xlane.xlu0 %2706 }
0x14db   : > { %v2711_v30 = vmul.f32 0.03125, %v2707_v29 }
0x14dd   : > { %v2713_v31 = vadd.f32 1e-05, %v2711_v30 }
0x14de   : > { %v2710_v33 = vpop.xlane.xlu0 %2709 }
0x14df   : > { %5886 = vrsqrt.f32 %v2713_v31  ;;  %v2712_v57 = vmul.f32 0.03125, %v2710_v33 }
0x14e1   : > { %v2714_v34 = vadd.f32 1e-05, %v2712_v57 }
0x14e3   : > { %5888 = vrsqrt.f32 %v2714_v34 }
0x14ec   : > { %v5887_v35 = vpop.eup %5886 }
0x14ed   : > { %v2717_v36 = vmul.f32 %v5887_v35, %v2701_v14 }
0x14ef   : > { %v2725_v62 = vmul.f32 %v5053_v37, %v2717_v36  ;;  %v5065_v36 = vld [vmem:[%s7036_s22] ss:$0 sm:$0xff]  ;;  %s7038_s22 = smov 96  }
0x14f0   : > { %v5889_v38 = vpop.eup %5888 }
0x14f1   : > { %v2718_v39 = vmul.f32 %v5889_v38, %v2702_v18  ;;  %v2733_v41 = vadd.f32 %v5054_v43, %v2725_v62  ;;  %v5066_v62 = vld [vmem:[%s7037_s27] ss:$0 sm:$0xff]  ;;  %s7045_s27 = smov 40  }
0x14f3   : > { %v2726_v40 = vmul.f32 %v5053_v37, %v2718_v39 }
0x14f5   : > { %v2734_v42 = vadd.f32 %v5054_v43, %v2726_v40 }
0x14f7   : > { %v2744_v45 = vpack.c.bf16 %v2734_v42, %v2733_v41 }
0x14f9   : > { %5507 = vmatmul.mubr.msk.bf16.vlgmr.msra.gmra.mxu1 %vm1084_vm2, %v2744_v45 }
0x14fa   : > { %5536 = vmatprep.mubr.msk.bf16.mxu1 %vm6014_vm1, %v6013_v1 }
0x15b9   : > { %v2820_v48 = vpop.f32.mrf.mxu1 }
0x15ba   : > { %v2821_v50 = vadd.f32 %v5055_v47, %v2820_v48 }
0x15bb   : > { %v5508_v49 = vpop.f32.mrf.mxu1 }
0x15bc   : > { %v2827_v55 = vmax.f32 %v2821_v50, 0.0 }
0x15bd   : > { %v2823_v51 = vpop.f32.mrf.mxu1 }
0x15be   : > { %v2824_v52 = vadd.f32 %v5055_v47, %v2823_v51 }
0x15bf   : > { %v5509_v54 = vpop.f32.mrf.mxu1 }
0x15c0   : > { %v2828_v32 = vmax.f32 %v2824_v52, 0.0 }
0x15c2   : > { %v2834_v56 = vpack.c.bf16 %v2828_v32, %v2827_v55 }
0x15c4   : > { %5515 = vmatmul.mubr.msk.bf16.vlgmr.msra.gmra.mxu0 %vm2851_vm8, %v2834_v56 }
0x15c5   : > { %5530 = vmatprep.mubr.msk.bf16.mxu0 %vm6014_vm1, %v6013_v1  ;;  %5519 = vmatpush3.bf16.xpose.msra.mxu0 %v3019_v9 }
0x15c6   : > { %5520 = vmatprep.subr.bf16.mxu0 %v6013_v1 }
0x15cd   : > { %5521 = vmatpush3.bf16.xpose.msra.mxu0 %v3016_v11 }
0x15ce   : > { %5522 = vmatprep.subr.bf16.mxu0 %v6013_v1 }
0x15d5   : > { %5523 = vmatpush3.bf16.xpose.msra.mxu0 %v3013_v13 }
0x15d6   : > { %5524 = vmatprep.subr.bf16.mxu0 %v6013_v1 }
0x15dd   : > { %5525 = vmatpush3.bf16.xpose.msra.mxu0 %v3010_v22 }
0x15de   : > { %5526 = vmatprep.subr.bf16.mxu0 %v6013_v1 }
0x15e5   : > { %5527 = vmatpush3.bf16.xpose.msra.mxu0 %v3007_v24 }
0x15e6   : > { %5528 = vmatprep.subr.bf16.mxu0 %v6013_v1 }
0x15ed   : > { %5529 = vmatpush3.bf16.xpose.msra.mxu0 %v3004_v27 }
0x15ee   : > { %5570 = vmatprep.subr.bf16.mxu0 %v6013_v1 }
0x1684   : > { %v2895_v59 = vpop.f32.mrf.mxu0 }
0x1685   : > { %v2896_v60 = vadd.f32 %v5061_v58, %v2895_v59  ;;  %v6615_v59 = vld [vmem:[%s7006_s17] sm:$0xff] }
0x1686   : > { %v5516_v53 = vpop.f32.mrf.mxu0 }
0x1687   : > { %v2902_v61 = vadd.f32 %v2896_v60, %v2733_v41 }
0x1688   : > { %v2898_v63 = vpop.f32.mrf.mxu0 }
0x1689   : > { %v2899_v0 = vadd.f32 %v5061_v58, %v2898_v63  ;;  %v2906_v2 = vsel %vm1084_vm2, %v2902_v61, 0.0 }
0x168a   : > { %2907 = vadd.xlane.f32.xlu1 %v2906_v2  ;;  %v5517_v5 = vpop.f32.mrf.mxu0  ;;  %v6620_v2 = vld [vmem:[%s7006_s17 + $0x8] sm:$0xff]  ;;  %s7042_s17 = smov 80  }
0x168b   : > { %v2903_v6 = vadd.f32 %v2899_v0, %v2734_v42 }
0x168d   : > { %v2909_v7 = vsel %vm1084_vm2, %v2903_v6, 0.0 }
0x168e   : > { %2910 = vadd.xlane.f32.xlu0 %v2909_v7 }
0x1713   : > { %v2908_v3 = vpop.xlane.xlu1 %2907 }
0x1714   : > { %v2912_v14 = vmul.f32 0.03125, %v2908_v3 }
0x1716   : > { %v2914_v15 = vsub.f32 %v2902_v61, %v2912_v14 }
0x1717   : > { %v2911_v16 = vpop.xlane.xlu0 %2910 }
0x1718   : > { %v2913_v17 = vmul.f32 0.03125, %v2911_v16  ;;  %v2916_v18 = vmul.f32 %v2914_v15, %v2914_v15 }
0x171a   : > { %v2915_v4 = vsub.f32 %v2903_v6, %v2913_v17  ;;  %v2918_v19 = vsel %vm1084_vm2, %v2916_v18, 0.0 }
0x171b   : > { %2919 = vadd.xlane.f32.xlu1 %v2918_v19 }
0x171c   : > { %v2917_v20 = vmul.f32 %v2915_v4, %v2915_v4 }
0x171e   : > { %v2921_v21 = vsel %vm1084_vm2, %v2917_v20, 0.0 }
0x171f   : > { %2922 = vadd.xlane.f32.xlu0 %v2921_v21 }
0x17a4   : > { %v2920_v28 = vpop.xlane.xlu1 %2919 }
0x17a5   : > { %v2924_v29 = vmul.f32 0.03125, %v2920_v28 }
0x17a7   : > { %v2926_v30 = vadd.f32 1e-05, %v2924_v29 }
0x17a8   : > { %v2923_v31 = vpop.xlane.xlu0 %2922 }
0x17a9   : > { %5890 = vrsqrt.f32 %v2926_v30  ;;  %v2925_v33 = vmul.f32 0.03125, %v2923_v31 }
0x17ab   : > { %v2927_v57 = vadd.f32 1e-05, %v2925_v33 }
0x17ad   : > { %5892 = vrsqrt.f32 %v2927_v57 }
0x17b6   : > { %v5891_v34 = vpop.eup %5890 }
0x17b7   : > { %v2930_v35 = vmul.f32 %v5891_v34, %v2914_v15 }
0x17b9   : > { %v2938_v39 = vmul.f32 %v5065_v36, %v2930_v35 }
0x17ba   : > { %v5893_v37 = vpop.eup %5892 }
0x17bb   : > { %v2931_v38 = vmul.f32 %v5893_v37, %v2915_v4  ;;  %v6589_v40 = vadd.f32 %v5066_v62, %v2938_v39 }
0x17bd   : > { %v2939_v43 = vmul.f32 %v5065_v36, %v2931_v38 }
0x17bf   : > { %v6591_v41 = vadd.f32 %v5066_v62, %v2939_v43 }
0x17c1   : > { %v2963_v42 = vpack.c.bf16 %v6591_v41, %v6589_v40 }
0x17c3   : > { %5531 = vmatmul.mubr.msk.bf16.vlgmr.msra.gmra.mxu0 %vm1084_vm2, %v2963_v42 }
0x17c4   : > { %5572 = vmatprep.mubr.msk.bf16.mxu0 %vm6014_vm1, %v6013_v1 }
0x1883   : > { %v3055_v45 = vpop.f32.mrf.mxu0 }
0x1884   : > { %v3056_v48 = vadd.f32 %v5080_v44, %v3055_v45 }
0x1885   : > { %v5532_v46 = vpop.f32.mrf.mxu0 }
0x1887   : > { %v3058_v47 = vpop.f32.mrf.mxu0 }
0x1888   : > { %v3059_v49 = vadd.f32 %v5080_v44, %v3058_v47 }
0x1889   : > { %v5533_v50 = vpop.f32.mrf.mxu0 }
0x188a   : > { %v6599_v51 = vpack.c.bf16 %v3059_v49, %v3056_v48 }
0x188c   : > { %3064 = vrot.lane.b32.xlu1 %v6599_v51, %s7038_s22 }
0x1890   : > { %3140 = vrot.lane.b32.xlu1 %v6599_v51, %s7039_s14  ;;  %s7041_s14 = smov 56  }
0x1894   : > { %3189 = vrot.lane.b32.xlu1 %v6599_v51, %s7040_s21 }
0x18fe   : > { %v3065_v52 = vpop.permute.xlu1 %3064 }
0x18ff   : > { %v3070_v54 = vsel %vm1255_vm3, %v3065_v52, 0 }
0x1900   : > { %5535 = vmatpush3.bf16.xpose.msra.mxu1 %v3070_v54 }
0x1901   : > { %5540 = vmatprep.subr.bf16.mxu1 %v6013_v1 }
0x1902   : > { %v3141_v55 = vpop.permute.xlu1 %3140 }
0x1906   : > { %v3190_v23 = vpop.permute.xlu1 %3189 }
0x1907   : > { %5537 = vmatmul.mubr.msk.bf16.vlgmr.msra.gmra.mxu1 %vm1255_vm3, %v6599_v51 }
0x1908   : > { %5541 = vmatpush3.bf16.msra.mxu1 %v3141_v55  ;;  %5542 = vmatprep.mubr.msk.bf16.mxu1 %vm6014_vm1, %v6013_v1 }
0x1909   : > { %5546 = vmatprep.subr.bf16.mxu1 %v6013_v1 }
0x19c7   : > { %v3106_v32 = vpop.f32.mrf.mxu1 }
0x19c8   : > { %v3113_v56 = vmul.f32 0.35355338, %v3106_v32 }
0x19c9   : > { %v5538_v58 = vpop.f32.mrf.mxu1 }
0x19ca   : > { %v3115_v60 = vadd.f32 %v6615_v59, %v3113_v56 }
0x19cb   : > { %v3109_v53 = vpop.f32.mrf.mxu1 }
0x19cc   : > { %v3114_v61 = vmul.f32 0.35355338, %v3109_v53  ;;  %v3117_v63 = vsel %vm1307_vm4, %v3115_v60, -inf }
0x19cd   : > { %3118 = vmax.xlane.f32.xlu0 %v3117_v63  ;;  %v5539_v0 = vpop.f32.mrf.mxu1 }
0x19ce   : > { %v3116_v5 = vadd.f32 %v6620_v2, %v3114_v61 }
0x19d0   : > { %v3120_v6 = vsel %vm1307_vm4, %v3116_v5, -inf }
0x19d1   : > { %3121 = vmax.xlane.f32.xlu0 %v3120_v6 }
0x1a56   : > { %v3119_v7 = vpop.xlane.xlu0 %3118 }
0x1a57   : > { %v3123_v8 = vsub.f32 %v3115_v60, %v3119_v7 }
0x1a59   : > { %v3125_v9 = vmul.f32 1.442695, %v3123_v8 }
0x1a5a   : > { %v3122_v10 = vpop.xlane.xlu0 %3121 }
0x1a5b   : > { %5894 = vpow2.f32 %v3125_v9  ;;  %v3124_v11 = vsub.f32 %v3116_v5, %v3122_v10 }
0x1a5d   : > { %v3127_v12 = vmul.f32 1.442695, %v3124_v11 }
0x1a5f   : > { %5896 = vpow2.f32 %v3127_v12 }
0x1a68   : > { %v5895_v13 = vpop.eup %5894 }
0x1a69   : > { %v3129_v3 = vsel %vm1307_vm4, %v5895_v13, 0.0 }
0x1a6a   : > { %3130 = vadd.xlane.f32.xlu0 %v3129_v3 }
0x1a6c   : > { %v5897_v14 = vpop.eup %5896 }
0x1a6d   : > { %v3132_v15 = vsel %vm1307_vm4, %v5897_v14, 0.0 }
0x1a6e   : > { %3133 = vadd.xlane.f32.xlu0 %v3132_v15 }
0x1a84   : > { %3191 = vrot.lane.b32.xlu0 %v6599_v51, %s7023_s18 }
0x1af3   : > { %v3131_v16 = vpop.xlane.xlu0 %3130 }
0x1af4   : > { %5898 = vrcp.f32 %v3131_v16 }
0x1af7   : > { %v3134_v17 = vpop.xlane.xlu0 %3133 }
0x1af8   : > { %5900 = vrcp.f32 %v3134_v17 }
0x1afb   : > { %v3192_v21 = vpop.permute.xlu0 %3191 }
0x1afc   : > { %v3197_v22 = vsel %vm1255_vm3, %v3192_v21, 0 }
0x1b01   : > { %v5899_v18 = vpop.eup %5898 }
0x1b02   : > { %v3137_v19 = vmul.f32 %v5899_v18, %v5895_v13 }
0x1b05   : > { %v5901_v4 = vpop.eup %5900 }
0x1b06   : > { %v3138_v20 = vmul.f32 %v5901_v4, %v5897_v14 }
0x1b08   : > { %v3139_v25 = vpack.c.bf16 %v3138_v20, %v3137_v19 }
0x1b0a   : > { %5543 = vmatmul.mubr.msk.bf16.vlgmr.msra.gmra.mxu1 %vm1307_vm4, %v3139_v25 }
0x1b0b   : > { %5547 = vmatpush3.bf16.xpose.msra.mxu1 %v3197_v22  ;;  %5548 = vmatprep.mubr.msk.bf16.mxu1 %vm6014_vm1, %v6013_v1 }
0x1b0c   : > { %5552 = vmatprep.subr.bf16.mxu1 %v6013_v1 }
0x1b12   : > { %5549 = vmatmul.mubr.msk.bf16.vlgmr.msra.gmra.mxu1 %vm1255_vm3, %v3190_v23 }
0x1b13   : > { %5554 = vmatprep.mubr.msk.bf16.mxu1 %vm6014_vm1, %v6013_v1 }
0x1bca   : > { %v3180_v24 = vpop.f32.mrf.mxu1 }
0x1bcb   : > { %3187 = vst.msk [vmem:[#allocation2] sm:$0xff] %vm1255_vm3, %v3180_v24 }
0x1bcc   : > { %v5544_v26 = vpop.f32.mrf.mxu1 }
0x1bce   : > { %v3183_v27 = vpop.f32.mrf.mxu1 }
0x1bcf   : > { %3188 = vst.msk [vmem:[#allocation2 + $0x8] sm:$0xff] %vm1255_vm3, %v3183_v27 }
0x1bd0   : > { %v5545_v28 = vpop.f32.mrf.mxu1 }
0x1bd2   : > { %v3233_v29 = vpop.f32.mrf.mxu1 }
0x1bd3   : > { %v3240_v30 = vmul.f32 0.35355338, %v3233_v29 }
0x1bd4   : > { %v5550_v31 = vpop.f32.mrf.mxu1 }
0x1bd5   : > { %v3242_v33 = vadd.f32 %v6615_v59, %v3240_v30 }
0x1bd6   : > { %v3236_v57 = vpop.f32.mrf.mxu1 }
0x1bd7   : > { %v3241_v34 = vmul.f32 0.35355338, %v3236_v57  ;;  %v3244_v35 = vsel %vm1307_vm4, %v3242_v33, -inf }
0x1bd8   : > { %3245 = vmax.xlane.f32.xlu1 %v3244_v35  ;;  %v5551_v36 = vpop.f32.mrf.mxu1 }
0x1bd9   : > { %v3243_v37 = vadd.f32 %v6620_v2, %v3241_v34 }
0x1bdb   : > { %v3247_v38 = vsel %vm1307_vm4, %v3243_v37, -inf }
0x1bdc   : > { %3248 = vmax.xlane.f32.xlu0 %v3247_v38 }
0x1be9   : > { %3267 = vrot.lane.b32.xlu1 %v6599_v51, %s7041_s14  ;;  %s7044_s14 = smov 112  }
0x1bf2   : > { %3326 = vrot.lane.b32.xlu0 %v6599_v51, %s7042_s17 }
0x1bf6   : > { %3459 = vrot.lane.b32.xlu0 %v6599_v51, %s7043_s19 }
0x1c61   : > { %v3246_v39 = vpop.xlane.xlu1 %3245 }
0x1c62   : > { %v3250_v62 = vsub.f32 %v3242_v33, %v3246_v39 }
0x1c64   : > { %v3252_v43 = vmul.f32 1.442695, %v3250_v62 }
0x1c65   : > { %v3268_v42 = vpop.permute.xlu1 %3267  ;;  %v3249_v45 = vpop.xlane.xlu0 %3248 }
0x1c66   : > { %5902 = vpow2.f32 %v3252_v43  ;;  %v3251_v44 = vsub.f32 %v3243_v37, %v3249_v45  ;;  %5553 = vmatpush3.bf16.msra.mxu1 %v3268_v42 }
0x1c67   : > { %5558 = vmatprep.subr.bf16.mxu1 %v6013_v1 }
0x1c68   : > { %v3254_v46 = vmul.f32 1.442695, %v3251_v44 }
0x1c69   : > { %v3327_v58 = vpop.permute.xlu0 %3326 }
0x1c6a   : > { %5904 = vpow2.f32 %v3254_v46  ;;  %v3332_v6 = vsel %vm1255_vm3, %v3327_v58, 0 }
0x1c6d   : > { %v3460_v0 = vpop.permute.xlu0 %3459 }
0x1c73   : > { %v5903_v47 = vpop.eup %5902 }
0x1c74   : > { %v3256_v48 = vsel %vm1307_vm4, %v5903_v47, 0.0 }
0x1c75   : > { %3257 = vadd.xlane.f32.xlu1 %v3256_v48 }
0x1c77   : > { %v5905_v49 = vpop.eup %5904 }
0x1c78   : > { %v3259_v50 = vsel %vm1307_vm4, %v5905_v49, 0.0 }
0x1c79   : > { %3260 = vadd.xlane.f32.xlu1 %v3259_v50 }
0x1c8a   : > { %3324 = vrot.lane.b32.xlu1 %v6599_v51, %s7044_s14 }
0x1c8e   : > { %3461 = vrot.lane.b32.xlu1 %v6599_v51, %s7022_s16 }
0x1cfe   : > { %v3258_v52 = vpop.xlane.xlu1 %3257 }
0x1cff   : > { %5906 = vrcp.f32 %v3258_v52 }
0x1d02   : > { %v3261_v54 = vpop.xlane.xlu1 %3260 }
0x1d03   : > { %5908 = vrcp.f32 %v3261_v54 }
0x1d06   : > { %v3325_v55 = vpop.permute.xlu1 %3324 }
0x1d0a   : > { %v3462_v32 = vpop.permute.xlu1 %3461 }
0x1d0b   : > { %v3467_v56 = vsel %vm1255_vm3, %v3462_v32, 0 }
0x1d0c   : > { %5571 = vmatpush3.bf16.xpose.msra.mxu0 %v3467_v56  ;;  %v5907_v60 = vpop.eup %5906 }
0x1d0d   : > { %5582 = vmatprep.subr.bf16.mxu0 %v6013_v1  ;;  %v3264_v61 = vmul.f32 %v5907_v60, %v5903_v47 }
0x1d10   : > { %v5909_v53 = vpop.eup %5908 }
0x1d11   : > { %v3265_v63 = vmul.f32 %v5909_v53, %v5905_v49 }
0x1d13   : > { %5573 = vmatmul.mubr.msk.bf16.vlgmr.msra.gmra.mxu0 %vm1255_vm3, %v3460_v0  ;;  %v3266_v5 = vpack.c.bf16 %v3265_v63, %v3264_v61 }
0x1d14   : > { %5586 = vmatprep.mubr.msk.bf16.mxu0 %vm6014_vm1, %v6013_v1 }
0x1d15   : > { %5555 = vmatmul.mubr.msk.bf16.vlgmr.msra.gmra.mxu1 %vm1307_vm4, %v3266_v5 }
0x1d16   : > { %5559 = vmatpush3.bf16.xpose.msra.mxu1 %v3332_v6  ;;  %5560 = vmatprep.mubr.msk.bf16.mxu1 %vm6014_vm1, %v6013_v1 }
0x1d17   : > { %5564 = vmatprep.subr.bf16.mxu1 %v6013_v1 }
0x1d1d   : > { %5561 = vmatmul.mubr.msk.bf16.vlgmr.msra.gmra.mxu1 %vm1255_vm3, %v3325_v55 }
0x1d1e   : > { %5566 = vmatprep.mubr.msk.bf16.mxu1 %vm6014_vm1, %v6013_v1 }
0x1dd3   : > { %v3503_v7 = vpop.f32.mrf.mxu0 }
0x1dd4   : > { %v3510_v19 = vmul.f32 0.35355338, %v3503_v7 }
0x1dd5   : > { %v3307_v8 = vpop.f32.mrf.mxu1  ;;  %v5574_v9 = vpop.f32.mrf.mxu0 }
0x1dd6   : > { %v3512_v24 = vadd.f32 %v6615_v59, %v3510_v19 }
0x1dd7   : > { %v5556_v10 = vpop.f32.mrf.mxu1  ;;  %v3506_v11 = vpop.f32.mrf.mxu0 }
0x1dd8   : > { %v3511_v15 = vmul.f32 0.35355338, %v3506_v11  ;;  %v3514_v28 = vsel %vm1307_vm4, %v3512_v24, -inf  ;;  %v5795_v11 = vld [vmem:[%s6092_s24 + $0x10] sm:$0xff]  }
0x1dd9   : > { %v3310_v12 = vpop.f32.mrf.mxu1  ;;  %v5575_v13 = vpop.f32.mrf.mxu0 }
0x1dda   : > { %v3513_v25 = vadd.f32 %v6620_v2, %v3511_v15  ;;  %v3624_v13 = vsel %vm1084_vm2, %v5795_v11, 0 }
0x1ddb   : > { %v5557_v3 = vpop.f32.mrf.mxu1 }
0x1ddc   : > { %v3517_v26 = vsel %vm1307_vm4, %v3513_v25, -inf }
0x1ddd   : > { %v3368_v14 = vpop.f32.mrf.mxu1 }
0x1dde   : > { %v3375_v16 = vmul.f32 0.35355338, %v3368_v14 }
0x1ddf   : > { %v5562_v17 = vpop.f32.mrf.mxu1 }
0x1de0   : > { %v3377_v18 = vadd.f32 %v6615_v59, %v3375_v16 }
0x1de1   : > { %v3371_v4 = vpop.f32.mrf.mxu1 }
0x1de2   : > { %v3376_v20 = vmul.f32 0.35355338, %v3371_v4  ;;  %v3379_v21 = vsel %vm1307_vm4, %v3377_v18, -inf }
0x1de3   : > { %3380 = vmax.xlane.f32.xlu1 %v3379_v21  ;;  %v5563_v22 = vpop.f32.mrf.mxu1 }
0x1de4   : > { %v3378_v23 = vadd.f32 %v6620_v2, %v3376_v20 }
0x1de6   : > { %v3382_v27 = vsel %vm1307_vm4, %v3378_v23, -inf }
0x1de7   : > { %3518 = vmax.xlane.f32.xlu1 %v3517_v26  ;;  %3383 = vmax.xlane.f32.xlu0 %v3382_v27 }
0x1deb   : > { %3515 = vmax.xlane.f32.xlu0 %v3514_v28 }
0x1e6c   : > { %v3381_v29 = vpop.xlane.xlu1 %3380 }
0x1e6d   : > { %v3385_v34 = vsub.f32 %v3377_v18, %v3381_v29 }
0x1e6f   : > { %v3387_v37 = vmul.f32 1.442695, %v3385_v34 }
0x1e70   : > { %v3519_v30 = vpop.xlane.xlu1 %3518  ;;  %v3384_v31 = vpop.xlane.xlu0 %3383 }
0x1e71   : > { %v3521_v33 = vsub.f32 %v3513_v25, %v3519_v30  ;;  %v3386_v57 = vsub.f32 %v3378_v23, %v3384_v31 }
0x1e73   : > { %v3524_v35 = vmul.f32 1.442695, %v3521_v33  ;;  %v3389_v36 = vmul.f32 1.442695, %v3386_v57 }
0x1e74   : > { %v3516_v2 = vpop.xlane.xlu0 %3515 }
0x1e75   : > { %5910 = vpow2.f32 %v3524_v35  ;;  %v3520_v59 = vsub.f32 %v3512_v24, %v3516_v2  ;;  %v5101_v24 = vld [vmem:[%s6097_s30 + $0x1] ss:$0 sm:$0xff] }
0x1e76   : > { %5912 = vpow2.f32 %v3389_v36  ;;  %v5796_v36 = vld [vmem:[%s7018_s0 + $0x38] sm:$0xff]  }
0x1e77   : > { %v3522_v38 = vmul.f32 1.442695, %v3520_v59  ;;  %v3839_v2 = vsel %vm1084_vm2, %v5796_v36, 0  ;;  %v5797_v59 = vld [vmem:[%s7018_s0 + $0x30] sm:$0xff]  }
0x1e79   : > { %5914 = vpow2.f32 %v3522_v38 }
0x1e7a   : > { %5916 = vpow2.f32 %v3387_v37 }
0x1e82   : > { %v5911_v39 = vpop.eup %5910 }
0x1e83   : > { %v3529_v62 = vsel %vm1307_vm4, %v5911_v39, 0.0  ;;  %v5913_v43 = vpop.eup %5912 }
0x1e84   : > { %3530 = vadd.xlane.f32.xlu1 %v3529_v62  ;;  %v3394_v45 = vsel %vm1307_vm4, %v5913_v43, 0.0 }
0x1e86   : > { %v5915_v42 = vpop.eup %5914 }
0x1e87   : > { %v3526_v44 = vsel %vm1307_vm4, %v5915_v42, 0.0  ;;  %v5917_v46 = vpop.eup %5916 }
0x1e88   : > { %3395 = vadd.xlane.f32.xlu1 %v3394_v45  ;;  %3527 = vadd.xlane.f32.xlu0 %v3526_v44  ;;  %v3391_v47 = vsel %vm1307_vm4, %v5917_v46, 0.0 }
0x1e8c   : > { %3392 = vadd.xlane.f32.xlu0 %v3391_v47  ;;  %v5798_v47 = vld [vmem:[%s7018_s0 + $0x28] sm:$0xff]  }
0x1e99   : > { %3537 = vrot.lane.b32.xlu1 %v6599_v51, %s7045_s27  ;;  %s7051_s27 = sld [smem:[#allocation29_spill]] }
0x1e9d   : > { %3316 = vrot.lane.b32.xlu1 %v3307_v8, %s7025_s7  ;;  %v5794_v8 = vld [vmem:[%s6092_s24 + $0x18] sm:$0xff]  }
0x1e9e   : > { %v3627_v9 = vsel %vm1084_vm2, %v5794_v8, 0 }
0x1e9f   : > { %5583 = vmatpush3.bf16.xpose.msra.mxu0 %v3627_v9 }
0x1ea0   : > { %5584 = vmatprep.subr.bf16.mxu0 %v6013_v1 }
0x1ea2   : > { %3402 = vrot.lane.b32.xlu0 %v6599_v51, %s7046_s23 }
0x1ea6   : > { %3318 = vrot.lane.b32.xlu0 %v3310_v12, %s7025_s7 }
0x1ea7   : > { %5585 = vmatpush3.bf16.xpose.msra.mxu0 %v3624_v13 }
0x1ea8   : > { %5598 = vmatprep.subr.bf16.mxu0 %v6013_v1 }
0x1f0d   : > { %v3531_v48 = vpop.xlane.xlu1 %3530 }
0x1f11   : > { %v3396_v49 = vpop.xlane.xlu1 %3395  ;;  %v3528_v50 = vpop.xlane.xlu0 %3527 }
0x1f12   : > { %5918 = vrcp.f32 %v3396_v49  ;;  %v5799_v49 = vld [vmem:[%s7018_s0 + $0x20] sm:$0xff]  }
0x1f15   : > { %v3538_v52 = vpop.permute.xlu1 %3537  ;;  %v3393_v54 = vpop.xlane.xlu0 %3392 }
0x1f16   : > { %5920 = vrcp.f32 %v3393_v54 }
0x1f17   : > { %5922 = vrcp.f32 %v3528_v50  ;;  %v3830_v50 = vsel %vm1084_vm2, %v5799_v49, 0 }
0x1f18   : > { %5924 = vrcp.f32 %v3531_v48  ;;  %v3833_v48 = vsel %vm1084_vm2, %v5798_v47, 0 }
0x1f19   : > { %v3317_v55 = vpop.permute.xlu1 %3316  ;;  %v3403_v32 = vpop.permute.xlu0 %3402 }
0x1f1a   : > { %3322 = vst.msk [vmem:[#allocation2] sm:$0xff] %vm1513_vm5, %v3317_v55  ;;  %5565 = vmatpush3.bf16.msra.mxu1 %v3403_v32  ;;  %v5972_v55 = vld [vmem:[%s6393_s26] sm:$0xff]   ;;  %v5801_v32 = vld [vmem:[%s6102_s6 + $0x10] sm:$0xff]  }
0x1f1b   : > { %5576 = vmatprep.subr.bf16.mxu1 %v6013_v1 }
0x1f1d   : > { %v3319_v56 = vpop.permute.xlu0 %3318 }
0x1f1e   : > { %3323 = vst.msk [vmem:[#allocation2 + $0x8] sm:$0xff] %vm1513_vm5, %v3319_v56  ;;  %v3746_v56 = vsel %vm1084_vm2, %v5801_v32, 0 }
0x1f1f   : > { %v5919_v51 = vpop.eup %5918 }
0x1f20   : > { %v3400_v53 = vmul.f32 %v5919_v51, %v5913_v43 }
0x1f23   : > { %v5921_v58 = vpop.eup %5920 }
0x1f24   : > { %v3399_v60 = vmul.f32 %v5921_v58, %v5917_v46  ;;  %v5923_v63 = vpop.eup %5922 }
0x1f25   : > { %v5925_v0 = vpop.eup %5924  ;;  %v3534_v5 = vmul.f32 %v5923_v63, %v5915_v42 }
0x1f26   : > { %v3401_v61 = vpack.c.bf16 %v3400_v53, %v3399_v60  ;;  %v3535_v6 = vmul.f32 %v5925_v0, %v5911_v39 }
0x1f28   : > { %5567 = vmatmul.mubr.msk.bf16.vlgmr.msra.gmra.mxu1 %vm1307_vm4, %v3401_v61  ;;  %v3536_v7 = vpack.c.bf16 %v3535_v6, %v3534_v5  ;;  %v5107_v6 = vld [vmem:[%s6152_s12 + $0x1] ss:$0 sm:$0xff] }
0x1f29   : > { %5577 = vmatpush3.bf16.msra.mxu1 %v3538_v52  ;;  %5578 = vmatprep.mubr.msk.bf16.mxu1 %vm6014_vm1, %v6013_v1  ;;  %v5800_v52 = vld [vmem:[%s6102_s6 + $0x18] sm:$0xff]  }
0x1f2a   : > { %5590 = vmatprep.subr.bf16.mxu1 %v6013_v1  ;;  %v3749_v54 = vsel %vm1084_vm2, %v5800_v52, 0 }
0x1f30   : > { %5579 = vmatmul.mubr.msk.bf16.vlgmr.msra.gmra.mxu1 %vm1307_vm4, %v3536_v7 }
0x1f31   : > { %5594 = vmatprep.mubr.msk.bf16.mxu1 %vm6014_vm1, %v6013_v1  ;;  %5591 = vmatpush3.bf16.xpose.msra.mxu1 %v3749_v54 }
0x1f32   : > { %5592 = vmatprep.subr.bf16.mxu1 %v6013_v1 }
0x1f39   : > { %5593 = vmatpush3.bf16.xpose.msra.mxu1 %v3746_v56 }
0x1f3a   : > { %5610 = vmatprep.subr.bf16.mxu1 %v6013_v1 }
0x1fe8   : > { %v3442_v10 = vpop.f32.mrf.mxu1 }
0x1fe9   : > { %3451 = vrot.lane.b32.xlu1 %v3442_v10, %s7026_s28  ;;  %v5108_v10 = vld [vmem:[%s7017_s11 + $0x1] ss:$0 sm:$0xff] }
0x1fea   : > { %v5568_v12 = vpop.f32.mrf.mxu1 }
0x1fec   : > { %v3445_v3 = vpop.f32.mrf.mxu1 }
0x1fed   : > { %3453 = vrot.lane.b32.xlu0 %v3445_v3, %s7026_s28 }
0x1fee   : > { %v5569_v14 = vpop.f32.mrf.mxu1 }
0x1fef   : > { %v5127_v14 = vld [vmem:[%s7019_s1 + $0x1] ss:$0 sm:$0xff] }
0x1ff0   : > { %v3577_v15 = vpop.f32.mrf.mxu1 }
0x1ff1   : > { %3586 = vrot.lane.b32.xlu1 %v3577_v15, %s7027_s3 }
0x1ff2   : > { %v5580_v16 = vpop.f32.mrf.mxu1 }
0x1ff4   : > { %v3580_v17 = vpop.f32.mrf.mxu1 }
0x1ff5   : > { %3588 = vrot.lane.b32.xlu0 %v3580_v17, %s7027_s3 }
0x1ff6   : > { %v5581_v18 = vpop.f32.mrf.mxu1 }
0x205b   : > { %v3452_v4 = vpop.permute.xlu1 %3451 }
0x205c   : > { %3457 = vst.msk [vmem:[#allocation2] sm:$0xff] %vm1649_vm6, %v3452_v4 }
0x205f   : > { %v3454_v19 = vpop.permute.xlu0 %3453 }
0x2060   : > { %3458 = vst.msk [vmem:[#allocation2 + $0x8] sm:$0xff] %vm1649_vm6, %v3454_v19 }
0x2063   : > { %v3587_v20 = vpop.permute.xlu1 %3586 }
0x2064   : > { %3592 = vst.msk [vmem:[#allocation2] sm:$0xff] %vm1785_vm7, %v3587_v20 }
0x2067   : > { %v3589_v21 = vpop.permute.xlu0 %3588 }
0x2068   : > { %3593 = vst.msk [vmem:[#allocation2 + $0x8] sm:$0xff] %vm1785_vm7, %v3589_v21 }
0x206b   : > { %v3594_v25 = vld [vmem:[#allocation2] sm:$0xff] }
0x206f   : > { %v3595_v22 = vld [vmem:[#allocation2 + $0x8] sm:$0xff] }
0x2070   : > { %v3603_v23 = vpack.c.bf16 %v3595_v22, %v3594_v25  ;;  %v5114_v22 = vld [vmem:[%s7020_s2 + $0x1] ss:$0 sm:$0xff] }
0x2072   : > { %5587 = vmatmul.mubr.msk.bf16.vlgmr.msra.gmra.mxu0 %vm1084_vm2, %v3603_v23 }
0x2073   : > { %5606 = vmatprep.mubr.msk.bf16.mxu0 %vm6014_vm1, %v6013_v1  ;;  %5599 = vmatpush3.bf16.xpose.msra.mxu0 %v3839_v2 }
0x2074   : > { %5600 = vmatprep.subr.bf16.mxu0 %v6013_v1 }
0x2132   : > { %v3663_v26 = vpop.f32.mrf.mxu0 }
0x2133   : > { %v3664_v27 = vadd.f32 %v5101_v24, %v3663_v26 }
0x2134   : > { %v5588_v28 = vpop.f32.mrf.mxu0 }
0x2135   : > { %v3670_v29 = vadd.f32 %v3664_v27, %v6589_v40  ;;  %v3836_v40 = vsel %vm1084_vm2, %v5797_v59, 0 }
0x2136   : > { %v3666_v30 = vpop.f32.mrf.mxu0  ;;  %5601 = vmatpush3.bf16.xpose.msra.mxu0 %v3836_v40 }
0x2137   : > { %v3667_v31 = vadd.f32 %v5101_v24, %v3666_v30  ;;  %v3676_v33 = vsel %vm1084_vm2, %v3670_v29, 0.0  ;;  %5602 = vmatprep.subr.bf16.mxu0 %v6013_v1 }
0x2138   : > { %3677 = vadd.xlane.f32.xlu1 %v3676_v33  ;;  %v5589_v57 = vpop.f32.mrf.mxu0 }
0x2139   : > { %v3671_v34 = vadd.f32 %v3667_v31, %v6591_v41  ;;  %v6764_v57 = vld [vmem:[%s7021_s10] ss:$0 sm:$0xff] }
0x213b   : > { %v3679_v35 = vsel %vm1084_vm2, %v3671_v34, 0.0 }
0x213c   : > { %3680 = vadd.xlane.f32.xlu0 %v3679_v35 }
0x213e   : > { %5603 = vmatpush3.bf16.xpose.msra.mxu0 %v3833_v48 }
0x213f   : > { %5604 = vmatprep.subr.bf16.mxu0 %v6013_v1 }
0x2146   : > { %5605 = vmatpush3.bf16.xpose.msra.mxu0 %v3830_v50 }
0x2147   : > { %5634 = vmatprep.subr.bf16.mxu0 %v6013_v1 }
0x214d   : > { %5607 = vmatmul.mubr.msk.bf16.vlgmr.msra.gmra.mxu0 %vm1084_vm2, %v5972_v55 }
0x214e   : > { %5636 = vmatprep.mubr.msk.bf16.mxu0 %vm6014_vm1, %v6013_v1 }
0x21c1   : > { %v3678_v37 = vpop.xlane.xlu1 %3677 }
0x21c2   : > { %v3682_v38 = vmul.f32 0.03125, %v3678_v37 }
0x21c4   : > { %v3684_v41 = vsub.f32 %v3670_v29, %v3682_v38 }
0x21c5   : > { %v3681_v39 = vpop.xlane.xlu0 %3680 }
0x21c6   : > { %v3683_v62 = vmul.f32 0.03125, %v3681_v39  ;;  %v3686_v43 = vmul.f32 %v3684_v41, %v3684_v41 }
0x21c8   : > { %v3685_v42 = vsub.f32 %v3671_v34, %v3683_v62  ;;  %v3688_v45 = vsel %vm1084_vm2, %v3686_v43, 0.0 }
0x21c9   : > { %3689 = vadd.xlane.f32.xlu0 %v3688_v45 }
0x21ca   : > { %v3687_v44 = vmul.f32 %v3685_v42, %v3685_v42 }
0x21cc   : > { %v3691_v46 = vsel %vm1084_vm2, %v3687_v44, 0.0 }
0x21cd   : > { %3692 = vadd.xlane.f32.xlu1 %v3691_v46 }
0x220d   : > { %v3875_v15 = vpop.f32.mrf.mxu0 }
0x220e   : > { %v3876_v17 = vadd.f32 %v5127_v14, %v3875_v15 }
0x220f   : > { %v5608_v16 = vpop.f32.mrf.mxu0 }
0x2211   : > { %v3878_v18 = vpop.f32.mrf.mxu0 }
0x2212   : > { %v3879_v4 = vadd.f32 %v5127_v14, %v3878_v18 }
0x2213   : > { %v5609_v19 = vpop.f32.mrf.mxu0 }
0x2214   : > { %v6754_v20 = vpack.c.bf16 %v3879_v4, %v3876_v17 }
0x2216   : > { %v3888_v21 = vsel %vm1255_vm3, %v6754_v20, 0 }
0x2252   : > { %v3690_v51 = vpop.xlane.xlu0 %3689 }
0x2253   : > { %v3694_v58 = vmul.f32 0.03125, %v3690_v51 }
0x2255   : > { %v3696_v60 = vadd.f32 1e-05, %v3694_v58 }
0x2256   : > { %v3693_v53 = vpop.xlane.xlu1 %3692 }
0x2257   : > { %5926 = vrsqrt.f32 %v3696_v60  ;;  %v3695_v61 = vmul.f32 0.03125, %v3693_v53 }
0x2259   : > { %v3697_v63 = vadd.f32 1e-05, %v3695_v61 }
0x225b   : > { %5928 = vrsqrt.f32 %v3697_v63 }
0x2264   : > { %v5927_v0 = vpop.eup %5926 }
0x2265   : > { %v3700_v5 = vmul.f32 %v5927_v0, %v3684_v41 }
0x2267   : > { %v3708_v9 = vmul.f32 %v5107_v6, %v3700_v5 }
0x2268   : > { %v5929_v7 = vpop.eup %5928 }
0x2269   : > { %v3701_v8 = vmul.f32 %v5929_v7, %v3685_v42  ;;  %v6744_v12 = vadd.f32 %v5108_v10, %v3708_v9 }
0x226b   : > { %v3709_v11 = vmul.f32 %v5107_v6, %v3701_v8 }
0x226d   : > { %v6746_v13 = vadd.f32 %v5108_v10, %v3709_v11 }
0x226f   : > { %v3725_v3 = vpack.c.bf16 %v6746_v13, %v6744_v12 }
0x2271   : > { %5595 = vmatmul.mubr.msk.bf16.vlgmr.msra.gmra.mxu1 %vm1084_vm2, %v3725_v3 }
0x2272   : > { %5612 = vmatprep.mubr.msk.bf16.mxu1 %vm6014_vm1, %v6013_v1  ;;  %5611 = vmatpush3.bf16.xpose.msra.mxu1 %v3888_v21 }
0x2273   : > { %5616 = vmatprep.subr.bf16.mxu1 %v6013_v1 }
0x2331   : > { %v3785_v25 = vpop.f32.mrf.mxu1 }
0x2332   : > { %v3786_v26 = vadd.f32 %v5114_v22, %v3785_v25 }
0x2333   : > { %v5596_v23 = vpop.f32.mrf.mxu1 }
0x2335   : > { %v3788_v24 = vpop.f32.mrf.mxu1 }
0x2336   : > { %v3789_v27 = vadd.f32 %v5114_v22, %v3788_v24 }
0x2337   : > { %v5597_v28 = vpop.f32.mrf.mxu1 }
0x2338   : > { %v3882_v29 = vpack.c.bf16 %v3789_v27, %v3786_v26 }
0x233a   : > { %5613 = vmatmul.mubr.msk.bf16.vlgmr.msra.gmra.mxu1 %vm1255_vm3, %v3882_v29 }
0x233b   : > { %5618 = vmatprep.mubr.msk.bf16.mxu1 %vm6014_vm1, %v6013_v1 }
0x23fa   : > { %v3924_v30 = vpop.f32.mrf.mxu1 }
0x23fb   : > { %v3931_v31 = vmul.f32 0.35355338, %v3924_v30 }
0x23fc   : > { %v5614_v33 = vpop.f32.mrf.mxu1 }
0x23fd   : > { %v3933_v34 = vadd.f32 %v6764_v57, %v3931_v31 }
0x23fe   : > { %v3927_v35 = vpop.f32.mrf.mxu1 }
0x23ff   : > { %v3932_v36 = vmul.f32 0.35355338, %v3927_v35  ;;  %v3935_v2 = vsel %vm1307_vm4, %v3933_v34, -inf }
0x2400   : > { %3936 = vmax.xlane.f32.xlu0 %v3935_v2  ;;  %v5615_v59 = vpop.f32.mrf.mxu1 }
0x2401   : > { %v3934_v40 = vadd.f32 %v6764_v57, %v3932_v36 }
0x2403   : > { %v3938_v37 = vsel %vm1307_vm4, %v3934_v40, -inf }
0x2404   : > { %3939 = vmax.xlane.f32.xlu1 %v3938_v37 }
0x2489   : > { %v3937_v38 = vpop.xlane.xlu0 %3936 }
0x248a   : > { %v3941_v41 = vsub.f32 %v3933_v34, %v3937_v38 }
0x248c   : > { %v3943_v39 = vmul.f32 1.442695, %v3941_v41 }
0x248d   : > { %v3940_v62 = vpop.xlane.xlu1 %3939 }
0x248e   : > { %5930 = vpow2.f32 %v3943_v39  ;;  %v3942_v43 = vsub.f32 %v3934_v40, %v3940_v62 }
0x2490   : > { %v3945_v42 = vmul.f32 1.442695, %v3942_v43 }
0x2492   : > { %5932 = vpow2.f32 %v3945_v42 }
0x249b   : > { %v5931_v45 = vpop.eup %5930 }
0x249c   : > { %v3947_v44 = vsel %vm1307_vm4, %v5931_v45, 0.0 }
0x249d   : > { %3948 = vadd.xlane.f32.xlu0 %v3947_v44 }
0x249f   : > { %v5933_v46 = vpop.eup %5932 }
0x24a0   : > { %v3950_v47 = vsel %vm1307_vm4, %v5933_v46, 0.0 }
0x24a1   : > { %3951 = vadd.xlane.f32.xlu1 %v3950_v47 }
0x24b2   : > { %4011 = vrot.lane.b32.xlu1 %v6754_v20, %s7040_s21 }
0x24b3   : > { %3959 = vrot.lane.b32.xlu0 %v6754_v20, %s7038_s22 }
0x24b6   : > { %4009 = vrot.lane.b32.xlu1 %v3882_v29, %s7040_s21  ;;  %s7048_s21 = sld [smem:[#allocation27_spill]] }
0x24b7   : > { %4146 = vrot.lane.b32.xlu0 %v6754_v20, %s7044_s14 }
0x24ba   : > { %4144 = vrot.lane.b32.xlu1 %v3882_v29, %s7044_s14 }
0x24bb   : > { %4281 = vrot.lane.b32.xlu0 %v6754_v20, %s7043_s19 }
0x24be   : > { %4279 = vrot.lane.b32.xlu1 %v3882_v29, %s7043_s19  ;;  %s7050_s19 = sld [smem:[#allocation31_spill]] }
0x24c4   : > { %s7052_s23 = sshll.u32 %s7050_s19, 4 }
0x2526   : > { %v3949_v48 = vpop.xlane.xlu0 %3948 }
0x2527   : > { %5934 = vrcp.f32 %v3949_v48 }
0x252a   : > { %v3960_v49 = vpop.permute.xlu0 %3959  ;;  %v3952_v50 = vpop.xlane.xlu1 %3951 }
0x252b   : > { %5936 = vrcp.f32 %v3952_v50  ;;  %5617 = vmatpush3.bf16.msra.mxu1 %v3960_v49 }
0x252c   : > { %5622 = vmatprep.subr.bf16.mxu1 %v6013_v1 }
0x252e   : > { %v4147_v52 = vpop.permute.xlu0 %4146  ;;  %v4012_v54 = vpop.permute.xlu1 %4011 }
0x252f   : > { %v4152_v55 = vsel %vm1255_vm3, %v4147_v52, 0  ;;  %v4017_v5 = vsel %vm1255_vm3, %v4012_v54, 0 }
0x2530   : > { %5635 = vmatpush3.bf16.xpose.msra.mxu0 %v4152_v55 }
0x2531   : > { %5646 = vmatprep.subr.bf16.mxu0 %v6013_v1 }
0x2532   : > { %v4010_v32 = vpop.permute.xlu1 %4009  ;;  %v4282_v56 = vpop.permute.xlu0 %4281 }
0x2533   : > { %v4287_v60 = vsel %vm1255_vm3, %v4282_v56, 0 }
0x2534   : > { %v5935_v51 = vpop.eup %5934 }
0x2535   : > { %v3955_v61 = vmul.f32 %v5935_v51, %v5931_v45 }
0x2536   : > { %v4145_v58 = vpop.permute.xlu1 %4144 }
0x2537   : > { %5637 = vmatmul.mubr.msk.bf16.vlgmr.msra.gmra.mxu0 %vm1255_vm3, %v4145_v58 }
0x2538   : > { %v5937_v53 = vpop.eup %5936  ;;  %5647 = vmatpush3.bf16.xpose.msra.mxu0 %v4287_v60  ;;  %5648 = vmatprep.mubr.msk.bf16.mxu0 %vm6014_vm1, %v6013_v1 }
0x2539   : > { %v3956_v63 = vmul.f32 %v5937_v53, %v5933_v46  ;;  %5658 = vmatprep.subr.bf16.mxu0 %v6013_v1 }
0x253a   : > { %v4280_v6 = vpop.permute.xlu1 %4279 }
0x253b   : > { %v3957_v0 = vpack.c.bf16 %v3956_v63, %v3955_v61 }
0x253d   : > { %5619 = vmatmul.mubr.msk.bf16.vlgmr.msra.gmra.mxu1 %vm1307_vm4, %v3957_v0 }
0x253e   : > { %5623 = vmatpush3.bf16.xpose.msra.mxu1 %v4017_v5  ;;  %5624 = vmatprep.mubr.msk.bf16.mxu1 %vm6014_vm1, %v6013_v1 }
0x253f   : > { %5649 = vmatmul.mubr.msk.bf16.vlgmr.msra.gmra.mxu0 %vm1255_vm3, %v4280_v6  ;;  %5628 = vmatprep.subr.bf16.mxu1 %v6013_v1 }
0x2540   : > { %5662 = vmatprep.mubr.msk.bf16.mxu0 %vm6014_vm1, %v6013_v1 }
0x2545   : > { %5625 = vmatmul.mubr.msk.bf16.vlgmr.msra.gmra.mxu1 %vm1255_vm3, %v4010_v32 }
0x2546   : > { %5630 = vmatprep.mubr.msk.bf16.mxu1 %vm6014_vm1, %v6013_v1 }
0x25f7   : > { %v4188_v7 = vpop.f32.mrf.mxu0 }
0x25f8   : > { %v4195_v4 = vmul.f32 0.35355338, %v4188_v7 }
0x25f9   : > { %v5638_v8 = vpop.f32.mrf.mxu0 }
0x25fa   : > { %v4197_v24 = vadd.f32 %v6764_v57, %v4195_v4 }
0x25fb   : > { %v4191_v9 = vpop.f32.mrf.mxu0 }
0x25fc   : > { %v4196_v26 = vmul.f32 0.35355338, %v4191_v9  ;;  %v4199_v34 = vsel %vm1307_vm4, %v4197_v24, -inf }
0x25fd   : > { %v3999_v10 = vpop.f32.mrf.mxu1  ;;  %v5639_v11 = vpop.f32.mrf.mxu0 }
0x25fe   : > { %4006 = vst.msk [vmem:[#allocation2] sm:$0xff] %vm1255_vm3, %v3999_v10  ;;  %v4198_v35 = vadd.f32 %v6764_v57, %v4196_v26 }
0x25ff   : > { %v5620_v3 = vpop.f32.mrf.mxu1  ;;  %v4323_v14 = vpop.f32.mrf.mxu0 }
0x2600   : > { %v4330_v28 = vmul.f32 0.35355338, %v4323_v14  ;;  %v4202_v37 = vsel %vm1307_vm4, %v4198_v35, -inf }
0x2601   : > { %v4002_v15 = vpop.f32.mrf.mxu1  ;;  %v5650_v16 = vpop.f32.mrf.mxu0 }
0x2602   : > { %4007 = vst.msk [vmem:[#allocation2 + $0x8] sm:$0xff] %vm1255_vm3, %v4002_v15  ;;  %v4332_v36 = vadd.f32 %v6764_v57, %v4330_v28 }
0x2603   : > { %v5621_v17 = vpop.f32.mrf.mxu1  ;;  %v4326_v18 = vpop.f32.mrf.mxu0 }
0x2604   : > { %v4331_v2 = vmul.f32 0.35355338, %v4326_v18  ;;  %v4334_v38 = vsel %vm1307_vm4, %v4332_v36, -inf }
0x2605   : > { %v4053_v19 = vpop.f32.mrf.mxu1  ;;  %v5651_v21 = vpop.f32.mrf.mxu0 }
0x2606   : > { %v4060_v25 = vmul.f32 0.35355338, %v4053_v19  ;;  %v4333_v40 = vadd.f32 %v6764_v57, %v4331_v2  ;;  %v5802_v2 = vld [vmem:[%s7024_s15 + $0x18] sm:$0xff]  }
0x2607   : > { %v5626_v22 = vpop.f32.mrf.mxu1 }
0x2608   : > { %v4062_v23 = vadd.f32 %v6764_v57, %v4060_v25  ;;  %v4337_v41 = vsel %vm1307_vm4, %v4333_v40, -inf }
0x2609   : > { %v4056_v27 = vpop.f32.mrf.mxu1 }
0x260a   : > { %v4061_v29 = vmul.f32 0.35355338, %v4056_v27  ;;  %v4064_v30 = vsel %vm1307_vm4, %v4062_v23, -inf }
0x260b   : > { %4065 = vmax.xlane.f32.xlu0 %v4064_v30  ;;  %v5627_v31 = vpop.f32.mrf.mxu1 }
0x260c   : > { %v4063_v33 = vadd.f32 %v6764_v57, %v4061_v29 }
0x260e   : > { %v4067_v59 = vsel %vm1307_vm4, %v4063_v33, -inf }
0x260f   : > { %4200 = vmax.xlane.f32.xlu0 %v4199_v34  ;;  %4068 = vmax.xlane.f32.xlu1 %v4067_v59 }
0x2613   : > { %4203 = vmax.xlane.f32.xlu0 %v4202_v37  ;;  %4335 = vmax.xlane.f32.xlu1 %v4334_v38 }
0x2617   : > { %4338 = vmax.xlane.f32.xlu0 %v4337_v41 }
0x2694   : > { %v4066_v39 = vpop.xlane.xlu0 %4065 }
0x2695   : > { %v4070_v46 = vsub.f32 %v4062_v23, %v4066_v39  ;;  %v5803_v39 = vld [vmem:[%s7024_s15 + $0x10] sm:$0xff]  }
0x2697   : > { %v4072_v55 = vmul.f32 1.442695, %v4070_v46 }
0x2698   : > { %v4201_v62 = vpop.xlane.xlu0 %4200  ;;  %v4069_v43 = vpop.xlane.xlu1 %4068 }
0x2699   : > { %v4205_v42 = vsub.f32 %v4197_v24, %v4201_v62  ;;  %v4071_v44 = vsub.f32 %v4063_v33, %v4069_v43  ;;  %v4444_v43 = vsel %vm1084_vm2, %v5803_v39, 0 }
0x269b   : > { %v4207_v45 = vmul.f32 1.442695, %v4205_v42  ;;  %v4074_v50 = vmul.f32 1.442695, %v4071_v44 }
0x269c   : > { %v4204_v47 = vpop.xlane.xlu0 %4203  ;;  %v4336_v48 = vpop.xlane.xlu1 %4335 }
0x269d   : > { %5938 = vpow2.f32 %v4207_v45  ;;  %v4206_v57 = vsub.f32 %v4198_v35, %v4204_v47  ;;  %v4340_v49 = vsub.f32 %v4332_v36, %v4336_v48 }
0x269f   : > { %v4209_v52 = vmul.f32 1.442695, %v4206_v57  ;;  %v4342_v54 = vmul.f32 1.442695, %v4340_v49 }
0x26a0   : > { %v4339_v32 = vpop.xlane.xlu0 %4338 }
0x26a1   : > { %5940 = vpow2.f32 %v4209_v52  ;;  %v4341_v56 = vsub.f32 %v4333_v40, %v4339_v32  ;;  %v4447_v40 = vsel %vm1084_vm2, %v5802_v2, 0  ;;  %v5152_v2 = vld [vmem:[%s7031_s13 + $0x1] ss:$0 sm:$0xff] }
0x26a2   : > { %5942 = vpow2.f32 %v4342_v54  ;;  %5659 = vmatpush3.bf16.xpose.msra.mxu0 %v4447_v40 }
0x26a3   : > { %5944 = vpow2.f32 %v4074_v50  ;;  %v4344_v51 = vmul.f32 1.442695, %v4341_v56  ;;  %5660 = vmatprep.subr.bf16.mxu0 %v6013_v1 }
0x26a4   : > { %5946 = vpow2.f32 %v4072_v55 }
0x26a5   : > { %5948 = vpow2.f32 %v4344_v51 }
0x26aa   : > { %v5939_v58 = vpop.eup %5938  ;;  %5661 = vmatpush3.bf16.xpose.msra.mxu0 %v4444_v43 }
0x26ab   : > { %v4211_v60 = vsel %vm1307_vm4, %v5939_v58, 0.0  ;;  %5678 = vmatprep.subr.bf16.mxu0 %v6013_v1 }
0x26ac   : > { %4212 = vadd.xlane.f32.xlu1 %v4211_v60 }
0x26ae   : > { %v5941_v53 = vpop.eup %5940 }
0x26af   : > { %v5943_v61 = vpop.eup %5942  ;;  %v4214_v63 = vsel %vm1307_vm4, %v5941_v53, 0.0 }
0x26b0   : > { %v5945_v0 = vpop.eup %5944  ;;  %4215 = vadd.xlane.f32.xlu0 %v4214_v63  ;;  %v4346_v5 = vsel %vm1307_vm4, %v5943_v61, 0.0 }
0x26b1   : > { %v5947_v6 = vpop.eup %5946  ;;  %4347 = vadd.xlane.f32.xlu1 %v4346_v5  ;;  %v4079_v7 = vsel %vm1307_vm4, %v5945_v0, 0.0 }
0x26b2   : > { %v5949_v8 = vpop.eup %5948  ;;  %v4076_v9 = vsel %vm1307_vm4, %v5947_v6, 0.0 }
0x26b3   : > { %v4349_v10 = vsel %vm1307_vm4, %v5949_v8, 0.0 }
0x26b4   : > { %4080 = vadd.xlane.f32.xlu0 %v4079_v7 }
0x26b5   : > { %4077 = vadd.xlane.f32.xlu1 %v4076_v9 }
0x26b8   : > { %4350 = vadd.xlane.f32.xlu0 %v4349_v10  ;;  %v5804_v10 = vld [vmem:[%s7029_s8 + $0x38] sm:$0xff]  }
0x26c6   : > { %4087 = vrot.lane.b32.xlu1 %v6754_v20, %s7023_s18 }
0x26ca   : > { %4357 = vrot.lane.b32.xlu1 %v6754_v20, %s7022_s16 }
0x26ce   : > { %4222 = vrot.lane.b32.xlu0 %v6754_v20, %s7042_s17  ;;  %s7047_s17 = sld [smem:[#allocation26_spill]] }
0x2735   : > { %v4213_v11 = vpop.xlane.xlu1 %4212 }
0x2739   : > { %v4216_v3 = vpop.xlane.xlu0 %4215 }
0x273a   : > { %v4348_v14 = vpop.xlane.xlu1 %4347 }
0x273d   : > { %v4081_v15 = vpop.xlane.xlu0 %4080 }
0x273e   : > { %5950 = vrcp.f32 %v4081_v15  ;;  %v4078_v16 = vpop.xlane.xlu1 %4077 }
0x273f   : > { %5952 = vrcp.f32 %v4078_v16 }
0x2740   : > { %5954 = vrcp.f32 %v4216_v3 }
0x2741   : > { %5956 = vrcp.f32 %v4213_v11  ;;  %v4351_v18 = vpop.xlane.xlu0 %4350  ;;  %v4589_v11 = vsel %vm1084_vm2, %v5804_v10, 0 }
0x2742   : > { %v4088_v17 = vpop.permute.xlu1 %4087  ;;  %5958 = vrcp.f32 %v4351_v18 }
0x2743   : > { %5629 = vmatpush3.bf16.msra.mxu1 %v4088_v17  ;;  %5960 = vrcp.f32 %v4348_v14 }
0x2744   : > { %5640 = vmatprep.subr.bf16.mxu1 %v6013_v1 }
0x2745   : > { %v4223_v23 = vpop.permute.xlu0 %4222 }
0x2746   : > { %v4358_v30 = vpop.permute.xlu1 %4357 }
0x274b   : > { %v5951_v4 = vpop.eup %5950 }
0x274c   : > { %v5953_v19 = vpop.eup %5952  ;;  %v4085_v21 = vmul.f32 %v5951_v4, %v5945_v0 }
0x274d   : > { %v4084_v20 = vmul.f32 %v5953_v19, %v5947_v6  ;;  %v5955_v22 = vpop.eup %5954 }
0x274e   : > { %v5957_v24 = vpop.eup %5956  ;;  %v4220_v26 = vmul.f32 %v5955_v22, %v5941_v53 }
0x274f   : > { %v4086_v25 = vpack.c.bf16 %v4085_v21, %v4084_v20  ;;  %v4219_v27 = vmul.f32 %v5957_v24, %v5939_v58  ;;  %v5959_v29 = vpop.eup %5958  ;;  %v5146_v58 = vld [vmem:[%s7028_s5 + $0x1] ss:$0 sm:$0xff]  ;;  %v5805_v21 = vld [vmem:[%s7029_s8 + $0x30] sm:$0xff]  }
0x2750   : > { %v5961_v31 = vpop.eup %5960  ;;  %v4355_v33 = vmul.f32 %v5959_v29, %v5949_v8  ;;  %v4586_v20 = vsel %vm1084_vm2, %v5805_v21, 0 }
0x2751   : > { %5631 = vmatmul.mubr.msk.bf16.vlgmr.msra.gmra.mxu1 %vm1307_vm4, %v4086_v25  ;;  %v4221_v28 = vpack.c.bf16 %v4220_v26, %v4219_v27  ;;  %v4354_v34 = vmul.f32 %v5961_v31, %v5943_v61  ;;  %v5806_v25 = vld [vmem:[%s7029_s8 + $0x28] sm:$0xff]   ;;  %v5808_v26 = vld [vmem:[%s7030_s9 + $0x18] sm:$0xff]  }
0x2752   : > { %5641 = vmatpush3.bf16.msra.mxu1 %v4223_v23  ;;  %5642 = vmatprep.mubr.msk.bf16.mxu1 %vm6014_vm1, %v6013_v1  ;;  %v4583_v22 = vsel %vm1084_vm2, %v5806_v25, 0  ;;  %v5807_v23 = vld [vmem:[%s7029_s8 + $0x20] sm:$0xff]   ;;  %v4665_v27 = vsel %vm2851_vm8, %v5808_v26, 0 }
0x2753   : > { %5652 = vmatprep.subr.bf16.mxu1 %v6013_v1  ;;  %v4356_v35 = vpack.c.bf16 %v4355_v33, %v4354_v34  ;;  %v4580_v24 = vsel %vm1084_vm2, %v5807_v23, 0 }
0x2759   : > { %5643 = vmatmul.mubr.msk.bf16.vlgmr.msra.gmra.mxu1 %vm1307_vm4, %v4221_v28 }
0x275a   : > { %5653 = vmatpush3.bf16.msra.mxu1 %v4358_v30  ;;  %5654 = vmatprep.mubr.msk.bf16.mxu1 %vm6014_vm1, %v6013_v1 }
0x275b   : > { %5666 = vmatprep.subr.bf16.mxu1 %v6013_v1 }
0x2761   : > { %5655 = vmatmul.mubr.msk.bf16.vlgmr.msra.gmra.mxu1 %vm1307_vm4, %v4356_v35 }
0x2762   : > { %5674 = vmatprep.mubr.msk.bf16.mxu1 %vm6014_vm1, %v6013_v1  ;;  %5667 = vmatpush3.bf16.xpose.msra.mxu1 %v4589_v11  ;;  %v5812_v11 = vld [vmem:[%s6182_s4 + $0x28] sm:$0xff]  }
0x2763   : > { %5668 = vmatprep.subr.bf16.mxu1 %v6013_v1 }
0x276a   : > { %5669 = vmatpush3.bf16.xpose.msra.mxu1 %v4586_v20 }
0x276b   : > { %5670 = vmatprep.subr.bf16.mxu1 %v6013_v1 }
0x2772   : > { %5671 = vmatpush3.bf16.xpose.msra.mxu1 %v4583_v22 }
0x2773   : > { %5672 = vmatprep.subr.bf16.mxu1 %v6013_v1 }
0x277a   : > { %5673 = vmatpush3.bf16.xpose.msra.mxu1 %v4580_v24  ;;  %v5815_v24 = vld [vmem:[%s6182_s4 + $0x10] sm:$0xff]  }
0x277b   : > { %v4830_v26 = vsel %vm1084_vm2, %v5815_v24, 0 }
0x2811   : > { %v4127_v36 = vpop.f32.mrf.mxu1 }
0x2812   : > { %4136 = vrot.lane.b32.xlu1 %v4127_v36, %s7025_s7 }
0x2813   : > { %v5632_v59 = vpop.f32.mrf.mxu1 }
0x2815   : > { %v4130_v37 = vpop.f32.mrf.mxu1 }
0x2816   : > { %4138 = vrot.lane.b32.xlu0 %v4130_v37, %s7025_s7 }
0x2817   : > { %v5633_v38 = vpop.f32.mrf.mxu1 }
0x2818   : > { %v5153_v38 = vld [vmem:[%s7032_s25 + $0x1] ss:$0 sm:$0xff] }
0x2819   : > { %v4262_v41 = vpop.f32.mrf.mxu1 }
0x281a   : > { %4271 = vrot.lane.b32.xlu1 %v4262_v41, %s7026_s28 }
0x281b   : > { %v5644_v62 = vpop.f32.mrf.mxu1 }
0x281d   : > { %v4265_v42 = vpop.f32.mrf.mxu1 }
0x281e   : > { %4273 = vrot.lane.b32.xlu0 %v4265_v42, %s7026_s28  ;;  %v5809_v42 = vld [vmem:[%s7030_s9 + $0x10] sm:$0xff]   ;;  %s978_s28 = scalar_lea.vmem %s7051_s27, %s7052_s23 }
0x281f   : > { %v5645_v45 = vpop.f32.mrf.mxu1 }
0x2820   : > { %v4662_v45 = vsel %vm2851_vm8, %v5809_v42, 0 }
0x2821   : > { %v4397_v44 = vpop.f32.mrf.mxu1 }
0x2822   : > { %4406 = vrot.lane.b32.xlu1 %v4397_v44, %s7027_s3  ;;  %v5163_v44 = vld [vmem:[%s7033_s29 + $0x1] ss:$0 sm:$0xff] }
0x2823   : > { %v5656_v46 = vpop.f32.mrf.mxu1 }
0x2825   : > { %v4400_v47 = vpop.f32.mrf.mxu1 }
0x2826   : > { %4408 = vrot.lane.b32.xlu0 %v4400_v47, %s7027_s3  ;;  %s7049_s3 = sld [smem:[#allocation28_spill]] }
0x2827   : > { %v5657_v48 = vpop.f32.mrf.mxu1 }
0x2884   : > { %v4137_v57 = vpop.permute.xlu1 %4136 }
0x2885   : > { %4142 = vst.msk [vmem:[#allocation2] sm:$0xff] %vm1513_vm5, %v4137_v57 }
0x2888   : > { %v4139_v49 = vpop.permute.xlu0 %4138 }
0x2889   : > { %4143 = vst.msk [vmem:[#allocation2 + $0x8] sm:$0xff] %vm1513_vm5, %v4139_v49 }
0x288c   : > { %v4272_v50 = vpop.permute.xlu1 %4271 }
0x288d   : > { %4277 = vst.msk [vmem:[#allocation2] sm:$0xff] %vm1649_vm6, %v4272_v50 }
0x2890   : > { %v4274_v52 = vpop.permute.xlu0 %4273 }
0x2891   : > { %4278 = vst.msk [vmem:[#allocation2 + $0x8] sm:$0xff] %vm1649_vm6, %v4274_v52 }
0x2894   : > { %v4407_v54 = vpop.permute.xlu1 %4406 }
0x2895   : > { %4412 = vst.msk [vmem:[#allocation2] sm:$0xff] %vm1785_vm7, %v4407_v54 }
0x2898   : > { %v4409_v55 = vpop.permute.xlu0 %4408 }
0x2899   : > { %4413 = vst.msk [vmem:[#allocation2 + $0x8] sm:$0xff] %vm1785_vm7, %v4409_v55 }
0x289c   : > { %v4414_v32 = vld [vmem:[#allocation2] sm:$0xff] }
0x28a0   : > { %v4415_v56 = vld [vmem:[#allocation2 + $0x8] sm:$0xff] }
0x28a1   : > { %v4423_v51 = vpack.c.bf16 %v4415_v56, %v4414_v32  ;;  %v5174_v32 = vld [vmem:[%s7035_s20 + $0x1] ss:$0 sm:$0xff] }
0x28a3   : > { %5663 = vmatmul.mubr.msk.bf16.vlgmr.msra.gmra.mxu0 %vm1084_vm2, %v4423_v51 }
0x28a4   : > { %5682 = vmatprep.mubr.msk.bf16.mxu0 %vm6014_vm1, %v6013_v1  ;;  %5679 = vmatpush3.bf16.xpose.msra.mxu0 %v4665_v27  ;;  %v5816_v27 = vld [vmem:[%s6182_s4 + $0x8] sm:$0xff]  }
0x28a5   : > { %5680 = vmatprep.subr.bf16.mxu0 %v6013_v1 }
0x28ac   : > { %5681 = vmatpush3.bf16.xpose.msra.mxu0 %v4662_v45 }
0x28ad   : > { %5686 = vmatprep.subr.bf16.mxu0 %v6013_v1 }
0x2963   : > { %v4483_v60 = vpop.f32.mrf.mxu0 }
0x2964   : > { %v4484_v53 = vadd.f32 %v5146_v58, %v4483_v60 }
0x2965   : > { %v5664_v61 = vpop.f32.mrf.mxu0 }
0x2966   : > { %v4490_v63 = vadd.f32 %v4484_v53, %v6744_v12 }
0x2967   : > { %v4486_v0 = vpop.f32.mrf.mxu0 }
0x2968   : > { %v4487_v5 = vadd.f32 %v5146_v58, %v4486_v0  ;;  %v4496_v6 = vsel %vm1084_vm2, %v4490_v63, 0.0 }
0x2969   : > { %4497 = vadd.xlane.f32.xlu1 %v4496_v6  ;;  %v5665_v7 = vpop.f32.mrf.mxu0 }
0x296a   : > { %v4491_v8 = vadd.f32 %v4487_v5, %v6746_v13  ;;  %v5810_v7 = vld [vmem:[%s6182_s4 + $0x38] sm:$0xff]  }
0x296c   : > { %v4499_v9 = vsel %vm1084_vm2, %v4491_v8, 0.0 }
0x296d   : > { %4500 = vadd.xlane.f32.xlu0 %v4499_v9  ;;  %v5811_v9 = vld [vmem:[%s6182_s4 + $0x30] sm:$0xff]  }
0x296e   : > { %v4842_v10 = vsel %vm1084_vm2, %v5811_v9, 0 }
0x29f2   : > { %v4498_v3 = vpop.xlane.xlu1 %4497 }
0x29f3   : > { %v4502_v12 = vmul.f32 0.03125, %v4498_v3  ;;  %v4839_v3 = vsel %vm1084_vm2, %v5812_v11, 0 }
0x29f5   : > { %v4504_v14 = vsub.f32 %v4490_v63, %v4502_v12  ;;  %v5813_v12 = vld [vmem:[%s6182_s4 + $0x20] sm:$0xff]  }
0x29f6   : > { %v4501_v15 = vpop.xlane.xlu0 %4500 }
0x29f7   : > { %v4503_v16 = vmul.f32 0.03125, %v4501_v15  ;;  %v4506_v17 = vmul.f32 %v4504_v14, %v4504_v14  ;;  %v5814_v15 = vld [vmem:[%s6182_s4 + $0x18] sm:$0xff]  }
0x29f9   : > { %v4505_v18 = vsub.f32 %v4491_v8, %v4503_v16  ;;  %v4508_v13 = vsel %vm1084_vm2, %v4506_v17, 0.0  ;;  %v4845_v8 = vsel %vm1084_vm2, %v5810_v7, 0  ;;  %v4833_v16 = vsel %vm1084_vm2, %v5814_v15, 0 }
0x29fa   : > { %4509 = vadd.xlane.f32.xlu0 %v4508_v13 }
0x29fb   : > { %v4507_v4 = vmul.f32 %v4505_v18, %v4505_v18 }
0x29fd   : > { %v4511_v19 = vsel %vm1084_vm2, %v4507_v4, 0.0 }
0x29fe   : > { %4512 = vadd.xlane.f32.xlu1 %v4511_v19 }
0x2a83   : > { %v4510_v28 = vpop.xlane.xlu0 %4509 }
0x2a84   : > { %v4514_v29 = vmul.f32 0.03125, %v4510_v28  ;;  %v4827_v28 = vsel %vm1084_vm2, %v5816_v27, 0 }
0x2a86   : > { %v4516_v30 = vadd.f32 1e-05, %v4514_v29  ;;  %v5817_v29 = vld [vmem:[%s6182_s4] sm:$0xff]  }
0x2a87   : > { %v4513_v31 = vpop.xlane.xlu1 %4512 }
0x2a88   : > { %5962 = vrsqrt.f32 %v4516_v30  ;;  %v4515_v33 = vmul.f32 0.03125, %v4513_v31  ;;  %v4824_v30 = vsel %vm1084_vm2, %v5817_v29, 0 }
0x2a8a   : > { %v4517_v34 = vadd.f32 1e-05, %v4515_v33 }
0x2a8c   : > { %5964 = vrsqrt.f32 %v4517_v34 }
0x2a95   : > { %v5963_v35 = vpop.eup %5962 }
0x2a96   : > { %v4520_v36 = vmul.f32 %v5963_v35, %v4504_v14  ;;  %v4836_v14 = vsel %vm1084_vm2, %v5813_v12, 0 }
0x2a98   : > { %v4528_v40 = vmul.f32 %v5152_v2, %v4520_v36 }
0x2a99   : > { %v5965_v59 = vpop.eup %5964 }
0x2a9a   : > { %v4521_v37 = vmul.f32 %v5965_v59, %v4505_v18  ;;  %v4536_v39 = vadd.f32 %v5153_v38, %v4528_v40 }
0x2a9c   : > { %v4529_v41 = vmul.f32 %v5152_v2, %v4521_v37  ;;  %v5180_v37 = vld [vmem:[%s7047_s17 + $0x1] ss:$0 sm:$0xff] }
0x2a9e   : > { %v4537_v62 = vadd.f32 %v5153_v38, %v4529_v41 }
0x2aa0   : > { %v4549_v43 = vpack.c.bf16 %v4537_v62, %v4536_v39 }
0x2aa2   : > { %5675 = vmatmul.mubr.msk.bf16.vlgmr.msra.gmra.mxu1 %vm1084_vm2, %v4549_v43 }
0x2b62   : > { %v4625_v46 = vpop.f32.mrf.mxu1 }
0x2b63   : > { %v4626_v48 = vadd.f32 %v5163_v44, %v4625_v46 }
0x2b64   : > { %v5676_v47 = vpop.f32.mrf.mxu1 }
0x2b65   : > { %v4632_v52 = vmax.f32 %v4626_v48, 0.0 }
0x2b66   : > { %v4628_v57 = vpop.f32.mrf.mxu1 }
0x2b67   : > { %v4629_v49 = vadd.f32 %v5163_v44, %v4628_v57  ;;  %v5182_v44 = vld [vmem:[%s7049_s3] ss:$0 sm:$0xff] }
0x2b68   : > { %v5677_v50 = vpop.f32.mrf.mxu1 }
0x2b69   : > { %v4633_v54 = vmax.f32 %v4629_v49, 0.0 }
0x2b6b   : > { %v4641_v55 = vpack.c.bf16 %v4633_v54, %v4632_v52 }
0x2b6d   : > { %5683 = vmatmul.mubr.msk.bf16.vlgmr.msra.gmra.mxu0 %vm2851_vm8, %v4641_v55 }
0x2b6e   : > { %5702 = vmatprep.mubr.msk.bf16.mxu0 %vm6014_vm1, %v6013_v1  ;;  %5687 = vmatpush3.bf16.xpose.msra.mxu0 %v4845_v8 }
0x2b6f   : > { %5688 = vmatprep.subr.bf16.mxu0 %v6013_v1 }
0x2b76   : > { %5689 = vmatpush3.bf16.xpose.msra.mxu0 %v4842_v10 }
0x2b77   : > { %5690 = vmatprep.subr.bf16.mxu0 %v6013_v1 }
0x2b7e   : > { %5691 = vmatpush3.bf16.xpose.msra.mxu0 %v4839_v3 }
0x2b7f   : > { %5692 = vmatprep.subr.bf16.mxu0 %v6013_v1 }
0x2b86   : > { %5693 = vmatpush3.bf16.xpose.msra.mxu0 %v4836_v14 }
0x2b87   : > { %5694 = vmatprep.subr.bf16.mxu0 %v6013_v1 }
0x2b8e   : > { %5695 = vmatpush3.bf16.xpose.msra.mxu0 %v4833_v16 }
0x2b8f   : > { %5696 = vmatprep.subr.bf16.mxu0 %v6013_v1 }
0x2b96   : > { %5697 = vmatpush3.bf16.xpose.msra.mxu0 %v4830_v26 }
0x2b97   : > { %5698 = vmatprep.subr.bf16.mxu0 %v6013_v1 }
0x2b9e   : > { %5699 = vmatpush3.bf16.xpose.msra.mxu0 %v4827_v28 }
0x2b9f   : > { %5700 = vmatprep.subr.bf16.mxu0 %v6013_v1 }
0x2ba6   : > { %5701 = vmatpush3.bf16.xpose.msra.mxu0 %v4824_v30 }
0x2c2d   : > { %v4701_v56 = vpop.f32.mrf.mxu0 }
0x2c2e   : > { %v4702_v51 = vadd.f32 %v5174_v32, %v4701_v56 }
0x2c2f   : > { %v5684_v58 = vpop.f32.mrf.mxu0 }
0x2c30   : > { %v4708_v60 = vadd.f32 %v4702_v51, %v4536_v39  ;;  %v5181_v39 = vld [vmem:[%s7048_s21 + $0x1] ss:$0 sm:$0xff] }
0x2c31   : > { %v4704_v53 = vpop.f32.mrf.mxu0 }
0x2c32   : > { %v4705_v61 = vadd.f32 %v5174_v32, %v4704_v53  ;;  %v4714_v63 = vsel %vm1084_vm2, %v4708_v60, 0.0 }
0x2c33   : > { %4715 = vadd.xlane.f32.xlu0 %v4714_v63  ;;  %v5685_v0 = vpop.f32.mrf.mxu0 }
0x2c34   : > { %v4709_v5 = vadd.f32 %v4705_v61, %v4537_v62 }
0x2c36   : > { %v4717_v6 = vsel %vm1084_vm2, %v4709_v5, 0.0 }
0x2c37   : > { %4718 = vadd.xlane.f32.xlu1 %v4717_v6 }
0x2cbc   : > { %v4716_v17 = vpop.xlane.xlu0 %4715 }
0x2cbd   : > { %v4720_v18 = vmul.f32 0.03125, %v4716_v17 }
0x2cbf   : > { %v4722_v13 = vsub.f32 %v4708_v60, %v4720_v18 }
0x2cc0   : > { %v4719_v4 = vpop.xlane.xlu1 %4718 }
0x2cc1   : > { %v4721_v19 = vmul.f32 0.03125, %v4719_v4  ;;  %v4724_v21 = vmul.f32 %v4722_v13, %v4722_v13 }
0x2cc3   : > { %v4723_v20 = vsub.f32 %v4709_v5, %v4721_v19  ;;  %v4726_v25 = vsel %vm1084_vm2, %v4724_v21, 0.0 }
0x2cc4   : > { %4727 = vadd.xlane.f32.xlu0 %v4726_v25 }
0x2cc5   : > { %v4725_v22 = vmul.f32 %v4723_v20, %v4723_v20 }
0x2cc7   : > { %v4729_v23 = vsel %vm1084_vm2, %v4725_v22, 0.0 }
0x2cc8   : > { %4730 = vadd.xlane.f32.xlu1 %v4729_v23 }
0x2d4d   : > { %v4728_v31 = vpop.xlane.xlu0 %4727 }
0x2d4e   : > { %v4732_v33 = vmul.f32 0.03125, %v4728_v31 }
0x2d50   : > { %v4734_v34 = vadd.f32 1e-05, %v4732_v33 }
0x2d51   : > { %v4731_v35 = vpop.xlane.xlu1 %4730 }
0x2d52   : > { %5966 = vrsqrt.f32 %v4734_v34  ;;  %v4733_v36 = vmul.f32 0.03125, %v4731_v35 }
0x2d54   : > { %v4735_v2 = vadd.f32 1e-05, %v4733_v36 }
0x2d56   : > { %5968 = vrsqrt.f32 %v4735_v2 }
0x2d5f   : > { %v5967_v59 = vpop.eup %5966 }
0x2d60   : > { %v4738_v40 = vmul.f32 %v5967_v59, %v4722_v13 }
0x2d62   : > { %v4746_v41 = vmul.f32 %v5180_v37, %v4738_v40 }
0x2d63   : > { %v5969_v1 = vpop.eup %5968 }
0x2d64   : > { %v4739_v38 = vmul.f32 %v5969_v1, %v4723_v20  ;;  %v4754_v43 = vadd.f32 %v5181_v39, %v4746_v41 }
0x2d66   : > { %v4747_v62 = vmul.f32 %v5180_v37, %v4739_v38 }
0x2d68   : > { %v4755_v42 = vadd.f32 %v5181_v39, %v4747_v62 }
0x2d6a   : > { %v4773_v45 = vpack.c.bf16 %v4755_v42, %v4754_v43 }
0x2d6c   : > { %5703 = vmatmul.mubr.msk.bf16.vlgmr.msra.gmra.mxu0 %vm1084_vm2, %v4773_v45 }
0x2e2c   : > { %v4881_v46 = vpop.f32.mrf.mxu0 }
0x2e2d   : > { %v4882_v47 = vadd.f32 %v5182_v44, %v4881_v46 }
0x2e2e   : > { %v5704_v48 = vpop.f32.mrf.mxu0 }
0x2e2f   : > { %4888 = vst [vmem:[%s978_s28] sm:$0xff] %v4882_v47 }
0x2e30   : > { %v4884_v57 = vpop.f32.mrf.mxu0 }
0x2e31   : > { %v4885_v49 = vadd.f32 %v5182_v44, %v4884_v57 }
0x2e32   : > { %v5705_v50 = vpop.f32.mrf.mxu0 }
0x2e33   : > { %4889 = vst [vmem:[%s978_s28 + $0x8] sm:$0xff] %v4885_v49 }
0x2e34 PF: > { %s7053_s7 = sld [smem:[#allocation30_spill]] }
0x2e3a   : > { %s73_s22 = sadd.s32 1, %s7053_s7  }
0x2e3b   : > { %p70_p4 = scmp.ge.s32.totalorder %s73_s22, 4  }
0x2e3d   :  { %72 = sbr.rel (!%p70_p4) target bundleno = 68 (0x44), region = 228 }

</bundles_post_ra>
